<compile_context>
chip_gen: v7x
topology: tpu7x:2x2x1
jax: 0.10.0
libtpu: 0.0.40
codegen_flags: <defaults>
</compile_context>

<pallas_src>
import functools

import jax
import jax.numpy as jnp
from jax.experimental import pallas as pl
from jax.experimental.pallas import tpu as pltpu


# ----------------------------------------------------------------------------
# Spectral norm (weight preprocessing, 1 power iteration like torch).
# ----------------------------------------------------------------------------
def _l2normalize(v, eps=1e-12):
    return v / (jnp.linalg.norm(v) + eps)


def _spectral_norm_weight(w, u, n_iters=1):
    w_mat = w.reshape(w.shape[0], -1)           # (C_out, C_in*kh*kw)
    u = _l2normalize(u)
    v = None
    for _ in range(n_iters):
        v = _l2normalize(w_mat.T @ u)
        u = _l2normalize(w_mat @ v)
    sigma = u @ (w_mat @ v)
    return w / sigma


# ----------------------------------------------------------------------------
# Wrapper-side layout prep (plain XLA): im2col for conv1, avgpool for skip.
# ----------------------------------------------------------------------------
def _im2col_3x3(x_nhwc):
    B, H, W, C = x_nhwc.shape
    xp = jnp.pad(x_nhwc, ((0, 0), (1, 1), (1, 1), (0, 0)))
    cols = [xp[:, dy:dy + H, dx:dx + W, :] for dy in range(3) for dx in range(3)]
    return jnp.concatenate(cols, axis=-1).reshape(B, H * W, 9 * C)


def _avgpool2_nhwc(x_nhwc):
    B, H, W, C = x_nhwc.shape
    return x_nhwc.reshape(B, H // 2, 2, W // 2, 2, C).mean(axis=(2, 4))


# ----------------------------------------------------------------------------
# VMEM budgeting helpers (rough, lane/sublane-padding aware).
# ----------------------------------------------------------------------------
def _tile_bytes(shape, itemsize):
    shape = tuple(shape)
    if len(shape) == 1:
        shape = (1,) + shape
    lead = 1
    for d in shape[:-2]:
        lead *= d
    sub = -(-shape[-2] // 8) * 8
    lane = -(-shape[-1] // 128) * 128
    return lead * sub * lane * itemsize


def _pick_batch_block(B, per_sample, fixed, budget):
    best = 1
    for bt in range(1, B + 1):
        if B % bt:
            continue
        if fixed + bt * per_sample > budget:
            continue
        if B >= 2 and B // bt < 2:
            continue       # keep >= 2 grid steps so both v7x TensorCores get work
        best = bt
    return best


# ----------------------------------------------------------------------------
# Fused Pallas kernel: one batch-block (Bt samples) per grid step.
# ----------------------------------------------------------------------------
def _disc_opt_block_kernel(xcol_ref, x0p_ref, w1_ref, b1_ref, w2_ref, b2_ref,
                           w0_ref, b0_ref, poolw_ref, o_ref, h1pad_ref,
                           *, Bt, H, W, C_in, C_out):
    f32 = jnp.float32
    bf16 = jnp.bfloat16
    Hh, Wh = H // 2, W // 2

    # ---- conv1 (3x3, pad 1): ONE bf16 matmul on the pre-im2col'd input -----
    xcol = xcol_ref[...].reshape(Bt * H * W, 9 * C_in)            # bf16
    h1 = jnp.dot(xcol, w1_ref[...], preferred_element_type=f32)
    h1 = jnp.maximum(h1 + b1_ref[...], 0.0)                       # f32 epilogue

    # ---- write h1 into the padded VMEM scratch; re-zero only the border ----
    h1pad_ref[:, 0:1, :, :] = jnp.zeros((Bt, 1, W + 2, C_out), bf16)
    h1pad_ref[:, H + 1:H + 2, :, :] = jnp.zeros((Bt, 1, W + 2, C_out), bf16)
    h1pad_ref[:, 1:H + 1, 0:1, :] = jnp.zeros((Bt, H, 1, C_out), bf16)
    h1pad_ref[:, 1:H + 1, W + 1:W + 2, :] = jnp.zeros((Bt, H, 1, C_out), bf16)
    h1pad_ref[:, 1:H + 1, 1:W + 1, :] = h1.reshape(Bt, H, W, C_out).astype(bf16)

    # ---- conv2 (3x3, pad 1): in-VMEM im2col + ONE bf16 matmul --------------
    taps = [h1pad_ref[:, dy:dy + H, dx:dx + W, :]
            for dy in range(3) for dx in range(3)]
    patches = jnp.concatenate(taps, axis=-1).reshape(Bt * H * W, 9 * C_out)
    h2 = jnp.dot(patches, w2_ref[...], preferred_element_type=f32) + b2_ref[...]

    # ---- 2x2 average pool ---------------------------------------------------
    # H direction: pair-sum via a leading-dim split (layout-safe reshape).
    h2 = h2.reshape(Bt, Hh, 2, W, C_out)
    hp = (h2[:, :, 0:1, :, :].reshape(Bt, Hh, W, C_out) +
          h2[:, :, 1:2, :, :].reshape(Bt, Hh, W, C_out))
    # W direction: tiny (W, Wh) column-pair selection matmul on a minor-
    # transposed view (cheap XLU transposes, avoids strided slicing).
    hp_t = jnp.swapaxes(hp, -1, -2).reshape(Bt * Hh * C_out, W)
    pooled = jnp.dot(hp_t, poolw_ref[...], preferred_element_type=f32)
    pooled = jnp.swapaxes(pooled.reshape(Bt, Hh, C_out, Wh), -1, -2)
    main = pooled.reshape(Bt, Hh * Wh, C_out) * 0.25

    # ---- skip branch: 1x1 conv on the wrapper-pooled input -----------------
    x0 = x0p_ref[...].reshape(Bt * Hh * Wh, C_in)                 # bf16
    skip = jnp.dot(x0, w0_ref[...], preferred_element_type=f32) + b0_ref[...]
    skip = skip.reshape(Bt, Hh * Wh, C_out)

    o_ref[...] = (main + skip).astype(o_ref.dtype)


# ----------------------------------------------------------------------------
# Wrapper
# ----------------------------------------------------------------------------
@jax.jit
def disc_opt_block(x, params):
    """x: (B, C_in, H, W) NCHW -> (B, C_out, H//2, W//2)."""
    B, C_in, H, W = x.shape
    w1 = _spectral_norm_weight(params["w1"], params["u1"])
    w2 = _spectral_norm_weight(params["w2"], params["u2"])
    w0 = _spectral_norm_weight(params["w0"], params["u0"])
    C_out = w1.shape[0]
    Hh, Wh = H // 2, W // 2
    bf16 = jnp.bfloat16

    # Column-form conv weights (tap-major, cin-minor) for single-matmul convs.
    w1col = jnp.transpose(w1, (2, 3, 1, 0)).reshape(9 * C_in, C_out).astype(bf16)
    w2col = jnp.transpose(w2, (2, 3, 1, 0)).reshape(9 * C_out, C_out).astype(bf16)
    w0col = w0.reshape(C_out, C_in).T.astype(bf16)
    b1 = params["b1"].reshape(1, C_out).astype(jnp.float32)
    b2 = params["b2"].reshape(1, C_out).astype(jnp.float32)
    b0 = params["b0"].reshape(1, C_out).astype(jnp.float32)

    # Lane-dense activations: im2col for conv1, pre-pooled x for the 1x1 skip.
    x_nhwc = jnp.transpose(x, (0, 2, 3, 1))
    xcol = _im2col_3x3(x_nhwc).astype(bf16)                       # (B, H*W, 9*C_in)
    x0p = _avgpool2_nhwc(x_nhwc).reshape(B, Hh * Wh, C_in).astype(bf16)

    # Tiny (W, Wh) column-pair selection matrix for in-kernel W pooling.
    poolw = ((jnp.arange(W)[:, None] // 2) == jnp.arange(Wh)[None, :]
             ).astype(jnp.float32)

    # ---- batch blocking & VMEM budget --------------------------------------
    per_sample = (2 * _tile_bytes((H * W, 9 * C_in), 2)        # xcol (dbuf)
                  + 2 * _tile_bytes((Hh * Wh, C_in), 2)        # x0p  (dbuf)
                  + 2 * _tile_bytes((Hh * Wh, C_out), 4)       # out  (dbuf)
                  + _tile_bytes((H + 2, W + 2, C_out), 2)      # h1pad scratch
                  + _tile_bytes((H * W, 9 * C_out), 2)         # conv2 im2col
                  + 6 * _tile_bytes((H * W, C_out), 4))        # f32 temps
    fixed = 2 * (_tile_bytes((9 * C_in, C_out), 2)
                 + _tile_bytes((9 * C_out, C_out), 2)
                 + _tile_bytes((C_in, C_out), 2)
                 + 3 * _tile_bytes((1, C_out), 4)
                 + _tile_bytes((W, Wh), 4))
    budget = 24 * 1024 * 1024          # conservative: fits v7x 64 MiB with headroom
    Bt = _pick_batch_block(B, per_sample, fixed, budget)
    vmem_limit = int(min(48 * 1024 * 1024,
                         max(32 * 1024 * 1024, 2 * (fixed + Bt * per_sample))))

    kernel = functools.partial(_disc_opt_block_kernel, Bt=Bt, H=H, W=W,
                               C_in=C_in, C_out=C_out)

    out2d = pl.pallas_call(
        kernel,
        out_shape=jax.ShapeDtypeStruct((B, Hh * Wh, C_out), x.dtype),
        grid=(B // Bt,),
        in_specs=[
            pl.BlockSpec((Bt, H * W, 9 * C_in), lambda b: (b, 0, 0)),
            pl.BlockSpec((Bt, Hh * Wh, C_in), lambda b: (b, 0, 0)),
            pl.BlockSpec((9 * C_in, C_out), lambda b: (0, 0)),
            pl.BlockSpec((1, C_out), lambda b: (0, 0)),
            pl.BlockSpec((9 * C_out, C_out), lambda b: (0, 0)),
            pl.BlockSpec((1, C_out), lambda b: (0, 0)),
            pl.BlockSpec((C_in, C_out), lambda b: (0, 0)),
            pl.BlockSpec((1, C_out), lambda b: (0, 0)),
            pl.BlockSpec((W, Wh), lambda b: (0, 0)),
        ],
        out_specs=pl.BlockSpec((Bt, Hh * Wh, C_out), lambda b: (b, 0, 0)),
        scratch_shapes=[pltpu.VMEM((Bt, H + 2, W + 2, C_out), jnp.bfloat16)],
        compiler_params=pltpu.CompilerParams(
            dimension_semantics=("parallel",),
            vmem_limit_bytes=vmem_limit),
    )(xcol, x0p, w1col, b1, w2col, b2, w0col, b0, poolw)

    out = out2d.reshape(B, Hh, Wh, C_out)
    return jnp.transpose(out, (0, 3, 1, 2))                       # NCHW


# ----------------------------------------------------------------------------
# Pure-JAX reference (mirrors the PyTorch forward exactly, f32 HIGHEST).
# ----------------------------------------------------------------------------
def _avgpool2_nchw(x):
    B, C, H, W = x.shape
    return x.reshape(B, C, H // 2, 2, W // 2, 2).mean(axis=(3, 5))


def _reference(x, params):
    w1 = _spectral_norm_weight(params["w1"], params["u1"])
    w2 = _spectral_norm_weight(params["w2"], params["u2"])
    w0 = _spectral_norm_weight(params["w0"], params["u0"])
    dn = ("NCHW", "OIHW", "NCHW")
    prec = jax.lax.Precision.HIGHEST
    h = jax.lax.conv_general_dilated(x, w1, (1, 1), ((1, 1), (1, 1)),
                                     dimension_numbers=dn, precision=prec)
    h = jnp.maximum(h + params["b1"].reshape(1, -1, 1, 1), 0.0)
    h = jax.lax.conv_general_dilated(h, w2, (1, 1), ((1, 1), (1, 1)),
                                     dimension_numbers=dn, precision=prec)
    h = h + params["b2"].reshape(1, -1, 1, 1)
    h = _avgpool2_nchw(h)
    x0 = _avgpool2_nchw(x)
    x0 = jax.lax.conv_general_dilated(x0, w0, (1, 1), ((0, 0), (0, 0)),
                                      dimension_numbers=dn, precision=prec)
    x0 = x0 + params["b0"].reshape(1, -1, 1, 1)
    return h + x0


if __name__ == "__main__":
    key = jax.random.PRNGKey(0)
    B, C_in, C_out, H, W = 2, 4, 8, 16, 16
    ks = jax.random.split(key, 10)
    x = jax.random.normal(ks[0], (B, C_in, H, W), dtype=jnp.float32)
    params = {
        "w1": 0.1 * jax.random.normal(ks[1], (C_out, C_in, 3, 3), jnp.float32),
        "b1": 0.1 * jax.random.normal(ks[2], (C_out,), jnp.float32),
        "u1": jax.random.normal(ks[3], (C_out,), jnp.float32),
        "w2": 0.1 * jax.random.normal(ks[4], (C_out, C_out, 3, 3), jnp.float32),
        "b2": 0.1 * jax.random.normal(ks[5], (C_out,), jnp.float32),
        "u2": jax.random.normal(ks[6], (C_out,), jnp.float32),
        "w0": 0.1 * jax.random.normal(ks[7], (C_out, C_in, 1, 1), jnp.float32),
        "b0": 0.1 * jax.random.normal(ks[8], (C_out,), jnp.float32),
        "u0": jax.random.normal(ks[9], (C_out,), jnp.float32),
    }

    out = jax.block_until_ready(disc_opt_block(x, params))
    ref = jax.block_until_ready(_reference(x, params))

    assert out.shape == (B, C_out, H // 2, W // 2), out.shape
    max_err = float(jnp.max(jnp.abs(out - ref)))
    # bf16 MXU feeds vs f32 HIGHEST reference -> relaxed but meaningful tolerance.
    assert jnp.allclose(out, ref, atol=2e-2, rtol=2e-2), f"mismatch, max err={max_err}"

    print("KERNEL_OK")
</pallas_src>

<mosaic_0001>
module attributes {stable_mosaic.version = 11 : i64} {
  func.func @_disc_opt_block_kernel(%arg0: i32, %arg1: memref<1x256x36xbf16, #tpu.memory_space<vmem>>, %arg2: memref<1x64x4xbf16, #tpu.memory_space<vmem>>, %arg3: memref<36x8xbf16, #tpu.memory_space<vmem>>, %arg4: memref<1x8xf32, #tpu.memory_space<vmem>>, %arg5: memref<72x8xbf16, #tpu.memory_space<vmem>>, %arg6: memref<1x8xf32, #tpu.memory_space<vmem>>, %arg7: memref<4x8xbf16, #tpu.memory_space<vmem>>, %arg8: memref<1x8xf32, #tpu.memory_space<vmem>>, %arg9: memref<16x8xf32, #tpu.memory_space<vmem>>, %arg10: memref<1x64x8xf32, #tpu.memory_space<vmem>>, %arg11: memref<1x18x18x8xbf16, #tpu.memory_space<vmem>>) attributes {dimension_semantics = [#tpu.dimension_semantics<parallel>], iteration_bounds = array<i64: 2>, scalar_prefetch = 0 : i64, scratch_operands = 1 : i64, tpu.core_type = #tpu.core_type<tc>, window_params = [{transform_indices = @transform_0, window_bounds = array<i64: 1, 256, 36>}, {transform_indices = @transform_1, window_bounds = array<i64: 1, 64, 4>}, {pipeline_mode = #tpu.pipeline_mode<synchronous>, transform_indices = @transform_2, window_bounds = array<i64: 36, 8>}, {pipeline_mode = #tpu.pipeline_mode<synchronous>, transform_indices = @transform_3, window_bounds = array<i64: 1, 8>}, {pipeline_mode = #tpu.pipeline_mode<synchronous>, transform_indices = @transform_4, window_bounds = array<i64: 72, 8>}, {pipeline_mode = #tpu.pipeline_mode<synchronous>, transform_indices = @transform_5, window_bounds = array<i64: 1, 8>}, {pipeline_mode = #tpu.pipeline_mode<synchronous>, transform_indices = @transform_6, window_bounds = array<i64: 4, 8>}, {pipeline_mode = #tpu.pipeline_mode<synchronous>, transform_indices = @transform_7, window_bounds = array<i64: 1, 8>}, {pipeline_mode = #tpu.pipeline_mode<synchronous>, transform_indices = @transform_8, window_bounds = array<i64: 16, 8>}, {transform_indices = @transform_9, window_bounds = array<i64: 1, 64, 8>}]} {
    %c0 = arith.constant 0 : index
    %c0_0 = arith.constant 0 : index
    %c0_1 = arith.constant 0 : index
    %0 = vector.load %arg1[%c0, %c0_0, %c0_1] : memref<1x256x36xbf16, #tpu.memory_space<vmem>>, vector<1x256x36xbf16>
    %1 = vector.shape_cast %0 : vector<1x256x36xbf16> to vector<256x36xbf16>
    %c0_2 = arith.constant 0 : index
    %c0_3 = arith.constant 0 : index
    %2 = vector.load %arg3[%c0_2, %c0_3] : memref<36x8xbf16, #tpu.memory_space<vmem>>, vector<36x8xbf16>
    %cst = arith.constant dense<0.000000e+00> : vector<256x8xf32>
    %3 = tpu.matmul %1, %2, %cst {dimension_numbers = #tpu.dot_dimension_numbers<[1], [0], [0], [1], [0, 0, 1, 1], [], []>} : vector<256x36xbf16>, vector<36x8xbf16>, vector<256x8xf32> -> vector<256x8xf32>
    %c0_4 = arith.constant 0 : index
    %c0_5 = arith.constant 0 : index
    %4 = vector.load %arg4[%c0_4, %c0_5] : memref<1x8xf32, #tpu.memory_space<vmem>>, vector<1x8xf32>
    %5 = vector.broadcast %4 : vector<1x8xf32> to vector<256x8xf32>
    %6 = arith.addf %3, %5 : vector<256x8xf32>
    %cst_6 = arith.constant 0.000000e+00 : f32
    %7 = vector.broadcast %cst_6 : f32 to vector<256x8xf32>
    %8 = arith.maximumf %6, %7 : vector<256x8xf32>
    %cst_7 = arith.constant 0.000000e+00 : bf16
    %9 = vector.broadcast %cst_7 : bf16 to vector<1x1x18x8xbf16>
    %c0_8 = arith.constant 0 : index
    %c0_9 = arith.constant 0 : index
    %c0_10 = arith.constant 0 : index
    %c0_11 = arith.constant 0 : index
    %10 = vector.load %arg11[%c0_8, %c0_9, %c0_10, %c0_11] : memref<1x18x18x8xbf16, #tpu.memory_space<vmem>>, vector<1x1x18x8xbf16>
    tpu.vector_store %arg11[%c0_8, %c0_9, %c0_10, %c0_11], %9 {strides = array<i32>} : memref<1x18x18x8xbf16, #tpu.memory_space<vmem>>, vector<1x1x18x8xbf16>,
    %cst_12 = arith.constant 0.000000e+00 : bf16
    %11 = vector.broadcast %cst_12 : bf16 to vector<1x1x18x8xbf16>
    %c0_13 = arith.constant 0 : index
    %c17 = arith.constant 17 : index
    %c0_14 = arith.constant 0 : index
    %c0_15 = arith.constant 0 : index
    %12 = vector.load %arg11[%c0_13, %c17, %c0_14, %c0_15] : memref<1x18x18x8xbf16, #tpu.memory_space<vmem>>, vector<1x1x18x8xbf16>
    tpu.vector_store %arg11[%c0_13, %c17, %c0_14, %c0_15], %11 {strides = array<i32>} : memref<1x18x18x8xbf16, #tpu.memory_space<vmem>>, vector<1x1x18x8xbf16>,
    %cst_16 = arith.constant 0.000000e+00 : bf16
    %13 = vector.broadcast %cst_16 : bf16 to vector<1x16x1x8xbf16>
    %c0_17 = arith.constant 0 : index
    %c1 = arith.constant 1 : index
    %c0_18 = arith.constant 0 : index
    %c0_19 = arith.constant 0 : index
    %14 = vector.load %arg11[%c0_17, %c1, %c0_18, %c0_19] : memref<1x18x18x8xbf16, #tpu.memory_space<vmem>>, vector<1x16x1x8xbf16>
    tpu.vector_store %arg11[%c0_17, %c1, %c0_18, %c0_19], %13 {strides = array<i32>} : memref<1x18x18x8xbf16, #tpu.memory_space<vmem>>, vector<1x16x1x8xbf16>,
    %cst_20 = arith.constant 0.000000e+00 : bf16
    %15 = vector.broadcast %cst_20 : bf16 to vector<1x16x1x8xbf16>
    %c0_21 = arith.constant 0 : index
    %c1_22 = arith.constant 1 : index
    %c17_23 = arith.constant 17 : index
    %c0_24 = arith.constant 0 : index
    %16 = vector.load %arg11[%c0_21, %c1_22, %c17_23, %c0_24] : memref<1x18x18x8xbf16, #tpu.memory_space<vmem>>, vector<1x16x1x8xbf16>
    tpu.vector_store %arg11[%c0_21, %c1_22, %c17_23, %c0_24], %15 {strides = array<i32>} : memref<1x18x18x8xbf16, #tpu.memory_space<vmem>>, vector<1x16x1x8xbf16>,
    %17 = vector.shape_cast %8 : vector<256x8xf32> to vector<1x16x16x8xf32>
    %18 = arith.truncf %17 : vector<1x16x16x8xf32> to vector<1x16x16x8xbf16>
    %c0_25 = arith.constant 0 : index
    %c1_26 = arith.constant 1 : index
    %c1_27 = arith.constant 1 : index
    %c0_28 = arith.constant 0 : index
    %19 = vector.load %arg11[%c0_25, %c1_26, %c1_27, %c0_28] : memref<1x18x18x8xbf16, #tpu.memory_space<vmem>>, vector<1x16x16x8xbf16>
    tpu.vector_store %arg11[%c0_25, %c1_26, %c1_27, %c0_28], %18 {strides = array<i32>} : memref<1x18x18x8xbf16, #tpu.memory_space<vmem>>, vector<1x16x16x8xbf16>,
    %c0_29 = arith.constant 0 : index
    %c0_30 = arith.constant 0 : index
    %c0_31 = arith.constant 0 : index
    %c0_32 = arith.constant 0 : index
    %20 = vector.load %arg11[%c0_29, %c0_30, %c0_31, %c0_32] : memref<1x18x18x8xbf16, #tpu.memory_space<vmem>>, vector<1x16x16x8xbf16>
    %c0_33 = arith.constant 0 : index
    %c0_34 = arith.constant 0 : index
    %c1_35 = arith.constant 1 : index
    %c0_36 = arith.constant 0 : index
    %21 = vector.load %arg11[%c0_33, %c0_34, %c1_35, %c0_36] : memref<1x18x18x8xbf16, #tpu.memory_space<vmem>>, vector<1x16x16x8xbf16>
    %c0_37 = arith.constant 0 : index
    %c0_38 = arith.constant 0 : index
    %c2 = arith.constant 2 : index
    %c0_39 = arith.constant 0 : index
    %22 = vector.load %arg11[%c0_37, %c0_38, %c2, %c0_39] : memref<1x18x18x8xbf16, #tpu.memory_space<vmem>>, vector<1x16x16x8xbf16>
    %c0_40 = arith.constant 0 : index
    %c1_41 = arith.constant 1 : index
    %c0_42 = arith.constant 0 : index
    %c0_43 = arith.constant 0 : index
    %23 = vector.load %arg11[%c0_40, %c1_41, %c0_42, %c0_43] : memref<1x18x18x8xbf16, #tpu.memory_space<vmem>>, vector<1x16x16x8xbf16>
    %c0_44 = arith.constant 0 : index
    %c1_45 = arith.constant 1 : index
    %c1_46 = arith.constant 1 : index
    %c0_47 = arith.constant 0 : index
    %24 = vector.load %arg11[%c0_44, %c1_45, %c1_46, %c0_47] : memref<1x18x18x8xbf16, #tpu.memory_space<vmem>>, vector<1x16x16x8xbf16>
    %c0_48 = arith.constant 0 : index
    %c1_49 = arith.constant 1 : index
    %c2_50 = arith.constant 2 : index
    %c0_51 = arith.constant 0 : index
    %25 = vector.load %arg11[%c0_48, %c1_49, %c2_50, %c0_51] : memref<1x18x18x8xbf16, #tpu.memory_space<vmem>>, vector<1x16x16x8xbf16>
    %c0_52 = arith.constant 0 : index
    %c2_53 = arith.constant 2 : index
    %c0_54 = arith.constant 0 : index
    %c0_55 = arith.constant 0 : index
    %26 = vector.load %arg11[%c0_52, %c2_53, %c0_54, %c0_55] : memref<1x18x18x8xbf16, #tpu.memory_space<vmem>>, vector<1x16x16x8xbf16>
    %c0_56 = arith.constant 0 : index
    %c2_57 = arith.constant 2 : index
    %c1_58 = arith.constant 1 : index
    %c0_59 = arith.constant 0 : index
    %27 = vector.load %arg11[%c0_56, %c2_57, %c1_58, %c0_59] : memref<1x18x18x8xbf16, #tpu.memory_space<vmem>>, vector<1x16x16x8xbf16>
    %c0_60 = arith.constant 0 : index
    %c2_61 = arith.constant 2 : index
    %c2_62 = arith.constant 2 : index
    %c0_63 = arith.constant 0 : index
    %28 = vector.load %arg11[%c0_60, %c2_61, %c2_62, %c0_63] : memref<1x18x18x8xbf16, #tpu.memory_space<vmem>>, vector<1x16x16x8xbf16>
    %29 = tpu.concatenate %20, %21, %22, %23, %24, %25, %26, %27, %28 in 3 : vector<1x16x16x8xbf16>, vector<1x16x16x8xbf16>, vector<1x16x16x8xbf16>, vector<1x16x16x8xbf16>, vector<1x16x16x8xbf16>, vector<1x16x16x8xbf16>, vector<1x16x16x8xbf16>, vector<1x16x16x8xbf16>, vector<1x16x16x8xbf16> -> vector<1x16x16x72xbf16>
    %30 = vector.shape_cast %29 : vector<1x16x16x72xbf16> to vector<256x72xbf16>
    %c0_64 = arith.constant 0 : index
    %c0_65 = arith.constant 0 : index
    %31 = vector.load %arg5[%c0_64, %c0_65] : memref<72x8xbf16, #tpu.memory_space<vmem>>, vector<72x8xbf16>
    %cst_66 = arith.constant dense<0.000000e+00> : vector<256x8xf32>
    %32 = tpu.matmul %30, %31, %cst_66 {dimension_numbers = #tpu.dot_dimension_numbers<[1], [0], [0], [1], [0, 0, 1, 1], [], []>} : vector<256x72xbf16>, vector<72x8xbf16>, vector<256x8xf32> -> vector<256x8xf32>
    %c0_67 = arith.constant 0 : index
    %c0_68 = arith.constant 0 : index
    %33 = vector.load %arg6[%c0_67, %c0_68] : memref<1x8xf32, #tpu.memory_space<vmem>>, vector<1x8xf32>
    %34 = vector.broadcast %33 : vector<1x8xf32> to vector<256x8xf32>
    %35 = arith.addf %32, %34 : vector<256x8xf32>
    %36 = vector.shape_cast %35 : vector<256x8xf32> to vector<1x8x2x16x8xf32>
    %37 = vector.extract_strided_slice %36 {offsets = [0, 0, 0, 0, 0], sizes = [1, 8, 1, 16, 8], strides = [1, 1, 1, 1, 1]} : vector<1x8x2x16x8xf32> to vector<1x8x1x16x8xf32>
    %38 = vector.shape_cast %37 : vector<1x8x1x16x8xf32> to vector<1x8x16x8xf32>
    %39 = vector.extract_strided_slice %36 {offsets = [0, 0, 1, 0, 0], sizes = [1, 8, 1, 16, 8], strides = [1, 1, 1, 1, 1]} : vector<1x8x2x16x8xf32> to vector<1x8x1x16x8xf32>
    %40 = vector.shape_cast %39 : vector<1x8x1x16x8xf32> to vector<1x8x16x8xf32>
    %41 = arith.addf %38, %40 : vector<1x8x16x8xf32>
    %42 = tpu.transpose %41, [0, 1, 3, 2] : vector<1x8x16x8xf32> -> vector<1x8x8x16xf32>
    %43 = vector.shape_cast %42 : vector<1x8x8x16xf32> to vector<64x16xf32>
    %c0_69 = arith.constant 0 : index
    %c0_70 = arith.constant 0 : index
    %44 = vector.load %arg9[%c0_69, %c0_70] : memref<16x8xf32, #tpu.memory_space<vmem>>, vector<16x8xf32>
    %cst_71 = arith.constant dense<0.000000e+00> : vector<64x8xf32>
    %45 = tpu.matmul %43, %44, %cst_71 {dimension_numbers = #tpu.dot_dimension_numbers<[1], [0], [0], [1], [0, 0, 1, 1], [], []>} : vector<64x16xf32>, vector<16x8xf32>, vector<64x8xf32> -> vector<64x8xf32>
    %46 = vector.shape_cast %45 : vector<64x8xf32> to vector<1x8x8x8xf32>
    %47 = tpu.transpose %46, [0, 1, 3, 2] : vector<1x8x8x8xf32> -> vector<1x8x8x8xf32>
    %48 = vector.shape_cast %47 : vector<1x8x8x8xf32> to vector<1x64x8xf32>
    %cst_72 = arith.constant 2.500000e-01 : f32
    %49 = vector.broadcast %cst_72 : f32 to vector<1x64x8xf32>
    %50 = arith.mulf %48, %49 : vector<1x64x8xf32>
    %c0_73 = arith.constant 0 : index
    %c0_74 = arith.constant 0 : index
    %c0_75 = arith.constant 0 : index
    %51 = vector.load %arg2[%c0_73, %c0_74, %c0_75] : memref<1x64x4xbf16, #tpu.memory_space<vmem>>, vector<1x64x4xbf16>
    %52 = vector.shape_cast %51 : vector<1x64x4xbf16> to vector<64x4xbf16>
    %c0_76 = arith.constant 0 : index
    %c0_77 = arith.constant 0 : index
    %53 = vector.load %arg7[%c0_76, %c0_77] : memref<4x8xbf16, #tpu.memory_space<vmem>>, vector<4x8xbf16>
    %cst_78 = arith.constant dense<0.000000e+00> : vector<64x8xf32>
    %54 = tpu.matmul %52, %53, %cst_78 {dimension_numbers = #tpu.dot_dimension_numbers<[1], [0], [0], [1], [0, 0, 1, 1], [], []>} : vector<64x4xbf16>, vector<4x8xbf16>, vector<64x8xf32> -> vector<64x8xf32>
    %c0_79 = arith.constant 0 : index
    %c0_80 = arith.constant 0 : index
    %55 = vector.load %arg8[%c0_79, %c0_80] : memref<1x8xf32, #tpu.memory_space<vmem>>, vector<1x8xf32>
    %56 = vector.broadcast %55 : vector<1x8xf32> to vector<64x8xf32>
    %57 = arith.addf %54, %56 : vector<64x8xf32>
    %58 = vector.shape_cast %57 : vector<64x8xf32> to vector<1x64x8xf32>
    %59 = arith.addf %50, %58 : vector<1x64x8xf32>
    %c0_81 = arith.constant 0 : index
    %c0_82 = arith.constant 0 : index
    %c0_83 = arith.constant 0 : index
    %60 = vector.load %arg10[%c0_81, %c0_82, %c0_83] : memref<1x64x8xf32, #tpu.memory_space<vmem>>, vector<1x64x8xf32>
    tpu.vector_store %arg10[%c0_81, %c0_82, %c0_83], %59 {strides = array<i32>} : memref<1x64x8xf32, #tpu.memory_space<vmem>>, vector<1x64x8xf32>,
    return
  }
  func.func @transform_0(%arg0: i32) -> (i32, i32, i32) {
    %c0_i32 = arith.constant 0 : i32
    %c0_i32_0 = arith.constant 0 : i32
    %c0_i32_1 = arith.constant 0 : i32
    return %arg0, %c0_i32, %c0_i32_0 : i32, i32, i32
  }
  func.func @transform_1(%arg0: i32) -> (i32, i32, i32) {
    %c0_i32 = arith.constant 0 : i32
    %c0_i32_0 = arith.constant 0 : i32
    %c0_i32_1 = arith.constant 0 : i32
    return %arg0, %c0_i32, %c0_i32_0 : i32, i32, i32
  }
  func.func @transform_2(%arg0: i32) -> (i32, i32) {
    %c0_i32 = arith.constant 0 : i32
    %c0_i32_0 = arith.constant 0 : i32
    %c0_i32_1 = arith.constant 0 : i32
    return %c0_i32, %c0_i32_0 : i32, i32
  }
  func.func @transform_3(%arg0: i32) -> (i32, i32) {
    %c0_i32 = arith.constant 0 : i32
    %c0_i32_0 = arith.constant 0 : i32
    %c0_i32_1 = arith.constant 0 : i32
    return %c0_i32, %c0_i32_0 : i32, i32
  }
  func.func @transform_4(%arg0: i32) -> (i32, i32) {
    %c0_i32 = arith.constant 0 : i32
    %c0_i32_0 = arith.constant 0 : i32
    %c0_i32_1 = arith.constant 0 : i32
    return %c0_i32, %c0_i32_0 : i32, i32
  }
  func.func @transform_5(%arg0: i32) -> (i32, i32) {
    %c0_i32 = arith.constant 0 : i32
    %c0_i32_0 = arith.constant 0 : i32
    %c0_i32_1 = arith.constant 0 : i32
    return %c0_i32, %c0_i32_0 : i32, i32
  }
  func.func @transform_6(%arg0: i32) -> (i32, i32) {
    %c0_i32 = arith.constant 0 : i32
    %c0_i32_0 = arith.constant 0 : i32
    %c0_i32_1 = arith.constant 0 : i32
    return %c0_i32, %c0_i32_0 : i32, i32
  }
  func.func @transform_7(%arg0: i32) -> (i32, i32) {
    %c0_i32 = arith.constant 0 : i32
    %c0_i32_0 = arith.constant 0 : i32
    %c0_i32_1 = arith.constant 0 : i32
    return %c0_i32, %c0_i32_0 : i32, i32
  }
  func.func @transform_8(%arg0: i32) -> (i32, i32) {
    %c0_i32 = arith.constant 0 : i32
    %c0_i32_0 = arith.constant 0 : i32
    %c0_i32_1 = arith.constant 0 : i32
    return %c0_i32, %c0_i32_0 : i32, i32
  }
  func.func @transform_9(%arg0: i32) -> (i32, i32, i32) {
    %c0_i32 = arith.constant 0 : i32
    %c0_i32_0 = arith.constant 0 : i32
    %c0_i32_1 = arith.constant 0 : i32
    return %arg0, %c0_i32, %c0_i32_0 : i32, i32, i32
  }
}

</mosaic_0001>

<bundles_post_ra>
// kernel: disc_opt_block.1
= control target key start
LH: loop header
LB: loop body
LE: loop exit
PB: predicated region body
PF: predicated region fallthrough
CT: control target
= control target key end

     0   :  { %s5180_s30 = smov 0   ;;  %s6759_s0 = inlined_call_operand.vmem [shape: bf16[2,256,36], index: 0, kind: input, shape index: {}]   ;;  %s6760_s1 = inlined_call_operand.vmem [shape: bf16[2,64,4], index: 1, kind: input, shape index: {}]   ;;  %s6761_s2 = inlined_call_operand.vmem [shape: bf16[36,8], index: 2, kind: input, shape index: {}]   ;;  %s6762_s3 = inlined_call_operand.vmem [shape: f32[1,8], index: 3, kind: input, shape index: {}]   ;;  %s6763_s4 = inlined_call_operand.vmem [shape: bf16[72,8], index: 4, kind: input, shape index: {}]   ;;  %s6764_s5 = inlined_call_operand.vmem [shape: f32[1,8], index: 5, kind: input, shape index: {}]   ;;  %s6765_s6 = inlined_call_operand.vmem [shape: bf16[4,8], index: 6, kind: input, shape index: {}]   ;;  %s6766_s7 = inlined_call_operand.vmem [shape: f32[1,8], index: 7, kind: input, shape index: {}]   ;;  %s6767_s8 = inlined_call_operand.vmem [shape: f32[16,8], index: 8, kind: input, shape index: {}]   ;;  %s6768_s9 = inlined_call_operand.vmem [shape: f32[2,64,8], index: 9, kind: output, shape index: {}]  }
   0x1 LB: > { %s4453_s10 = sadd.s32 4294967295, %s5119_s30   ;;  %p4457_p0 = scmp.ge.s32.totalorder %s5119_s30, 1  ;;  %s5119_s30 = sphi %s5180_s30, %s19_s30  }
   0x2   : > { %p297_p1 = scmp.lt.s32.totalorder %s5119_s30, 3 }
   0x4   : > { %p298_p2 = pnand %p4457_p0, %p297_p1 }
   0x6   : > { %301 = sbr.rel (%p298_p2) target bundleno = 1322 (0x52a), region = 56 }
   0xd   : > { %v4938_v0 = vld [vmem:[%s6761_s2] sm:$0xff]   ;;  %v4939_v1 = vld [vmem:[%s6761_s2 + $0x8] sm:$0xff]   ;;  %p338_p3 = scmp.lt.s32.totalorder %s4453_s10, 1  ;;  %v4940_v2 = vld [vmem:[%s6761_s2 + $0x10] ss:$0 sps:$4 sm:$0x33]  }
   0xe   : > { %4807 = vmatprep.subr.bf16.mxu0 %v4938_v0  ;;  %vm6773_vm0 = vcmask 1041408   ;;  %vm493_vm1 = vcmask 293888   ;;  %vm742_vm2 = vcmask 57344   ;;  %vm750_vm3 = vsmask.f32 256  ;;  %s5122_s21 = smov 48  }
   0xf   : > { %4808 = vmatpush3.bf16.msra.mxu0 %v4938_v0  ;;  %s6824_s10 = smov (!%p338_p3, %s4453_s10), 1  ;;  %v544_v4 = vsel %vm6773_vm0, %v4940_v2, 0  ;;  %vm739_vm4 = vcmask 60416   ;;  %vm5241_vm5 = vmand %vm742_vm2, %vm750_vm3  ;;  %v755_v21 = vld [vmem:[#allocation2 + $0x18] sm:$0x1]  ;;  %v5121_v27 = vmov 0  }
  0x10   : > { %4809 = vmatprep.subr.bf16.mxu0 %v4939_v1  ;;  %s4717_s17 = sshll.u32 %s6824_s10, 7  ;;  %vm800_vm6 = vsmask.f32 7938  ;;  %v756_v22 = vsel %vm5241_vm5, 0, %v755_v21  ;;  %v752_v23 = vld [vmem:[#allocation2 + $0xc] sm:$0x1] }
  0x11   : > { %s5203_s20 = scalar_lea.vmem %s6759_s0, %s4717_s17  ;;  %757 = vst [vmem:[#allocation2 + $0x18] sm:$0x1] %v756_v22  ;;  %v753_v24 = vsel %vm5241_vm5, 0, %v752_v23  ;;  %vm5251_vm7 = vmand %vm742_vm2, %vm800_vm6  ;;  %v805_v26 = vld [vmem:[#allocation2 + $0x20] sm:$0x1]  ;;  %vm1976_vm8 = vcmask 1046528  }
  0x12   : > { %v4941_v3 = vld [vmem:[%s5203_s20] sm:$0xff]   ;;  %v4942_v5 = vld [vmem:[%s5203_s20 + $0x8] sm:$0xff]   ;;  %v4943_v6 = vld [vmem:[%s5203_s20 + $0x10] sm:$0xff]   ;;  %745 = vst.msk [vmem:[#allocation2 + $0xcc] sm:$0xf] %vm739_vm4, %v5121_v27  ;;  %v806_v28 = vsel %vm5251_vm7, 0, %v805_v26 }
  0x13   : > { %4810 = vmatpush3.bf16.msra.mxu0 %v4939_v1  ;;  %4813 = vmatprep.mubr.msk.bf16.mxu0 %vm493_vm1, %v4941_v3  ;;  %v4944_v7 = vld [vmem:[%s5203_s20 + $0x18] sm:$0xff]   ;;  %v4945_v8 = vld [vmem:[%s5203_s20 + $0x20] sm:$0xff]   ;;  %v4946_v9 = vld [vmem:[%s5203_s20 + $0x28] sm:$0xff]   ;;  %746 = vst.msk [vmem:[#allocation2 + $0xd0] sm:$0xf] %vm739_vm4, %v5121_v27  ;;  %s5123_s22 = smov 16  }
  0x14   : > { %4917 = vmatprep.subr.msk.bf16.mxu0 %vm6773_vm0, %v4940_v2  ;;  %v4947_v10 = vld [vmem:[%s5203_s20 + $0x30] sm:$0xff]   ;;  %v4948_v11 = vld [vmem:[%s5203_s20 + $0x38] sm:$0xff]   ;;  %v4949_v12 = vld [vmem:[%s5203_s20 + $0x40] sm:$0xff]   ;;  %740 = vst.msk [vmem:[#allocation2] sm:$0xf] %vm739_vm4, %v5121_v27  ;;  %s5124_s23 = smov 8  }
  0x15   : > { %v4950_v13 = vld [vmem:[%s5203_s20 + $0x48] sm:$0xff]   ;;  %v4951_v14 = vld [vmem:[%s5203_s20 + $0x50] sm:$0xff]   ;;  %v4952_v15 = vld [vmem:[%s5203_s20 + $0x58] sm:$0xff]   ;;  %741 = vst.msk [vmem:[#allocation2 + $0x4] sm:$0xf] %vm739_vm4, %v5121_v27  ;;  %s5125_s26 = smov 24  }
  0x16   : > { %v4953_v16 = vld [vmem:[%s5203_s20 + $0x60] sm:$0xff]   ;;  %v4954_v17 = vld [vmem:[%s5203_s20 + $0x68] sm:$0xff]   ;;  %v4955_v18 = vld [vmem:[%s5203_s20 + $0x70] sm:$0xff]   ;;  %743 = vst.msk [vmem:[#allocation2 + $0x8] sm:$0x1] %vm742_vm2, %v5121_v27  ;;  %s5126_s27 = smov 40  }
  0x17   : > { %4812 = vmatpush3.bf16.msra.mxu0 %v544_v4  ;;  %v4956_v19 = vld [vmem:[%s5203_s20 + $0x78] sm:$0xff]   ;;  %747 = vst.msk [vmem:[#allocation2 + $0xd4] sm:$0x1] %vm742_vm2, %v5121_v27  ;;  %754 = vst [vmem:[#allocation2 + $0xc] sm:$0x1] %v753_v24  ;;  %s5127_s28 = smov 64  }
  0x18   : > { %v802_v29 = vld [vmem:[#allocation2 + $0x14] sm:$0x1]  ;;  %807 = vst [vmem:[#allocation2 + $0x20] sm:$0x1] %v806_v28  ;;  %v761_v40 = vld [vmem:[#allocation2 + $0x30] sm:$0x1]  ;;  %vm5321_vm11 = vmand %vm739_vm4, %vm800_vm6 }
  0x19   : > { %v803_v30 = vsel %vm5251_vm7, 0, %v802_v29  ;;  %v1541_v34 = vld [vmem:[#allocation2 + $0xcc] sm:$0xf]  ;;  %v762_v43 = vsel %vm5241_vm5, 0, %v761_v40  ;;  %vm1703_vm9 = vsmask.f32 7424 }
  0x1a   : > { %4814 = vmatmul.mubr.msk.bf16.vlgmr.msra.gmra.mrb[0].mxu0 %vm493_vm1, %v4942_v5  ;;  %804 = vst [vmem:[#allocation2 + $0x14] sm:$0x1] %v803_v30  ;;  %v1542_v35 = vld [vmem:[#allocation2 + $0xd0] sm:$0xf]  ;;  %763 = vst [vmem:[#allocation2 + $0x30] sm:$0x1] %v762_v43 }
  0x1b   : > { %4817 = vmatprep.mubr.msk.bf16.mxu0 %vm493_vm1, %v4943_v6  ;;  %v1382_v32 = vld [vmem:[#allocation2] sm:$0xf]  ;;  %v5267_v36 = vcombine.low %v1541_v34, %v1542_v35  ;;  %v758_v51 = vld [vmem:[#allocation2 + $0x24] sm:$0x1]  ;;  %v811_v53 = vld [vmem:[#allocation2 + $0x38] sm:$0x1] }
  0x1c   : > { %v1383_v31 = vld [vmem:[#allocation2 + $0x4] sm:$0xf]  ;;  %v1430_v37 = vld [vmem:[#allocation2] sm:$0xe]  ;;  %v759_v52 = vsel %vm5241_vm5, 0, %v758_v51  ;;  %v812_v55 = vsel %vm5251_vm7, 0, %v811_v53 }
  0x1d   : > { %v5265_v33 = vcombine.low %v1382_v32, %v1383_v31  ;;  %v4959_v38 = vld [vmem:[#allocation2 + $0x8] ss:$0 sps:$4 sm:$0x11]   ;;  %v4564_v41 = vcombine.low %v1430_v37, %v1383_v31  ;;  %2679 = vrot.lane.b32.xlu1 %v5267_v36, %s5122_s21  ;;  %760 = vst [vmem:[#allocation2 + $0x24] sm:$0x1] %v759_v52  ;;  %s5128_s29 = smov 32  }
  0x1e   : > { %v1978_v45 = vrot.slane %v4959_v38, 1  ;;  %v1712_v47 = vshll.u32 %v4959_v38, 16  ;;  %813 = vst [vmem:[#allocation2 + $0x38] sm:$0x1] %v812_v55  ;;  %v808_v56 = vld [vmem:[#allocation2 + $0x2c] sm:$0x1] }
  0x1f   : > { %v1707_v39 = vshll.u32 %v5265_v33, 16  ;;  %v1705_v42 = vshrl.u32 %v5265_v33, 16  ;;  %v1977_v44 = vrot.slane %v4564_v41, 1  ;;  %v809_v57 = vsel %vm5251_vm7, 0, %v808_v56  ;;  %v767_v58 = vld [vmem:[#allocation2 + $0x48] sm:$0x1] }
  0x20   : > { %v1714_v50 = vrot.slane %v1712_v47, 1  ;;  %810 = vst [vmem:[#allocation2 + $0x2c] sm:$0x1] %v809_v57  ;;  %v768_v59 = vsel %vm5241_vm5, 0, %v767_v58  ;;  %v764_v60 = vld [vmem:[#allocation2 + $0x3c] sm:$0x1] }
  0x21   : > { %v1709_v46 = vrot.slane %v1707_v39, 1  ;;  %v1979_v48 = vsel %vm1976_vm8, %v1977_v44, %v1978_v45  ;;  %769 = vst [vmem:[#allocation2 + $0x48] sm:$0x1] %v768_v59  ;;  %v817_v61 = vld [vmem:[#allocation2 + $0x50] sm:$0x1]  ;;  %v765_v62 = vsel %vm5241_vm5, 0, %v764_v60 }
  0x22   : > { %4818 = vmatmul.mubr.msk.bf16.gmra.mrb[4].mxu0 %vm493_vm1, %v4944_v7  ;;  %2025 = vrot.lane.b32.xlu1 %v1979_v48, %s5123_s22  ;;  %v818_v63 = vsel %vm5251_vm7, 0, %v817_v61  ;;  %766 = vst [vmem:[#allocation2 + $0x3c] sm:$0x1] %v765_v62  ;;  %v814_v0 = vld [vmem:[#allocation2 + $0x44] sm:$0x1]  ;;  %s5129_s11 = smov 56  }
  0x23   : > { %4821 = vmatprep.mubr.msk.bf16.mxu0 %vm493_vm1, %v4945_v8  ;;  %v1710_v49 = vor.u32 %v1709_v46, %v1705_v42  ;;  %819 = vst [vmem:[#allocation2 + $0x50] sm:$0x1] %v818_v63  ;;  %v815_v1 = vsel %vm5251_vm7, 0, %v814_v0  ;;  %v773_v2 = vld [vmem:[#allocation2 + $0x60] sm:$0x1]  ;;  %vm3081_vm13 = vcmask 64512  }
  0x24   : > { %816 = vst [vmem:[#allocation2 + $0x44] sm:$0x1] %v815_v1  ;;  %v774_v3 = vsel %vm5241_vm5, 0, %v773_v2  ;;  %v770_v4 = vld [vmem:[#allocation2 + $0x54] sm:$0x1]  ;;  %vm6774_vm14 = vcmask 130048  }
  0x25   : > { %v1715_v54 = vsel %vm1703_vm9, %v1710_v49, %v1714_v50  ;;  %775 = vst [vmem:[#allocation2 + $0x60] sm:$0x1] %v774_v3  ;;  %v823_v5 = vld [vmem:[#allocation2 + $0x68] sm:$0x1]  ;;  %v820_v6 = vld [vmem:[#allocation2 + $0x5c] sm:$0x1] }
  0x26   : > { %1896 = vrot.lane.b32.xlu0 %v1715_v54, %s5124_s23  ;;  %v771_v7 = vsel %vm5241_vm5, 0, %v770_v4  ;;  %v824_v8 = vsel %vm5251_vm7, 0, %v823_v5  ;;  %vm946_vm10 = vsmask.f32 4368  ;;  %v1277_v50 = vld [vmem:[#allocation2 + $0x18] sm:$0xf] }
  0x27   : > { %772 = vst [vmem:[#allocation2 + $0x54] sm:$0x1] %v771_v7  ;;  %825 = vst [vmem:[#allocation2 + $0x68] sm:$0x1] %v824_v8  ;;  %v1270_v58 = vld [vmem:[#allocation2 + $0xc] sm:$0xf] }
  0x28   : > { %vm5328_vm12 = vmor %vm750_vm3, %vm946_vm10  ;;  %v1281_v1 = vld [vmem:[#allocation2 + $0x20] sm:$0x1]  ;;  %v1274_v7 = vld [vmem:[#allocation2 + $0x14] sm:$0x1]  ;;  %vm3147_vm15 = vcmask 195584   ;;  %vm3213_vm2 = vcmask 326656  }
  0x29   : > { %vm3421_vm3 = vcmask 1043456   ;;  %vm3246_vm6 = vcmask 392192   ;;  %vm3279_vm10 = vcmask 457728   ;;  %vm3312_vm0 = vcmask 523264   ;;  %s4718_s15 = sshll.u32 %s6824_s10, 5  ;;  %s4719_s24 = sshll.u32 %s6824_s10, 6 }
  0x2a   : > { %4822 = vmatmul.mubr.msk.bf16.gmra.mrb[8].mxu0 %vm493_vm1, %v4946_v9  ;;  %v821_v9 = vsel %vm5251_vm7, 0, %v820_v6  ;;  %s347_s18 = scalar_lea.vmem %s6760_s1, %s4718_s15  ;;  %s6738_s13 = scalar_lea.vmem %s6768_s9, %s4719_s24 }
  0x2b   : > { %4825 = vmatprep.mubr.msk.bf16.mxu0 %vm493_vm1, %v4947_v10  ;;  %822 = vst [vmem:[#allocation2 + $0x5c] sm:$0x1] %v821_v9  ;;  %v779_v10 = vld [vmem:[#allocation2 + $0x78] sm:$0x1] }
  0x32   : > { %4826 = vmatmul.mubr.msk.bf16.gmra.mrb[12].mxu0 %vm493_vm1, %v4948_v11  ;;  %v780_v11 = vsel %vm5241_vm5, 0, %v779_v10 }
  0x33   : > { %4829 = vmatprep.mubr.msk.bf16.mxu0 %vm493_vm1, %v4949_v12  ;;  %781 = vst [vmem:[#allocation2 + $0x78] sm:$0x1] %v780_v11  ;;  %v776_v12 = vld [vmem:[#allocation2 + $0x6c] sm:$0x1] }
  0x3a   : > { %4830 = vmatmul.mubr.msk.bf16.gmra.mrb[16].mxu0 %vm493_vm1, %v4950_v13  ;;  %v829_v13 = vld [vmem:[#allocation2 + $0x80] sm:$0x1] }
  0x3b   : > { %4833 = vmatprep.mubr.msk.bf16.mxu0 %vm493_vm1, %v4951_v14  ;;  %v826_v14 = vld [vmem:[#allocation2 + $0x74] sm:$0x1] }
  0x42   : > { %4834 = vmatmul.mubr.msk.bf16.gmra.mrb[20].mxu0 %vm493_vm1, %v4952_v15  ;;  %v777_v15 = vsel %vm5241_vm5, 0, %v776_v12 }
  0x43   : > { %4837 = vmatprep.mubr.msk.bf16.mxu0 %vm493_vm1, %v4953_v16  ;;  %v830_v16 = vsel %vm5251_vm7, 0, %v829_v13  ;;  %778 = vst [vmem:[#allocation2 + $0x6c] sm:$0x1] %v777_v15 }
  0x44   : > { %831 = vst [vmem:[#allocation2 + $0x80] sm:$0x1] %v830_v16 }
  0x4a   : > { %4838 = vmatmul.mubr.msk.bf16.gmra.mrb[24].mxu0 %vm493_vm1, %v4954_v17  ;;  %v827_v17 = vsel %vm5251_vm7, 0, %v826_v14 }
  0x4b   : > { %4841 = vmatprep.mubr.msk.bf16.mxu0 %vm493_vm1, %v4955_v18  ;;  %828 = vst [vmem:[#allocation2 + $0x74] sm:$0x1] %v827_v17  ;;  %v5312_v18 = vld [vmem:[%s6762_s3] ss:$0 sm:$0xff] }
  0x52   : > { %4842 = vmatmul.mubr.msk.bf16.gmra.mrb[28].mxu0 %vm493_vm1, %v4956_v19  ;;  %vm3180_vm1 = vcmask 261120  }
  0xed   : > { %v4815_v19 = vpop.f32.mrb[0].mxu0 }
  0xee   : > { %v589_v21 = vadd.f32 %v4815_v19, %v5312_v18  ;;  %v580_v22 = vpop.f32.mrb[1].mxu0 }
  0xef   : > { %v581_v23 = vadd.f32 %v5312_v18, %v580_v22  ;;  %v4816_v24 = vpop.f32.mrb[2].mxu0 }
  0xf0   : > { %v709_v26 = vmax.f32 %v589_v21, 0.0  ;;  %v592_v27 = vadd.f32 %v4816_v24, %v5312_v18  ;;  %v583_v28 = vpop.f32.mrb[3].mxu0 }
  0xf1   : > { %v707_v29 = vmax.f32 %v581_v23, 0.0  ;;  %v584_v30 = vadd.f32 %v5312_v18, %v583_v28 }
  0xf2   : > { %v4722_v31 = vpack.c.bf16 %v709_v26, %v709_v26  ;;  %v710_v32 = vmax.f32 %v592_v27, 0.0 }
  0xf3   : > { %v4720_v34 = vpack.c.bf16 %v707_v29, %v707_v29  ;;  %v708_v35 = vmax.f32 %v584_v30, 0.0  ;;  %v1291_v30 = vld [vmem:[#allocation2 + $0x30] sm:$0xf] }
  0xf4   : > { %v966_v37 = vshrl.u32 %v4722_v31, 16  ;;  %v4723_v38 = vpack.c.bf16 %v710_v32, %v710_v32  ;;  %v969_v39 = vshll.u32 %v4722_v31, 16 }
  0xf5   : > { %v949_v40 = vshrl.u32 %v4720_v34, 16  ;;  %v952_v41 = vshll.u32 %v4720_v34, 16  ;;  %v4721_v42 = vpack.c.bf16 %v708_v35, %v708_v35  ;;  %v4819_v43 = vpop.f32.mrb[4].mxu0 }
  0xf6   : > { %v968_v44 = vrot.slane %v966_v37, 7  ;;  %v974_v45 = vshrl.u32 %v4723_v38, 16  ;;  %v977_v46 = vshll.u32 %v4723_v38, 16  ;;  %v605_v47 = vadd.f32 %v4819_v43, %v5312_v18  ;;  %v596_v48 = vpop.f32.mrb[5].mxu0  ;;  %v1284_v37 = vld [vmem:[#allocation2 + $0x24] sm:$0xf] }
  0xf7   : > { %v951_v51 = vrot.slane %v949_v40, 7  ;;  %v957_v52 = vshrl.u32 %v4721_v42, 16  ;;  %v960_v53 = vshll.u32 %v4721_v42, 16  ;;  %v597_v54 = vadd.f32 %v5312_v18, %v596_v48  ;;  %v4820_v55 = vpop.f32.mrb[6].mxu0 }
  0xf8   : > { %v971_v56 = vor.u32 %v969_v39, %v968_v44  ;;  %v972_v57 = vrot.slane %v968_v44, 4  ;;  %v976_v59 = vrot.slane %v974_v45, 7  ;;  %v713_v60 = vmax.f32 %v605_v47, 0.0  ;;  %v599_v61 = vpop.f32.mrb[7].mxu0 }
  0xf9   : > { %v954_v62 = vor.u32 %v952_v41, %v951_v51  ;;  %v955_v63 = vrot.slane %v951_v51, 4  ;;  %v959_v2 = vrot.slane %v957_v52, 7  ;;  %v711_v3 = vmax.f32 %v597_v54, 0.0 }
  0xfa   : > { %v1278_v4 = vsel %vm5321_vm11, %v971_v56, %v1277_v50  ;;  %v979_v5 = vor.u32 %v977_v46, %v976_v59  ;;  %v981_v6 = vrot.slane %v976_v59, 4  ;;  %v4726_v8 = vpack.c.bf16 %v713_v60, %v713_v60  ;;  %v1295_v60 = vld [vmem:[#allocation2 + $0x38] sm:$0x1] }
  0xfb   : > { %1279 = vst [vmem:[#allocation2 + $0x18] sm:$0xf] %v1278_v4  ;;  %v1271_v9 = vsel %vm5321_vm11, %v954_v62, %v1270_v58  ;;  %v962_v10 = vor.u32 %v960_v53, %v959_v2  ;;  %v964_v11 = vrot.slane %v959_v2, 4  ;;  %v4724_v12 = vpack.c.bf16 %v711_v3, %v711_v3 }
  0xfc   : > { %1272 = vst [vmem:[#allocation2 + $0xc] sm:$0xf] %v1271_v9  ;;  %v980_v13 = vsel %vm5328_vm12, %v972_v57, %v979_v5  ;;  %v1282_v14 = vsel %vm5241_vm5, %v981_v6, %v1281_v1  ;;  %v1000_v15 = vshrl.u32 %v4726_v8, 16  ;;  %v1003_v16 = vshll.u32 %v4726_v8, 16 }
  0xfd   : > { %1280 = vst.msk [vmem:[#allocation2 + $0x1c] sm:$0xf] %vm739_vm4, %v980_v13  ;;  %1283 = vst [vmem:[#allocation2 + $0x20] sm:$0x1] %v1282_v14  ;;  %v963_v17 = vsel %vm5328_vm12, %v955_v63, %v962_v10  ;;  %v1275_v19 = vsel %vm5241_vm5, %v964_v11, %v1274_v7  ;;  %v983_v21 = vshrl.u32 %v4724_v12, 16  ;;  %v986_v22 = vshll.u32 %v4724_v12, 16 }
  0xfe   : > { %v4823_v23 = vpop.f32.mrb[8].mxu0  ;;  %1273 = vst.msk [vmem:[#allocation2 + $0x10] sm:$0xf] %vm739_vm4, %v963_v17  ;;  %1276 = vst [vmem:[#allocation2 + $0x14] sm:$0x1] %v1275_v19  ;;  %v5346_v24 = vrot.slane %v1000_v15, 7  ;;  %v608_v26 = vadd.f32 %v4820_v55, %v5312_v18  ;;  %v600_v27 = vadd.f32 %v5312_v18, %v599_v61 }
  0xff   : > { %v5351_v28 = vadd.f32 %v4823_v23, %v5312_v18  ;;  %v612_v29 = vpop.f32.mrb[9].mxu0  ;;  %v985_v31 = vrot.slane %v983_v21, 7  ;;  %v1288_v61 = vld [vmem:[#allocation2 + $0x2c] sm:$0x1] }
 0x100   : > { %v5354_v32 = vadd.f32 %v5312_v18, %v612_v29  ;;  %v5356_v34 = vpop.f32.mrb[10].mxu0  ;;  %v1005_v35 = vor.u32 %v1003_v16, %v5346_v24  ;;  %v714_v38 = vmax.f32 %v608_v26, 0.0  ;;  %v712_v39 = vmax.f32 %v600_v27, 0.0 }
 0x101   : > { %v5359_v40 = vpop.f32.mrb[11].mxu0  ;;  %v1006_v41 = vrot.slane %v5346_v24, 4  ;;  %v988_v42 = vor.u32 %v986_v22, %v985_v31  ;;  %v989_v43 = vrot.slane %v985_v31, 4  ;;  %v717_v44 = vmax.f32 %v5351_v28, 0.0 }
 0x102   : > { %v1292_v45 = vsel %vm5321_vm11, %v1005_v35, %v1291_v30  ;;  %v4727_v46 = vpack.c.bf16 %v714_v38, %v714_v38  ;;  %v4725_v47 = vpack.c.bf16 %v712_v39, %v712_v39  ;;  %v715_v48 = vmax.f32 %v5354_v32, 0.0  ;;  %v1511_v51 = vld [vmem:[#allocation2 + $0x18] sm:$0xf] }
 0x103   : > { %1293 = vst [vmem:[#allocation2 + $0x30] sm:$0xf] %v1292_v45  ;;  %v1285_v50 = vsel %vm5321_vm11, %v988_v42, %v1284_v37  ;;  %v1448_v52 = vld [vmem:[#allocation2 + $0x18] sm:$0xf]  ;;  %v1446_v7 = vld [vmem:[#allocation2 + $0xc] sm:$0xf] }
 0x104   : > { %v1495_v53 = vld [vmem:[#allocation2 + $0x18] sm:$0xe]  ;;  %1286 = vst [vmem:[#allocation2 + $0x24] sm:$0xf] %v1285_v50  ;;  %v1008_v54 = vshrl.u32 %v4727_v46, 16  ;;  %v1011_v55 = vshll.u32 %v4727_v46, 16 }
 0x105   : > { %v991_v56 = vshrl.u32 %v4725_v47, 16  ;;  %v994_v57 = vshll.u32 %v4725_v47, 16  ;;  %v1512_v58 = vld [vmem:[#allocation2 + $0x1c] sm:$0xf]  ;;  %v1559_v59 = vld [vmem:[#allocation2 + $0x18] sm:$0xe] }
 0x106   : > { %v5368_v62 = vcombine.low %v1511_v51, %v1512_v58  ;;  %v1449_v63 = vld [vmem:[#allocation2 + $0x1c] sm:$0xf]  ;;  %v5370_v1 = vld [vmem:[#allocation2 + $0x10] sm:$0xf]  ;;  %v1010_v2 = vrot.slane %v1008_v54, 7  ;;  %v5372_v8 = vpop.f32.mrb[12].mxu0  ;;  %v4660_v9 = vcombine.low %v1559_v59, %v1512_v58 }
 0x107   : > { %v993_v3 = vrot.slane %v991_v56, 7  ;;  %v4581_v4 = vcombine.low %v1448_v52, %v1449_v63  ;;  %v4613_v5 = vcombine.low %v1495_v53, %v1449_v63  ;;  %v4966_v6 = vld [vmem:[#allocation2 + $0x20] ss:$0 sps:$4 sm:$0x11]   ;;  %v1385_v16 = vld [vmem:[#allocation2 + $0x10] sm:$0xf]  ;;  %v5381_v23 = vcombine.low %v1446_v7, %v5370_v1 }
 0x108   : > { %2649 = vrot.lane.b32.xlu0 %v5368_v62, %s5122_s21  ;;  %v2732_v10 = vshll.u32 %v5368_v62, 16  ;;  %v5377_v11 = vld [vmem:[#allocation2 + $0x20] ss:$0 sps:$4 sm:$0x11]   ;;  %v1013_v12 = vor.u32 %v1011_v55, %v1010_v2  ;;  %v1015_v13 = vrot.slane %v1010_v2, 4  ;;  %v2493_v21 = vrot.slane %v4966_v6, 1 }
 0x109   : > { %v996_v14 = vor.u32 %v994_v57, %v993_v3  ;;  %v998_v15 = vrot.slane %v993_v3, 4  ;;  %2139 = vrot.lane.b32.xlu1 %v4581_v4, %s5125_s26  ;;  %v2232_v17 = vshll.u32 %v4581_v4, 16  ;;  %v2492_v19 = vrot.slane %v4613_v5, 1  ;;  %v1494_v22 = vld [vmem:[#allocation2 + $0xc] sm:$0xe]  ;;  %v5393_v35 = vpop.f32.mrb[13].mxu0 }
 0x10a   : > { %v1014_v24 = vsel %vm5328_vm12, %v1006_v41, %v1013_v12  ;;  %v1296_v26 = vsel %vm5241_vm5, %v1015_v13, %v1295_v60  ;;  %v1431_v30 = vld [vmem:[#allocation2 + $0xc] sm:$0xe]  ;;  %v5391_v31 = vld [vmem:[#allocation2 + $0x14] ss:$0 sps:$4 sm:$0x11]   ;;  %v3001_v38 = vrot.slane %v4660_v9, 1  ;;  %v4612_v45 = vcombine.low %v1494_v22, %v5370_v1 }
 0x10b   : > { %v997_v27 = vsel %vm5328_vm12, %v989_v43, %v996_v14  ;;  %v1289_v29 = vsel %vm5241_vm5, %v998_v15, %v1288_v61  ;;  %1294 = vst.msk [vmem:[#allocation2 + $0x34] sm:$0xf] %vm739_vm4, %v1014_v24  ;;  %1297 = vst [vmem:[#allocation2 + $0x38] sm:$0x1] %v1296_v26  ;;  %v2494_v37 = vsel %vm1976_vm8, %v2492_v19, %v2493_v21  ;;  %v3002_v39 = vrot.slane %v5377_v11, 1  ;;  %v5406_v56 = vpop.f32.mrb[14].mxu0 }
 0x10c   : > { %1287 = vst.msk [vmem:[#allocation2 + $0x28] sm:$0xf] %vm739_vm4, %v997_v27  ;;  %1290 = vst [vmem:[#allocation2 + $0x2c] sm:$0x1] %v1289_v29  ;;  %2137 = vrot.lane.b32.xlu0 %v5381_v23, %s5125_s26  ;;  %v4565_v41 = vcombine.low %v1431_v30, %v1385_v16  ;;  %v1386_v42 = vld [vmem:[#allocation2 + $0x18] sm:$0xf]  ;;  %v5413_v60 = vadd.f32 %v5356_v34, %v5312_v18  ;;  %v5424_v34 = vpack.c.bf16 %v715_v48, %v715_v48 }
 0x10d   : > { %v1387_v43 = vld [vmem:[#allocation2 + $0x1c] sm:$0xf]  ;;  %2539 = vrot.lane.b32.xlu1 %v2494_v37, %s5126_s27  ;;  %v1981_v46 = vrot.slane %v5391_v31, 1  ;;  %v1432_v47 = vld [vmem:[#allocation2 + $0x18] sm:$0xe]  ;;  %v2230_v50 = vshrl.u32 %v4581_v4, 16  ;;  %v3003_v57 = vsel %vm1976_vm8, %v3001_v38, %v3002_v39  ;;  %v5428_v7 = vadd.f32 %v5312_v18, %v5359_v40 }
 0x10e   : > { %v1980_v51 = vrot.slane %v4565_v41, 1  ;;  %v5404_v52 = vcombine.low %v1386_v42, %v1387_v43  ;;  %v4974_v53 = vld [vmem:[#allocation2 + $0x20] ss:$0 sps:$4 sm:$0x11]   ;;  %v4566_v54 = vcombine.low %v1432_v47, %v1387_v43  ;;  %v2234_v55 = vrot.slane %v2232_v17, 1  ;;  %v5432_v15 = vpop.f32.mrb[15].mxu0 }
 0x10f   : > { %v2237_v58 = vshll.u32 %v4966_v6, 16  ;;  %v5409_v59 = vld [vmem:[#allocation2 + $0x14] ss:$0 sps:$4 sm:$0x11]   ;;  %v1984_v1 = vrot.slane %v4974_v53, 1  ;;  %v4730_v6 = vpack.c.bf16 %v717_v44, %v717_v44  ;;  %v2489_v9 = vrot.slane %v4612_v45, 1 }
 0x110   : > { %3049 = vrot.lane.b32.xlu0 %v3003_v57, %s5127_s28  ;;  %v1982_v61 = vsel %vm1976_vm8, %v1980_v51, %v1981_v46  ;;  %v1983_v63 = vrot.slane %v4566_v54, 1  ;;  %v2235_v2 = vor.u32 %v2234_v55, %v2230_v50  ;;  %v1384_v3 = vld [vmem:[#allocation2 + $0xc] sm:$0xf]  ;;  %v1452_v5 = vld [vmem:[#allocation2 + $0x30] sm:$0xf]  ;;  %v2490_v12 = vrot.slane %v5409_v59, 1 }
 0x111   : > { %2027 = vrot.lane.b32.xlu1 %v1982_v61, %s5123_s22  ;;  %v2239_v4 = vrot.slane %v2237_v58, 1  ;;  %v1731_v13 = vshll.u32 %v5404_v52, 16  ;;  %v1736_v14 = vshll.u32 %v4974_v53, 16  ;;  %v5434_v28 = vcombine.low %v1384_v3, %v1385_v16  ;;  %v1497_v40 = vld [vmem:[#allocation2 + $0x30] sm:$0xe]  ;;  %v5449_v41 = vpop.f32.mrb[16].mxu0 }
 0x112   : > { %v1985_v44 = vsel %vm1976_vm8, %v1983_v63, %v1984_v1  ;;  %v2734_v32 = vrot.slane %v2732_v10, 1  ;;  %v2737_v48 = vshll.u32 %v5377_v11, 16  ;;  %v1453_v17 = vld [vmem:[#allocation2 + $0x34] sm:$0xf]  ;;  %v1729_v21 = vshrl.u32 %v5404_v52, 16 }
 0x113   : > { %v2240_v19 = vsel %vm1703_vm9, %v2235_v2, %v2239_v4  ;;  %v1733_v22 = vrot.slane %v1731_v13, 1  ;;  %v5443_v24 = vcombine.low %v1452_v5, %v1453_v17  ;;  %v2220_v16 = vshll.u32 %v5381_v23, 16  ;;  %v1305_v38 = vld [vmem:[#allocation2 + $0x48] sm:$0xf]  ;;  %v1513_v39 = vld [vmem:[#allocation2 + $0x24] sm:$0xf] }
 0x114   : > { %2029 = vrot.lane.b32.xlu0 %v1985_v44, %s5123_s22  ;;  %v2730_v10 = vshrl.u32 %v5368_v62, 16  ;;  %v1034_v26 = vshrl.u32 %v4730_v6, 16  ;;  %v1037_v11 = vshll.u32 %v4730_v6, 16  ;;  %v2491_v27 = vsel %vm1976_vm8, %v2489_v9, %v2490_v12  ;;  %v5453_v46 = vld [vmem:[#allocation2 + $0x28] sm:$0xf]  ;;  %v5456_v62 = vpop.f32.mrb[17].mxu0 }
 0x115   : > { %2411 = vrot.lane.b32.xlu1 %v2240_v19, %s5128_s29  ;;  %v1734_v29 = vor.u32 %v1733_v22, %v1729_v21  ;;  %v1738_v30 = vrot.slane %v1736_v14, 1  ;;  %v4615_v37 = vcombine.low %v1497_v40, %v1453_v17  ;;  %v2739_v43 = vrot.slane %v2737_v48, 1  ;;  %v5463_v55 = vld [vmem:[#allocation2 + $0x38] ss:$0 sps:$4 sm:$0x11]   ;;  %v5469_v1 = vpop.f32.mrb[18].mxu0 }
 0x116   : > { %v2735_v42 = vor.u32 %v2734_v32, %v2730_v10  ;;  %v5451_v45 = vrot.slane %v1034_v26, 7  ;;  %v1719_v47 = vshll.u32 %v5434_v28, 16  ;;  %v2256_v51 = vshll.u32 %v5443_v24, 16  ;;  %v5484_v32 = vld [vmem:[#allocation2 + $0x2c] ss:$0 sps:$4 sm:$0x11]  }
 0x117   : > { %v1739_v50 = vsel %vm1703_vm9, %v1734_v29, %v1738_v30  ;;  %v1724_v53 = vshll.u32 %v5391_v31, 16  ;;  %v1017_v54 = vshrl.u32 %v5424_v34, 16  ;;  %v1717_v58 = vshrl.u32 %v5434_v28, 16  ;;  %v1433_v21 = vld [vmem:[#allocation2 + $0x24] sm:$0xe] }
 0x118   : > { %2537 = vrot.lane.b32.xlu0 %v2491_v27, %s5126_s27  ;;  %v1039_v57 = vor.u32 %v1037_v11, %v5451_v45  ;;  %v1721_v61 = vrot.slane %v1719_v47, 1  ;;  %v1020_v63 = vshll.u32 %v5424_v34, 16  ;;  %v5472_v2 = vcombine.low %v1513_v39, %v5453_v46  ;;  %v1298_v34 = vld [vmem:[#allocation2 + $0x3c] sm:$0xf]  ;;  %v1309_v30 = vld [vmem:[#allocation2 + $0x50] sm:$0x1] }
 0x119   : > { %1900 = vrot.lane.b32.xlu1 %v1739_v50, %s5124_s23  ;;  %v5474_v3 = vrot.slane %v1017_v54, 7  ;;  %v718_v31 = vmax.f32 %v5413_v60, 0.0  ;;  %v716_v4 = vmax.f32 %v5428_v7, 0.0  ;;  %v2740_v5 = vsel %vm1703_vm9, %v2735_v42, %v2739_v43  ;;  %v5486_v7 = vpop.f32.mrb[19].mxu0 }
 0x11a   : > { %v1040_v6 = vrot.slane %v5451_v45, 4  ;;  %v1306_v9 = vsel %vm5321_vm11, %v1039_v57, %v1305_v38  ;;  %v1722_v12 = vor.u32 %v1721_v61, %v1717_v58  ;;  %v1726_v13 = vrot.slane %v1724_v53, 1  ;;  %v5494_v27 = vpop.f32.mrb[20].mxu0  ;;  %v1388_v58 = vld [vmem:[#allocation2 + $0x24] sm:$0xf] }
 0x11b   : > { %1307 = vst [vmem:[#allocation2 + $0x48] sm:$0xf] %v1306_v9  ;;  %v1022_v14 = vor.u32 %v1020_v63, %v5474_v3  ;;  %v4731_v44 = vpack.c.bf16 %v718_v31, %v718_v31  ;;  %v4729_v60 = vpack.c.bf16 %v716_v4, %v716_v4  ;;  %v2498_v48 = vrot.slane %v4615_v37, 1  ;;  %v1302_v37 = vld [vmem:[#allocation2 + $0x44] sm:$0x1] }
 0x11c   : > { %2921 = vrot.lane.b32.xlu0 %v2740_v5, %s5129_s11  ;;  %v2499_v17 = vrot.slane %v5463_v55, 1  ;;  %v2218_v40 = vshrl.u32 %v5381_v23, 16  ;;  %v2222_v19 = vrot.slane %v2220_v16, 1  ;;  %v1727_v29 = vsel %vm1703_vm9, %v1722_v12, %v1726_v13  ;;  %v1389_v23 = vld [vmem:[#allocation2 + $0x28] sm:$0xf]  ;;  %v5498_v16 = vpop.f32.mrb[21].mxu0 }
 0x11d   : > { %2143 = vrot.lane.b32.xlu1 %v5443_v24, %s5125_s26  ;;  %v1299_v22 = vsel %vm5321_vm11, %v1022_v14, %v1298_v34  ;;  %v1042_v10 = vshrl.u32 %v4731_v44, 16  ;;  %v1045_v26 = vshll.u32 %v4731_v44, 16  ;;  %v1025_v11 = vshrl.u32 %v4729_v60, 16  ;;  %v5502_v53 = vpop.f32.mrb[22].mxu0  ;;  %v1515_v63 = vld [vmem:[#allocation2 + $0x30] sm:$0xf] }
 0x11e   : > { %1300 = vst [vmem:[#allocation2 + $0x3c] sm:$0xf] %v1299_v22  ;;  %v1028_v38 = vshll.u32 %v4729_v60, 16  ;;  %v2223_v39 = vor.u32 %v2222_v19, %v2218_v40  ;;  %v2225_v42 = vshll.u32 %v5409_v59, 16  ;;  %v1023_v43 = vrot.slane %v5474_v3, 4  ;;  %v5509_v5 = vpop.f32.mrb[23].mxu0 }
 0x11f   : > { %v1044_v45 = vrot.slane %v1042_v10, 7  ;;  %v1027_v47 = vrot.slane %v1025_v11, 7  ;;  %v4567_v50 = vcombine.low %v1433_v21, %v1389_v23  ;;  %v2744_v54 = vshll.u32 %v5472_v2, 16  ;;  %v1516_v31 = vld [vmem:[#allocation2 + $0x34] sm:$0xf] }
 0x120   : > { %1898 = vrot.lane.b32.xlu0 %v1727_v29, %s5124_s23  ;;  %v2500_v57 = vsel %vm1976_vm8, %v2498_v48, %v2499_v17  ;;  %v2227_v59 = vrot.slane %v2225_v42, 1  ;;  %v1987_v61 = vrot.slane %v5484_v32, 1  ;;  %v1561_v4 = vld [vmem:[#allocation2 + $0x30] sm:$0xe]  ;;  %v1391_v14 = vld [vmem:[#allocation2 + $0x34] sm:$0xf]  ;;  %v5534_v11 = vcombine.low %v1515_v63, %v1516_v31 }
 0x121   : > { %2651 = vrot.lane.b32.xlu1 %v5472_v2, %s5122_s21  ;;  %v1390_v3 = vld [vmem:[#allocation2 + $0x30] sm:$0xf]  ;;  %v1047_v9 = vor.u32 %v1045_v26, %v1044_v45  ;;  %v1049_v12 = vrot.slane %v1044_v45, 4  ;;  %v1030_v34 = vor.u32 %v1028_v38, %v1027_v47  ;;  %v1032_v13 = vrot.slane %v1027_v47, 4  ;;  %v1560_v26 = vld [vmem:[#allocation2 + $0x24] sm:$0xe] }
 0x122   : > { %v2228_v44 = vsel %vm1703_vm9, %v2223_v39, %v2227_v59  ;;  %v1986_v60 = vrot.slane %v4567_v50, 1  ;;  %v2254_v48 = vshrl.u32 %v5443_v24, 16  ;;  %v2258_v17 = vrot.slane %v2256_v51, 1  ;;  %v5515_v40 = vld [vmem:[#allocation2 + $0x38] ss:$0 sps:$4 sm:$0x11]  }
 0x123   : > { %v1048_v19 = vsel %vm5328_vm12, %v1040_v6, %v1047_v9  ;;  %v1310_v21 = vsel %vm5241_vm5, %v1049_v12, %v1309_v30  ;;  %v1031_v22 = vsel %vm5328_vm12, %v1023_v43, %v1030_v34  ;;  %v1303_v10 = vsel %vm5241_vm5, %v1032_v13, %v1302_v37  ;;  %v5530_v51 = vld [vmem:[#allocation2 + $0x2c] ss:$0 sps:$4 sm:$0x11]   ;;  %v1450_v30 = vld [vmem:[#allocation2 + $0x24] sm:$0xf] }
 0x124   : > { %2409 = vrot.lane.b32.xlu0 %v2228_v44, %s5128_s29  ;;  %1308 = vst.msk [vmem:[#allocation2 + $0x4c] sm:$0xf] %vm739_vm4, %v1048_v19  ;;  %1311 = vst [vmem:[#allocation2 + $0x50] sm:$0x1] %v1310_v21  ;;  %v2261_v24 = vshll.u32 %v5463_v55, 16  ;;  %v5532_v6 = vcombine.low %v1388_v58, %v1389_v23  ;;  %v4662_v29 = vcombine.low %v1561_v4, %v1516_v31  ;;  %v1760_v47 = vshll.u32 %v5515_v40, 16 }
 0x125   : > { %1301 = vst.msk [vmem:[#allocation2 + $0x40] sm:$0xf] %vm739_vm4, %v1031_v22  ;;  %1304 = vst [vmem:[#allocation2 + $0x44] sm:$0x1] %v1303_v10  ;;  %2543 = vrot.lane.b32.xlu1 %v2500_v57, %s5126_s27  ;;  %v1451_v38 = vld [vmem:[#allocation2 + $0x28] sm:$0xf]  ;;  %v5536_v37 = vcombine.low %v1390_v3, %v1391_v14  ;;  %v1988_v42 = vsel %vm1976_vm8, %v1986_v60, %v1987_v61  ;;  %v2259_v43 = vor.u32 %v2258_v17, %v2254_v48 }
 0x126   : > { %v1434_v39 = vld [vmem:[#allocation2 + $0x30] sm:$0xe]  ;;  %v2263_v45 = vrot.slane %v2261_v24, 1  ;;  %v5540_v50 = vld [vmem:[#allocation2 + $0x38] ss:$0 sps:$4 sm:$0x11]   ;;  %v637_v31 = vadd.f32 %v5372_v8, %v5312_v18  ;;  %v629_v4 = vadd.f32 %v5312_v18, %v5393_v35  ;;  %v4661_v9 = vcombine.low %v1560_v26, %v5453_v46 }
 0x127   : > { %v1496_v55 = vld [vmem:[#allocation2 + $0x24] sm:$0xe]  ;;  %v1753_v23 = vshrl.u32 %v5536_v37, 16  ;;  %v1755_v57 = vshll.u32 %v5536_v37, 16  ;;  %v2742_v59 = vshrl.u32 %v5472_v2, 16  ;;  %v2746_v58 = vrot.slane %v2744_v54, 1 }
 0x128   : > { %2653 = vrot.lane.b32.xlu0 %v5534_v11, %s5122_s21  ;;  %v2749_v61 = vshll.u32 %v5530_v51, 16  ;;  %v4568_v63 = vcombine.low %v1434_v39, %v1391_v14  ;;  %v5048_v3 = vld [vmem:[%s6763_s4] sm:$0xff]   ;;  %v5557_v12 = vcombine.low %v1450_v30, %v1451_v38  ;;  %v640_v54 = vadd.f32 %v5406_v56, %v5312_v18  ;;  %v5049_v34 = vld [vmem:[%s6763_s4 + $0x8] sm:$0xff]   ;;  %v5569_v56 = vpop.f32.mrb[24].mxu0  ;;  %v5053_v30 = vld [vmem:[%s6763_s4 + $0x10] sm:$0xff]  }
 0x129   : > { %2031 = vrot.lane.b32.xlu1 %v1988_v42, %s5123_s22  ;;  %v1757_v2 = vrot.slane %v1755_v57, 1  ;;  %v4614_v8 = vcombine.low %v1496_v55, %v1451_v38  ;;  %v3007_v13 = vrot.slane %v4662_v29, 1  ;;  %v3008_v35 = vrot.slane %v5540_v50, 1  ;;  %4845 = vmatprep.subr.bf16.mxu1 %v5048_v3  ;;  %v5580_v39 = vld [vmem:[#allocation2 + $0x2c] ss:$0 sps:$4 sm:$0x11]  }
 0x12a   : > { %v1743_v14 = vshll.u32 %v5532_v6, 16  ;;  %v2264_v44 = vsel %vm1703_vm9, %v2259_v43, %v2263_v45  ;;  %v1762_v60 = vrot.slane %v1760_v47, 1  ;;  %v2747_v48 = vor.u32 %v2746_v58, %v2742_v59  ;;  %4846 = vmatpush3.bf16.msra.mxu1 %v5048_v3  ;;  %v5591_v58 = vpop.f32.mrb[25].mxu0 }
 0x12b   : > { %v1758_v46 = vor.u32 %v1757_v2, %v1753_v23  ;;  %v2751_v17 = vrot.slane %v2749_v61, 1  ;;  %v1989_v19 = vrot.slane %v4568_v63, 1  ;;  %v1990_v21 = vrot.slane %v5515_v40, 1  ;;  %4847 = vmatprep.subr.bf16.mxu1 %v5049_v34  ;;  %v1456_v23 = vld [vmem:[#allocation2 + $0x48] sm:$0xf] }
 0x12c   : > { %2141 = vrot.lane.b32.xlu0 %v5557_v12, %s5125_s26  ;;  %v1748_v22 = vshll.u32 %v5484_v32, 16  ;;  %v1741_v10 = vshrl.u32 %v5532_v6, 16  ;;  %v1745_v26 = vrot.slane %v1743_v14, 1  ;;  %v3004_v24 = vrot.slane %v4661_v9, 1  ;;  %v5589_v57 = vld [vmem:[#allocation2 + $0x4c] sm:$0xf] }
 0x12d   : > { %2415 = vrot.lane.b32.xlu1 %v2264_v44, %s5128_s29  ;;  %v3005_v29 = vrot.slane %v5530_v51, 1  ;;  %v3009_v38 = vsel %vm1976_vm8, %v3007_v13, %v3008_v35  ;;  %v721_v42 = vmax.f32 %v637_v31, 0.0  ;;  %v2756_v40 = vshll.u32 %v5534_v11, 16  ;;  %v5594_v9 = vpop.f32.mrb[26].mxu0 }
 0x12e   : > { %v2244_v32 = vshll.u32 %v5557_v12, 16  ;;  %v1763_v43 = vsel %vm1703_vm9, %v1758_v46, %v1762_v60  ;;  %v2495_v45 = vrot.slane %v4614_v8, 1  ;;  %4848 = vmatpush3.bf16.msra.mxu1 %v5049_v34  ;;  %v2752_v51 = vsel %vm1703_vm9, %v2747_v48, %v2751_v17 }
 0x12f   : > { %v1991_v47 = vsel %vm1976_vm8, %v1989_v19, %v1990_v21  ;;  %v1750_v55 = vrot.slane %v1748_v22, 1  ;;  %v4734_v59 = vpack.c.bf16 %v721_v42, %v721_v42  ;;  %4849 = vmatprep.subr.bf16.mxu1 %v5053_v30  ;;  %v1746_v61 = vor.u32 %v1745_v26, %v1741_v10  ;;  %v1312_v10 = vld [vmem:[#allocation2 + $0x54] sm:$0xf] }
 0x130   : > { %3053 = vrot.lane.b32.xlu0 %v3009_v38, %s5127_s28  ;;  %v3006_v63 = vsel %vm1976_vm8, %v3004_v24, %v3005_v29  ;;  %v719_v31 = vmax.f32 %v629_v4, 0.0  ;;  %v722_v3 = vmax.f32 %v640_v54, 0.0  ;;  %v2496_v2 = vrot.slane %v5580_v39, 1  ;;  %v1323_v24 = vld [vmem:[#allocation2 + $0x68] sm:$0x1] }
 0x131   : > { %1904 = vrot.lane.b32.xlu1 %v1763_v43, %s5124_s23  ;;  %v1068_v34 = vshrl.u32 %v4734_v59, 16  ;;  %v1071_v8 = vshll.u32 %v4734_v59, 16  ;;  %v632_v13 = vadd.f32 %v5312_v18, %v5432_v15  ;;  %v2754_v35 = vshrl.u32 %v5534_v11, 16  ;;  %v1319_v18 = vld [vmem:[#allocation2 + $0x60] sm:$0xf] }
 0x132   : > { %v2758_v14 = vrot.slane %v2756_v40, 1  ;;  %v4732_v44 = vpack.c.bf16 %v719_v31, %v719_v31  ;;  %v4735_v46 = vpack.c.bf16 %v722_v3, %v722_v3  ;;  %4850 = vmatpush3.bf16.msra.mxu1 %v5053_v30  ;;  %v5603_v4 = vcombine.low %v1456_v23, %v5589_v57  ;;  %v5608_v30 = vpop.f32.mrb[27].mxu0  ;;  %v1499_v43 = vld [vmem:[#allocation2 + $0x48] sm:$0xe]  ;;  %v1517_v23 = vld [vmem:[#allocation2 + $0x3c] sm:$0xf] }
 0x133   : > { %v1070_v54 = vrot.slane %v1068_v34, 7  ;;  %v2761_v60 = vshll.u32 %v5540_v50, 16  ;;  %v720_v48 = vmax.f32 %v632_v13, 0.0  ;;  %v1751_v17 = vsel %vm1703_vm9, %v1746_v61, %v1750_v55  ;;  %v5615_v3 = vld [vmem:[#allocation2 + $0x40] sm:$0xf] }
 0x134   : > { %2033 = vrot.lane.b32.xlu0 %v1991_v47, %s5123_s22  ;;  %v1051_v15 = vshrl.u32 %v4732_v44, 16  ;;  %v1054_v19 = vshll.u32 %v4732_v44, 16  ;;  %v1076_v21 = vshrl.u32 %v4735_v46, 16  ;;  %v2497_v11 = vsel %vm1976_vm8, %v2495_v45, %v2496_v2 }
 0x135   : > { %2923 = vrot.lane.b32.xlu1 %v2752_v51, %s5129_s11  ;;  %v1073_v22 = vor.u32 %v1071_v8, %v1070_v54  ;;  %v1079_v26 = vshll.u32 %v4735_v46, 16  ;;  %v4733_v29 = vpack.c.bf16 %v720_v48, %v720_v48  ;;  %v1074_v38 = vrot.slane %v1070_v54, 4  ;;  %v1316_v54 = vld [vmem:[#allocation2 + $0x5c] sm:$0x1]  ;;  %v1435_v48 = vld [vmem:[#allocation2 + $0x3c] sm:$0xe] }
 0x136   : > { %v2759_v50 = vor.u32 %v2758_v14, %v2754_v35  ;;  %v1053_v42 = vrot.slane %v1051_v15, 7  ;;  %v1078_v40 = vrot.slane %v1076_v21, 7  ;;  %v2763_v45 = vrot.slane %v2761_v60, 1  ;;  %v4999_v60 = vld [vmem:[#allocation2 + $0x50] ss:$0 sps:$4 sm:$0x11]  }
 0x137   : > { %v1320_v51 = vsel %vm5321_vm11, %v1073_v22, %v1319_v18  ;;  %v1059_v47 = vshrl.u32 %v4733_v29, 16  ;;  %v1062_v55 = vshll.u32 %v4733_v29, 16  ;;  %v2246_v8 = vrot.slane %v2244_v32, 1  ;;  %v1563_v15 = vld [vmem:[#allocation2 + $0x48] sm:$0xe] }
 0x138   : > { %3051 = vrot.lane.b32.xlu0 %v3006_v63, %s5127_s28  ;;  %1321 = vst [vmem:[#allocation2 + $0x60] sm:$0xf] %v1320_v51  ;;  %v1056_v59 = vor.u32 %v1054_v19, %v1053_v42  ;;  %v1081_v61 = vor.u32 %v1079_v26, %v1078_v40  ;;  %v1083_v31 = vrot.slane %v1078_v40, 4  ;;  %v2242_v63 = vshrl.u32 %v5557_v12, 16  ;;  %v5056_v12 = vld [vmem:[%s6763_s4 + $0x18] sm:$0xff]  }
 0x139   : > { %1902 = vrot.lane.b32.xlu1 %v1751_v17, %s5124_s23  ;;  %v1057_v2 = vrot.slane %v1053_v42, 4  ;;  %v1061_v34 = vrot.slane %v1059_v47, 7  ;;  %v2249_v13 = vshll.u32 %v5580_v39, 16  ;;  %v4617_v35 = vcombine.low %v1499_v43, %v5589_v57  ;;  %v1394_v19 = vld [vmem:[#allocation2 + $0x48] sm:$0xf]  ;;  %4851 = vmatprep.subr.bf16.mxu1 %v5056_v12 }
 0x13a   : > { %v1313_v14 = vsel %vm5321_vm11, %v1056_v59, %v1312_v10  ;;  %v1082_v44 = vsel %vm5328_vm12, %v1074_v38, %v1081_v61  ;;  %v1324_v46 = vsel %vm5241_vm5, %v1083_v31, %v1323_v24  ;;  %v2280_v39 = vshll.u32 %v5603_v4, 16  ;;  %v5639_v21 = vld [vmem:[#allocation2 + $0x4c] sm:$0xf]  ;;  %v1393_v24 = vld [vmem:[#allocation2 + $0x40] sm:$0xf]  ;;  %4852 = vmatpush3.bf16.msra.mxu1 %v5056_v12  ;;  %v5645_v38 = vpop.f32.mrb[28].mxu0 }
 0x13b   : > { %1314 = vst [vmem:[#allocation2 + $0x54] sm:$0xf] %v1313_v14  ;;  %1322 = vst.msk [vmem:[#allocation2 + $0x64] sm:$0xf] %vm739_vm4, %v1082_v44  ;;  %v1064_v32 = vor.u32 %v1062_v55, %v1061_v34  ;;  %v1066_v57 = vrot.slane %v1061_v34, 4  ;;  %v5636_v17 = vcombine.low %v1517_v23, %v5615_v3  ;;  %v2764_v18 = vsel %vm1703_vm9, %v2759_v50, %v2763_v45 }
 0x13c   : > { %2541 = vrot.lane.b32.xlu0 %v2497_v11, %s5126_s27  ;;  %1325 = vst [vmem:[#allocation2 + $0x68] sm:$0x1] %v1324_v46  ;;  %v2247_v10 = vor.u32 %v2246_v8, %v2242_v63  ;;  %v2251_v26 = vrot.slane %v2249_v13, 1  ;;  %v1520_v29 = vld [vmem:[#allocation2 + $0x4c] sm:$0xf]  ;;  %v2504_v50 = vrot.slane %v4617_v35, 1  ;;  %v4569_v43 = vcombine.low %v1435_v48, %v1393_v24 }
 0x13d   : > { %2147 = vrot.lane.b32.xlu1 %v5603_v4, %s5125_s26  ;;  %v1065_v11 = vsel %vm5328_vm12, %v1057_v2, %v1064_v32  ;;  %v1317_v22 = vsel %vm5241_vm5, %v1066_v57, %v1316_v54  ;;  %v2505_v42 = vrot.slane %v4999_v60, 1  ;;  %v5649_v40 = vld [vmem:[#allocation2 + $0x44] ss:$0 sps:$4 sm:$0x11]   ;;  %v1519_v51 = vld [vmem:[#allocation2 + $0x48] sm:$0xf]  ;;  %v5657_v31 = vcombine.low %v1394_v19, %v5639_v21 }
 0x13e   : > { %1315 = vst.msk [vmem:[#allocation2 + $0x58] sm:$0xf] %vm739_vm4, %v1065_v11  ;;  %1318 = vst [vmem:[#allocation2 + $0x5c] sm:$0x1] %v1317_v22  ;;  %v1454_v45 = vld [vmem:[#allocation2 + $0x3c] sm:$0xf]  ;;  %v4664_v2 = vcombine.low %v1563_v15, %v1520_v29  ;;  %v2252_v35 = vsel %vm1703_vm9, %v2247_v10, %v2251_v26  ;;  %v5678_v32 = vcombine.low %v1519_v51, %v1520_v29 }
 0x13f   : > { %v1392_v47 = vld [vmem:[#allocation2 + $0x3c] sm:$0xf]  ;;  %v2278_v55 = vshrl.u32 %v5603_v4, 16  ;;  %v2282_v23 = vrot.slane %v2280_v39, 1  ;;  %v2285_v59 = vshll.u32 %v4999_v60, 16  ;;  %6783 = vst [vmem:[#allocation3_spill] sm:$0xff] %v5657_v31  ;;  %v2506_v46 = vsel %vm1976_vm8, %v2504_v50, %v2505_v42 }
 0x140   : > { %2925 = vrot.lane.b32.xlu0 %v2764_v18, %s5129_s11  ;;  %v5654_v61 = vld [vmem:[#allocation2 + $0x40] sm:$0xf]  ;;  %v5659_v63 = vpop.f32.mrb[29].mxu0  ;;  %v5661_v34 = vld [vmem:[#allocation2 + $0x50] ss:$0 sps:$4 sm:$0x11]   ;;  %v5685_v11 = vcombine.low %v1392_v47, %v1393_v24 }
 0x141   : > { %2655 = vrot.lane.b32.xlu1 %v5636_v17, %s5122_s21  ;;  %v5663_v8 = vld [vmem:[#allocation2 + $0x50] ss:$0 sps:$4 sm:$0x11]   ;;  %v2768_v13 = vshll.u32 %v5636_v17, 16  ;;  %v5669_v4 = vpop.f32.mrb[30].mxu0  ;;  %v1992_v54 = vrot.slane %v4569_v43, 1  ;;  %v2283_v57 = vor.u32 %v2282_v23, %v2278_v55  ;;  %v5683_v15 = vcombine.low %v1454_v45, %v5654_v61 }
 0x142   : > { %v5667_v14 = vld [vmem:[#allocation2 + $0x44] ss:$0 sps:$4 sm:$0x11]   ;;  %v1562_v44 = vld [vmem:[#allocation2 + $0x3c] sm:$0xe]  ;;  %v1993_v60 = vrot.slane %v5649_v40, 1 }
 0x143   : > { %v1779_v12 = vshll.u32 %v5657_v31, 16  ;;  %v5675_v39 = vpop.f32.mrb[31].mxu0  ;;  %v2287_v48 = vrot.slane %v2285_v59, 1  ;;  %v5680_v18 = vld [vmem:[#allocation2 + $0x3c] sm:$0xe]  ;;  %v1784_v22 = vshll.u32 %v5661_v34, 16  ;;  %v4663_v50 = vcombine.low %v1562_v44, %v5615_v3 }
 0x144   : > { %2413 = vrot.lane.b32.xlu0 %v2252_v35, %s5128_s29  ;;  %v1436_v19 = vld [vmem:[#allocation2 + $0x48] sm:$0xe]  ;;  %v3013_v10 = vrot.slane %v4664_v2, 1  ;;  %v3014_v26 = vrot.slane %v5663_v8, 1  ;;  %v2766_v29 = vshrl.u32 %v5636_v17, 16  ;;  %v2770_v42 = vrot.slane %v2768_v13, 1 }
 0x145   : > { %2547 = vrot.lane.b32.xlu1 %v2506_v46, %s5126_s27  ;;  %v2773_v43 = vshll.u32 %v5667_v14, 16  ;;  %v1994_v51 = vsel %vm1976_vm8, %v1992_v54, %v1993_v60  ;;  %v1777_v24 = vshrl.u32 %v5657_v31, 16  ;;  %v1781_v45 = vrot.slane %v1779_v12, 1  ;;  %v1460_v35 = vld [vmem:[#allocation2 + $0x60] sm:$0xf] }
 0x146   : > { %v4570_v47 = vcombine.low %v1436_v19, %v5639_v21  ;;  %v2780_v55 = vshll.u32 %v5678_v32, 16  ;;  %v2288_v3 = vsel %vm1703_vm9, %v2283_v57, %v2287_v48  ;;  %v2268_v17 = vshll.u32 %v5683_v15, 16  ;;  %v5708_v21 = vld [vmem:[%s6762_s3] ss:$0 sm:$0xff]  ;;  %v5714_v12 = vld [vmem:[#allocation2 + $0x64] sm:$0xf] }
 0x147   : > { %v4616_v23 = vcombine.low %v5680_v18, %v5654_v61  ;;  %v1786_v59 = vrot.slane %v1784_v22, 1  ;;  %v3015_v2 = vsel %vm1976_vm8, %v3013_v10, %v3014_v26  ;;  %v1767_v13 = vshll.u32 %v5685_v11, 16 }
 0x148   : > { %2657 = vrot.lane.b32.xlu0 %v5678_v32, %s5122_s21  ;;  %v653_v44 = vadd.f32 %v5708_v21, %v5449_v41  ;;  %v2771_v46 = vor.u32 %v2770_v42, %v2766_v29  ;;  %v2775_v54 = vrot.slane %v2773_v43, 1  ;;  %v1996_v60 = vrot.slane %v5661_v34, 1 }
 0x149   : > { %2035 = vrot.lane.b32.xlu1 %v1994_v51, %s5123_s22  ;;  %v1765_v61 = vshrl.u32 %v5685_v11, 16  ;;  %v1782_v57 = vor.u32 %v1781_v45, %v1777_v24  ;;  %v1995_v48 = vrot.slane %v4570_v47, 1  ;;  %v1772_v18 = vshll.u32 %v5649_v40, 16  ;;  %v5734_v45 = vld [vmem:[#allocation2 + $0x44] ss:$0 sps:$4 sm:$0x11]  }
 0x14a   : > { %v725_v19 = vmax.f32 %v653_v44, 0.0  ;;  %v3010_v22 = vrot.slane %v4663_v50, 1  ;;  %v645_v41 = vadd.f32 %v5708_v21, %v5456_v62  ;;  %v656_v34 = vadd.f32 %v5708_v21, %v5469_v1 }
 0x14b   : > { %v648_v10 = vadd.f32 %v5708_v21, %v5486_v7  ;;  %v1769_v26 = vrot.slane %v1767_v13, 1  ;;  %v3011_v29 = vrot.slane %v5667_v14, 1  ;;  %v5728_v42 = vcombine.low %v1460_v35, %v5714_v12 }
 0x14c   : > { %2145 = vrot.lane.b32.xlu0 %v5683_v15, %s5125_s26  ;;  %v4738_v40 = vpack.c.bf16 %v725_v19, %v725_v19  ;;  %v2776_v43 = vsel %vm1703_vm9, %v2771_v46, %v2775_v54  ;;  %v723_v51 = vmax.f32 %v645_v41, 0.0  ;;  %v726_v50 = vmax.f32 %v656_v34, 0.0 }
 0x14d   : > { %2419 = vrot.lane.b32.xlu1 %v2288_v3, %s5128_s29  ;;  %v724_v24 = vmax.f32 %v648_v10, 0.0  ;;  %v1787_v62 = vsel %vm1703_vm9, %v1782_v57, %v1786_v59  ;;  %v1997_v1 = vsel %vm1976_vm8, %v1995_v48, %v1996_v60  ;;  %v1774_v14 = vrot.slane %v1772_v18, 1  ;;  %v1333_v59 = vld [vmem:[#allocation2 + $0x78] sm:$0xf]  ;;  %v1326_v10 = vld [vmem:[#allocation2 + $0x6c] sm:$0xf] }
 0x14e   : > { %v1102_v7 = vshrl.u32 %v4738_v40, 16  ;;  %v1105_v47 = vshll.u32 %v4738_v40, 16  ;;  %v4736_v3 = vpack.c.bf16 %v723_v51, %v723_v51  ;;  %v4739_v13 = vpack.c.bf16 %v726_v50, %v726_v50 }
 0x14f   : > { %v4737_v35 = vpack.c.bf16 %v724_v24, %v724_v24  ;;  %v1770_v44 = vor.u32 %v1769_v26, %v1765_v61  ;;  %v3012_v46 = vsel %vm1976_vm8, %v3010_v22, %v3011_v29  ;;  %v2501_v54 = vrot.slane %v4616_v23, 1  ;;  %v1501_v61 = vld [vmem:[#allocation2 + $0x60] sm:$0xe] }
 0x150   : > { %3057 = vrot.lane.b32.xlu0 %v3015_v2, %s5127_s28  ;;  %v1104_v19 = vrot.slane %v1102_v7, 7  ;;  %v1085_v57 = vshrl.u32 %v4736_v3, 16  ;;  %v1088_v2 = vshll.u32 %v4736_v3, 16  ;;  %v1110_v41 = vshrl.u32 %v4739_v13, 16 }
 0x151   : > { %1908 = vrot.lane.b32.xlu1 %v1787_v62, %s5124_s23  ;;  %v1113_v60 = vshll.u32 %v4739_v13, 16  ;;  %v2502_v48 = vrot.slane %v5734_v45, 1  ;;  %v1093_v18 = vshrl.u32 %v4737_v35, 16  ;;  %v1096_v40 = vshll.u32 %v4737_v35, 16  ;;  %v1337_v62 = vld [vmem:[#allocation2 + $0x80] sm:$0x1] }
 0x152   : > { %v1107_v34 = vor.u32 %v1105_v47, %v1104_v19  ;;  %v1108_v26 = vrot.slane %v1104_v19, 4  ;;  %v2778_v23 = vshrl.u32 %v5678_v32, 16  ;;  %v1087_v22 = vrot.slane %v1085_v57, 7  ;;  %v1330_v13 = vld [vmem:[#allocation2 + $0x74] sm:$0x1] }
 0x153   : > { %v1112_v29 = vrot.slane %v1110_v41, 7  ;;  %v2782_v50 = vrot.slane %v2780_v55, 1  ;;  %v2785_v24 = vshll.u32 %v5663_v8, 16  ;;  %v1775_v35 = vsel %vm1703_vm9, %v1770_v44, %v1774_v14  ;;  %v5750_v57 = vld [vmem:[#allocation2 + $0x58] sm:$0xf] }
 0x154   : > { %2037 = vrot.lane.b32.xlu0 %v1997_v1, %s5123_s22  ;;  %v1334_v51 = vsel %vm5321_vm11, %v1107_v34, %v1333_v59  ;;  %v1095_v1 = vrot.slane %v1093_v18, 7  ;;  %v1090_v7 = vor.u32 %v1088_v2, %v1087_v22  ;;  %v1091_v47 = vrot.slane %v1087_v22, 4  ;;  %v1521_v59 = vld [vmem:[#allocation2 + $0x54] sm:$0xf]  ;;  %v1397_v18 = vld [vmem:[#allocation2 + $0x58] sm:$0xf] }
 0x155   : > { %2927 = vrot.lane.b32.xlu1 %v2776_v43, %s5129_s11  ;;  %1335 = vst [vmem:[#allocation2 + $0x78] sm:$0xf] %v1334_v51  ;;  %v1115_v43 = vor.u32 %v1113_v60, %v1112_v29  ;;  %v1117_v3 = vrot.slane %v1112_v29, 4  ;;  %v4619_v19 = vcombine.low %v1501_v61, %v5714_v12  ;;  %v2304_v8 = vshll.u32 %v5728_v42, 16  ;;  %v1437_v12 = vld [vmem:[#allocation2 + $0x54] sm:$0xe] }
 0x156   : > { %v1098_v32 = vor.u32 %v1096_v40, %v1095_v1  ;;  %v1100_v55 = vrot.slane %v1095_v1, 4  ;;  %v1327_v2 = vsel %vm5321_vm11, %v1090_v7, %v1326_v10  ;;  %v5017_v44 = vld [vmem:[#allocation2 + $0x68] ss:$0 sps:$4 sm:$0x11]   ;;  %v2787_v60 = vrot.slane %v2785_v24, 1 }
 0x157   : > { %v1116_v41 = vsel %vm5328_vm12, %v1108_v26, %v1115_v43  ;;  %v1338_v14 = vsel %vm5241_vm5, %v1117_v3, %v1337_v62  ;;  %1328 = vst [vmem:[#allocation2 + $0x6c] sm:$0xf] %v1327_v2  ;;  %v2503_v40 = vsel %vm1976_vm8, %v2501_v54, %v2502_v48  ;;  %v2266_v61 = vshrl.u32 %v5683_v15, 16  ;;  %v5771_v22 = vld [vmem:[#allocation2 + $0x5c] ss:$0 sps:$4 sm:$0x11]  }
 0x158   : > { %3055 = vrot.lane.b32.xlu0 %v3012_v46, %s5127_s28  ;;  %v2783_v46 = vor.u32 %v2782_v50, %v2778_v23  ;;  %1336 = vst.msk [vmem:[#allocation2 + $0x7c] sm:$0xf] %vm739_vm4, %v1116_v41  ;;  %1339 = vst [vmem:[#allocation2 + $0x80] sm:$0x1] %v1338_v14  ;;  %v1099_v34 = vsel %vm5328_vm12, %v1091_v47, %v1098_v32  ;;  %v1331_v10 = vsel %vm5241_vm5, %v1100_v55, %v1330_v13  ;;  %v1523_v50 = vld [vmem:[#allocation2 + $0x60] sm:$0xf] }
 0x159   : > { %1906 = vrot.lane.b32.xlu1 %v1775_v35, %s5124_s23  ;;  %1329 = vst.msk [vmem:[#allocation2 + $0x70] sm:$0xf] %vm739_vm4, %v1099_v34  ;;  %1332 = vst [vmem:[#allocation2 + $0x74] sm:$0x1] %v1331_v10  ;;  %v2270_v26 = vrot.slane %v2268_v17, 1  ;;  %v2273_v23 = vshll.u32 %v5734_v45, 16  ;;  %v5775_v29 = vcombine.low %v1521_v59, %v5750_v57  ;;  %v4571_v51 = vcombine.low %v1437_v12, %v1397_v18 }
 0x15a   : > { %v1565_v54 = vld [vmem:[#allocation2 + $0x60] sm:$0xe]  ;;  %v5777_v24 = vld [vmem:[#allocation2 + $0x64] sm:$0xf]  ;;  %v5781_v15 = vld [vmem:[#allocation2 + $0x54] sm:$0xe]  ;;  %v2788_v1 = vsel %vm1703_vm9, %v2783_v46, %v2787_v60 }
 0x15b   : > { %v1398_v48 = vld [vmem:[#allocation2 + $0x60] sm:$0xf]  ;;  %v2510_v17 = vrot.slane %v4619_v19, 1  ;;  %v2511_v45 = vrot.slane %v5017_v44, 1  ;;  %v1524_v62 = vld [vmem:[#allocation2 + $0x64] sm:$0xf]  ;;  %v2271_v13 = vor.u32 %v2270_v26, %v2266_v61  ;;  %v4665_v14 = vcombine.low %v5781_v15, %v5750_v57 }
 0x15c   : > { %2545 = vrot.lane.b32.xlu0 %v2503_v40, %s5126_s27  ;;  %v2302_v7 = vshrl.u32 %v5728_v42, 16  ;;  %v2306_v47 = vrot.slane %v2304_v8, 1  ;;  %v2309_v43 = vshll.u32 %v5017_v44, 16  ;;  %v5785_v3 = vld [vmem:[#allocation2 + $0x68] ss:$0 sps:$4 sm:$0x11]   ;;  %v4666_v32 = vcombine.low %v1565_v54, %v1524_v62 }
 0x15d   : > { %2151 = vrot.lane.b32.xlu1 %v5728_v42, %s5125_s26  ;;  %v2275_v35 = vrot.slane %v2273_v23, 1  ;;  %v1396_v59 = vld [vmem:[#allocation2 + $0x54] sm:$0xf]  ;;  %v5788_v55 = vcombine.low %v1398_v48, %v5777_v24  ;;  %v5790_v2 = vld [vmem:[#allocation2 + $0x68] ss:$0 sps:$4 sm:$0x11]   ;;  %v2512_v44 = vsel %vm1976_vm8, %v2510_v17, %v2511_v45  ;;  %v5802_v12 = vcombine.low %v1523_v50, %v1524_v62 }
 0x15e   : > { %v2792_v19 = vshll.u32 %v5775_v29, 16  ;;  %v1998_v41 = vrot.slane %v4571_v51, 1  ;;  %v1999_v42 = vrot.slane %v5771_v22, 1  ;;  %v5795_v8 = vld [vmem:[#allocation2 + $0x5c] ss:$0 sps:$4 sm:$0x11]   ;;  %v5804_v34 = vcombine.low %v1396_v59, %v1397_v18 }
 0x15f   : > { %6784 = vst [vmem:[#allocation4_spill] sm:$0xff] %v5788_v55  ;;  %v1458_v46 = vld [vmem:[#allocation2 + $0x54] sm:$0xf]  ;;  %v785_v60 = vld [vmem:[#allocation2 + $0x90] sm:$0x1]  ;;  %v2307_v10 = vor.u32 %v2306_v47, %v2302_v7  ;;  %v2311_v40 = vrot.slane %v2309_v43, 1  ;;  %v2276_v51 = vsel %vm1703_vm9, %v2271_v13, %v2275_v35 }
 0x160   : > { %2929 = vrot.lane.b32.xlu0 %v2788_v1, %s5129_s11  ;;  %6785 = vst [vmem:[#allocation5_spill] sm:$0xff] %v5804_v34  ;;  %v5806_v61 = vld [vmem:[#allocation2 + $0x58] sm:$0xf]  ;;  %v5808_v26 = vld [vmem:[#allocation2 + $0x54] sm:$0xe]  ;;  %v1808_v23 = vshll.u32 %v5785_v3, 16  ;;  %v2000_v18 = vsel %vm1976_vm8, %v1998_v41, %v1999_v42 }
 0x161   : > { %2659 = vrot.lane.b32.xlu1 %v5775_v29, %s5122_s21  ;;  %v1803_v54 = vshll.u32 %v5788_v55, 16  ;;  %v3019_v48 = vrot.slane %v4666_v32, 1  ;;  %v3020_v50 = vrot.slane %v5790_v2, 1  ;;  %v1438_v17 = vld [vmem:[#allocation2 + $0x60] sm:$0xe]  ;;  %v2790_v45 = vshrl.u32 %v5775_v29, 16 }
 0x162   : > { %v2794_v62 = vrot.slane %v2792_v19, 1  ;;  %v2797_v1 = vshll.u32 %v5795_v8, 16  ;;  %v2804_v7 = vshll.u32 %v5802_v12, 16  ;;  %v5821_v47 = vcombine.low %v1458_v46, %v5806_v61  ;;  %v782_v35 = vld [vmem:[#allocation2 + $0x84] sm:$0x1] }
 0x163   : > { %v1801_v13 = vshrl.u32 %v5788_v55, 16  ;;  %v2312_v59 = vsel %vm1703_vm9, %v2307_v10, %v2311_v40  ;;  %v1810_v32 = vrot.slane %v1808_v23, 1  ;;  %v669_v29 = vadd.f32 %v5708_v21, %v5494_v27  ;;  %v835_v41 = vld [vmem:[#allocation2 + $0x98] sm:$0x1]  ;;  %v832_v43 = vld [vmem:[#allocation2 + $0x8c] sm:$0x1] }
 0x164   : > { %2417 = vrot.lane.b32.xlu0 %v2276_v51, %s5128_s29  ;;  %v786_v19 = vsel %vm5241_vm5, 0, %v785_v60  ;;  %v1805_v42 = vrot.slane %v1803_v54, 1  ;;  %v4572_v46 = vcombine.low %v1438_v17, %v5777_v24  ;;  %v2002_v51 = vrot.slane %v5785_v3, 1 }
 0x165   : > { %2551 = vrot.lane.b32.xlu1 %v2512_v44, %s5126_s27  ;;  %v3021_v44 = vsel %vm1976_vm8, %v3019_v48, %v3020_v50  ;;  %787 = vst [vmem:[#allocation2 + $0x90] sm:$0x1] %v786_v19  ;;  %v2795_v10 = vor.u32 %v2794_v62, %v2790_v45  ;;  %v2799_v40 = vrot.slane %v2797_v1, 1  ;;  %v1789_v23 = vshrl.u32 %v5804_v34, 16 }
 0x166   : > { %v729_v27 = vmax.f32 %v669_v29, 0.0  ;;  %v661_v60 = vadd.f32 %v5708_v21, %v5498_v16  ;;  %v783_v24 = vsel %vm5241_vm5, 0, %v782_v35  ;;  %v672_v3 = vadd.f32 %v5708_v21, %v5502_v53 }
 0x167   : > { %v836_v54 = vsel %vm5251_vm7, 0, %v835_v41  ;;  %v1791_v48 = vshll.u32 %v5804_v34, 16  ;;  %v1796_v50 = vshll.u32 %v5771_v22, 16  ;;  %784 = vst [vmem:[#allocation2 + $0x84] sm:$0x1] %v783_v24  ;;  %v1806_v16 = vor.u32 %v1805_v42, %v1801_v13 }
 0x168   : > { %2661 = vrot.lane.b32.xlu0 %v5802_v12, %s5122_s21  ;;  %v4742_v17 = vpack.c.bf16 %v729_v27, %v729_v27  ;;  %837 = vst [vmem:[#allocation2 + $0x98] sm:$0x1] %v836_v54  ;;  %v727_v45 = vmax.f32 %v661_v60, 0.0  ;;  %v730_v62 = vmax.f32 %v672_v3, 0.0  ;;  %v833_v1 = vsel %vm5251_vm7, 0, %v832_v43 }
 0x169   : > { %2039 = vrot.lane.b32.xlu1 %v2000_v18, %s5123_s22  ;;  %v664_v18 = vadd.f32 %v5708_v21, %v5509_v5  ;;  %v2001_v53 = vrot.slane %v4572_v46, 1  ;;  %834 = vst [vmem:[#allocation2 + $0x8c] sm:$0x1] %v833_v1  ;;  %v5858_v5 = vrot.slane %v4665_v14, 1  ;;  %v3017_v22 = vrot.slane %v5795_v8, 1 }
 0x16a   : > { %v1136_v35 = vshrl.u32 %v4742_v17, 16  ;;  %v1139_v29 = vshll.u32 %v4742_v17, 16  ;;  %v1464_v13 = vld [vmem:[#allocation2 + $0x78] sm:$0xf]  ;;  %v4740_v41 = vpack.c.bf16 %v727_v45, %v727_v45  ;;  %v4743_v43 = vpack.c.bf16 %v730_v62, %v730_v62  ;;  %v5862_v27 = vld [vmem:[#allocation2 + $0x7c] sm:$0xf] }
 0x16b   : > { %v728_v19 = vmax.f32 %v664_v18, 0.0  ;;  %v2800_v42 = vsel %vm1703_vm9, %v2795_v10, %v2799_v40  ;;  %v1793_v46 = vrot.slane %v1791_v48, 1  ;;  %v1811_v8 = vsel %vm1703_vm9, %v1806_v16, %v1810_v32  ;;  %v5869_v48 = vld [vmem:[#allocation2 + $0x5c] ss:$0 sps:$4 sm:$0x11]  }
 0x16c   : > { %2149 = vrot.lane.b32.xlu0 %v5821_v47, %s5125_s26  ;;  %v1138_v60 = vrot.slane %v1136_v35, 7  ;;  %v1347_v24 = vld [vmem:[#allocation2 + $0x90] sm:$0xf]  ;;  %v1119_v54 = vshrl.u32 %v4740_v41, 16  ;;  %v1122_v57 = vshll.u32 %v4740_v41, 16  ;;  %v1144_v15 = vshrl.u32 %v4743_v43, 16 }
 0x16d   : > { %2423 = vrot.lane.b32.xlu1 %v2312_v59, %s5128_s29  ;;  %v4741_v3 = vpack.c.bf16 %v728_v19, %v728_v19  ;;  %v5864_v59 = vpop.permute.xlu1 %2679  ;;  %v1147_v14 = vshll.u32 %v4743_v43, 16  ;;  %v1798_v40 = vrot.slane %v1796_v50, 1  ;;  %v2003_v19 = vsel %vm1976_vm8, %v2001_v53, %v2002_v51  ;;  %v1503_v53 = vld [vmem:[#allocation2 + $0x78] sm:$0xe]  ;;  %v788_v34 = vld [vmem:[#allocation2 + $0x9c] sm:$0x1] }
 0x16e   : > { %6786 = vst [vmem:[#allocation6_spill] sm:$0xff] %v5864_v59  ;;  %v1141_v17 = vor.u32 %v1139_v29, %v1138_v60  ;;  %v1142_v45 = vrot.slane %v1138_v60, 4  ;;  %v1121_v62 = vrot.slane %v1119_v54, 7  ;;  %v1340_v1 = vld [vmem:[#allocation2 + $0x84] sm:$0xf]  ;;  %v1146_v35 = vrot.slane %v1144_v15, 7  ;;  %v1897_v60 = vpop.permute.xlu0 %1896 }
 0x16f   : > { %v1127_v18 = vshrl.u32 %v4741_v3, 16  ;;  %v1130_v10 = vshll.u32 %v4741_v3, 16  ;;  %v5873_v41 = vcombine.low %v1464_v13, %v5862_v27  ;;  %v1794_v51 = vor.u32 %v1793_v46, %v1789_v23 }
 0x170   : > { %3061 = vrot.lane.b32.xlu0 %v3021_v44, %s5127_s28  ;;  %v1348_v32 = vsel %vm5321_vm11, %v1141_v17, %v1347_v24  ;;  %v1351_v44 = vld [vmem:[#allocation2 + $0x98] sm:$0x1]  ;;  %v1124_v29 = vor.u32 %v1122_v57, %v1121_v62  ;;  %v1125_v43 = vrot.slane %v1121_v62, 4  ;;  %v1149_v50 = vor.u32 %v1147_v14, %v1146_v35 }
 0x171   : > { %1912 = vrot.lane.b32.xlu1 %v1811_v8, %s5124_s23  ;;  %v1129_v16 = vrot.slane %v1127_v18, 7  ;;  %1349 = vst [vmem:[#allocation2 + $0x90] sm:$0xf] %v1348_v32  ;;  %v1151_v3 = vrot.slane %v1146_v35, 4  ;;  %v1344_v8 = vld [vmem:[#allocation2 + $0x8c] sm:$0x1]  ;;  %v2026_v24 = vpop.permute.xlu1 %2025  ;;  %v4621_v62 = vcombine.low %v1503_v53, %v5862_v27  ;;  %v1799_v32 = vsel %vm1703_vm9, %v1794_v51, %v1798_v40 }
 0x172   : > { %v2802_v13 = vshrl.u32 %v5802_v12, 16  ;;  %v2806_v57 = vrot.slane %v2804_v7, 1  ;;  %v1341_v14 = vsel %vm5321_vm11, %v1124_v29, %v1340_v1  ;;  %v1150_v17 = vsel %vm5328_vm12, %v1142_v45, %v1149_v50  ;;  %v1525_v18 = vld [vmem:[#allocation2 + $0x6c] sm:$0xf]  ;;  %v1567_v27 = vld [vmem:[#allocation2 + $0x78] sm:$0xe] }
 0x173   : > { %v1132_v54 = vor.u32 %v1130_v10, %v1129_v16  ;;  %v1134_v15 = vrot.slane %v1129_v16, 4  ;;  %v1352_v23 = vsel %vm5241_vm5, %v1151_v3, %v1351_v44  ;;  %v2292_v46 = vshll.u32 %v5821_v47, 16  ;;  %v5891_v10 = vld [vmem:[#allocation2 + $0x70] sm:$0xf]  ;;  %1342 = vst [vmem:[#allocation2 + $0x84] sm:$0xf] %v1341_v14 }
 0x174   : > { %2041 = vrot.lane.b32.xlu0 %v2003_v19, %s5123_s22  ;;  %1350 = vst.msk [vmem:[#allocation2 + $0x94] sm:$0xf] %vm739_vm4, %v1150_v17  ;;  %1353 = vst [vmem:[#allocation2 + $0x98] sm:$0x1] %v1352_v23  ;;  %v3018_v45 = vsel %vm1976_vm8, %v5858_v5, %v3017_v22  ;;  %v6787_v1 = vcombine.low %v5808_v26, %v5806_v61  ;;  %v2328_v44 = vshll.u32 %v5873_v41, 16  ;;  %v2297_v53 = vshll.u32 %v5869_v48, 16 }
 0x175   : > { %2931 = vrot.lane.b32.xlu1 %v2800_v42, %s5129_s11  ;;  %v2809_v42 = vshll.u32 %v5790_v2, 16  ;;  %v1133_v12 = vsel %vm5328_vm12, %v1125_v43, %v1132_v54  ;;  %v1345_v7 = vsel %vm5241_vm5, %v1134_v15, %v1344_v8  ;;  %v2508_v2 = vrot.slane %v5869_v48, 1  ;;  %v5035_v19 = vld [vmem:[#allocation2 + $0x80] ss:$0 sps:$4 sm:$0x11]  }
 0x176   : > { %v2507_v35 = vrot.slane %v6787_v1, 1  ;;  %1343 = vst.msk [vmem:[#allocation2 + $0x88] sm:$0xf] %vm739_vm4, %v1133_v12  ;;  %1346 = vst [vmem:[#allocation2 + $0x8c] sm:$0x1] %v1345_v7  ;;  %v3083_v61 = vsel %vm3081_vm13, %v5265_v33, %v1897_v60  ;;  %v5916_v26 = vcombine.low %v1525_v18, %v5891_v10  ;;  %v2807_v29 = vor.u32 %v2806_v57, %v2802_v13 }
 0x177   : > { %v5910_v16 = vld [vmem:[#allocation2 + $0x6c] sm:$0xe]  ;;  %v1401_v5 = vld [vmem:[#allocation2 + $0x70] sm:$0xf]  ;;  %v1402_v43 = vld [vmem:[#allocation2 + $0x78] sm:$0xf]  ;;  %v5936_v12 = vsel %vm6774_vm14, %v3083_v61, %v2026_v24 }
 0x178   : > { %3059 = vrot.lane.b32.xlu0 %v3018_v45, %s5127_s28  ;;  %v1439_v22 = vld [vmem:[#allocation2 + $0x6c] sm:$0xe]  ;;  %v5918_v40 = vld [vmem:[#allocation2 + $0x74] ss:$0 sps:$4 sm:$0x11]   ;;  %v2811_v3 = vrot.slane %v2809_v42, 1  ;;  %v2509_v15 = vsel %vm1976_vm8, %v2507_v35, %v2508_v2 }
 0x179   : > { %1910 = vrot.lane.b32.xlu1 %v1799_v32, %s5124_s23  ;;  %v2290_v8 = vshrl.u32 %v5821_v47, 16  ;;  %v2294_v51 = vrot.slane %v2292_v46, 1  ;;  %v1527_v54 = vld [vmem:[#allocation2 + $0x78] sm:$0xf]  ;;  %v5924_v33 = vld [vmem:[#allocation2 + $0x7c] sm:$0xf]  ;;  %v4573_v17 = vcombine.low %v1439_v22, %v1401_v5 }
 0x17a   : > { %v5920_v50 = vpop.permute.xlu0 %2649  ;;  %v2516_v14 = vrot.slane %v4621_v62, 1  ;;  %v2517_v13 = vrot.slane %v5035_v19, 1  ;;  %v1400_v57 = vld [vmem:[#allocation2 + $0x6c] sm:$0xf]  ;;  %v1528_v23 = vld [vmem:[#allocation2 + $0x7c] sm:$0xf]  ;;  %v5941_v62 = vcombine.low %v1402_v43, %v5924_v33 }
 0x17b   : > { %v5926_v60 = vpop.permute.xlu1 %2139  ;;  %v1462_v18 = vld [vmem:[#allocation2 + $0x6c] sm:$0xf]  ;;  %v2326_v47 = vshrl.u32 %v5873_v41, 16  ;;  %v2330_v46 = vrot.slane %v2328_v44, 1  ;;  %v2333_v42 = vshll.u32 %v5035_v19, 16  ;;  %v4668_v45 = vcombine.low %v1567_v27, %v1528_v23 }
 0x17c   : > { %2549 = vrot.lane.b32.xlu0 %v2509_v15, %s5126_s27  ;;  %v5931_v48 = vld [vmem:[#allocation2 + $0x70] sm:$0xf]  ;;  %6788 = vst [vmem:[#allocation7_spill] sm:$0xff] %v5941_v62  ;;  %v5943_v1 = vld [vmem:[#allocation2 + $0x80] ss:$0 sps:$4 sm:$0x11]   ;;  %v2295_v32 = vor.u32 %v2294_v51, %v2290_v8  ;;  %v2518_v27 = vsel %vm1976_vm8, %v2516_v14, %v2517_v13  ;;  %v5955_v15 = vcombine.low %v1527_v54, %v1528_v23 }
 0x17d   : > { %2155 = vrot.lane.b32.xlu1 %v5873_v41, %s5125_s26  ;;  %v5945_v35 = vld [vmem:[#allocation2 + $0x80] ss:$0 sps:$4 sm:$0x11]   ;;  %v2816_v19 = vshll.u32 %v5916_v26, 16  ;;  %v2812_v41 = vsel %vm1703_vm9, %v2807_v29, %v2811_v3  ;;  %v2299_v24 = vrot.slane %v2297_v53, 1  ;;  %v2004_v61 = vrot.slane %v4573_v17, 1 }
 0x17e   : > { %v2138_v2 = vpop.permute.xlu0 %2137  ;;  %v5949_v44 = vld [vmem:[#allocation2 + $0x74] ss:$0 sps:$4 sm:$0x11]   ;;  %v2005_v43 = vrot.slane %v5918_v40, 1  ;;  %v5957_v7 = vld [vmem:[#allocation2 + $0x6c] sm:$0xe]  ;;  %v5960_v59 = vcombine.low %v1400_v57, %v1401_v5  ;;  %v2331_v29 = vor.u32 %v2330_v46, %v2326_v47  ;;  %v5963_v8 = vcombine.low %v1462_v18, %v5931_v48 }
 0x17f   : > { %v5951_v22 = vpop.permute.xlu1 %2539  ;;  %v2335_v3 = vrot.slane %v2333_v42, 1  ;;  %v1440_v51 = vld [vmem:[#allocation2 + $0x78] sm:$0xe]  ;;  %v1827_v53 = vshll.u32 %v5941_v62, 16  ;;  %v1832_v54 = vshll.u32 %v5943_v1, 16  ;;  %v3025_v14 = vrot.slane %v4668_v45, 1 }
 0x180   : > { %2933 = vrot.lane.b32.xlu0 %v2812_v41, %s5129_s11  ;;  %v3026_v13 = vrot.slane %v5945_v35, 1  ;;  %v791_v17 = vld [vmem:[#allocation2 + $0xa8] sm:$0x1]  ;;  %v2300_v5 = vsel %vm1703_vm9, %v2295_v32, %v2299_v24  ;;  %v2814_v57 = vshrl.u32 %v5916_v26, 16  ;;  %v2818_v18 = vrot.slane %v2816_v19, 1 }
 0x181   : > { %2663 = vrot.lane.b32.xlu1 %v5916_v26, %s5122_s21  ;;  %v2821_v47 = vshll.u32 %v5949_v44, 16  ;;  %v2006_v42 = vsel %vm1976_vm8, %v2004_v61, %v2005_v43  ;;  %v4574_v55 = vcombine.low %v1440_v51, %v5924_v33  ;;  %v2336_v32 = vsel %vm1703_vm9, %v2331_v29, %v2335_v3  ;;  %v841_v29 = vld [vmem:[#allocation2 + $0xb0] sm:$0x1]  ;;  %v838_v45 = vld [vmem:[#allocation2 + $0xa4] sm:$0x1] }
 0x182   : > { %v5970_v23 = vpop.permute.xlu0 %3049  ;;  %v1825_v19 = vshrl.u32 %v5941_v62, 16  ;;  %v685_v24 = vadd.f32 %v5708_v21, %v5569_v56  ;;  %v1829_v61 = vrot.slane %v1827_v53, 1  ;;  %v5989_v43 = vrot.slane %v1832_v54, 1 }
 0x183   : > { %v5975_v46 = vpop.permute.xlu1 %2027  ;;  %v5992_v41 = vsel %vm1976_vm8, %v3025_v14, %v3026_v13  ;;  %v792_v33 = vsel %vm5241_vm5, 0, %v791_v17  ;;  %v2819_v51 = vor.u32 %v2818_v18, %v2814_v57  ;;  %v2008_v26 = vrot.slane %v5943_v1, 1 }
 0x184   : > { %2421 = vrot.lane.b32.xlu0 %v2300_v5, %s5128_s29  ;;  %v2823_v5 = vrot.slane %v2821_v47, 1  ;;  %v733_v56 = vmax.f32 %v685_v24, 0.0  ;;  %793 = vst [vmem:[#allocation2 + $0xa8] sm:$0x1] %v792_v33  ;;  %v2007_v53 = vrot.slane %v4574_v55, 1  ;;  %v677_v54 = vadd.f32 %v5708_v21, %v5591_v58 }
 0x185   : > { %2555 = vrot.lane.b32.xlu1 %v2518_v27, %s5126_s27  ;;  %v789_v14 = vsel %vm5241_vm5, 0, %v788_v34  ;;  %v688_v13 = vadd.f32 %v5708_v21, %v5594_v9  ;;  %v6009_v17 = vsel %vm3147_vm15, %v5936_v12, %v2138_v2  ;;  %v842_v58 = vsel %vm5251_vm7, 0, %v841_v29 }
 0x186   : > { %v5996_v3 = vpop.permute.xlu0 %2029  ;;  %v4746_v57 = vpack.c.bf16 %v733_v56, %v733_v56  ;;  %790 = vst [vmem:[#allocation2 + $0x9c] sm:$0x1] %v789_v14  ;;  %v731_v55 = vmax.f32 %v677_v54, 0.0  ;;  %843 = vst [vmem:[#allocation2 + $0xb0] sm:$0x1] %v842_v58  ;;  %v680_v9 = vadd.f32 %v5708_v21, %v5608_v30  ;;  %v839_v12 = vsel %vm5251_vm7, 0, %v838_v45 }
 0x187   : > { %v5999_v27 = vpop.permute.xlu1 %2411  ;;  %v734_v34 = vmax.f32 %v688_v13, 0.0  ;;  %v1830_v18 = vor.u32 %v1829_v61, %v1825_v19  ;;  %v1815_v47 = vshll.u32 %v5960_v59, 16  ;;  %840 = vst [vmem:[#allocation2 + $0xa4] sm:$0x1] %v839_v12  ;;  %v2824_v30 = vsel %vm1703_vm9, %v2819_v51, %v2823_v5  ;;  %v6039_v51 = vld [vmem:[%s6763_s4 + $0x20] ss:$0 sps:$4 sm:$0xff]  }
 0x188   : > { %2665 = vrot.lane.b32.xlu0 %v5955_v15, %s5122_s21  ;;  %v1170_v24 = vshrl.u32 %v4746_v57, 16  ;;  %v1173_v33 = vshll.u32 %v4746_v57, 16  ;;  %v4744_v56 = vpack.c.bf16 %v731_v55, %v731_v55  ;;  %v732_v14 = vmax.f32 %v680_v9, 0.0  ;;  %v6047_v12 = vld [vmem:[#allocation2 + $0x90] sm:$0xe]  ;;  %4918 = vmatprep.subr.msk.bf16.mxu1 %vm3421_vm3, %v6039_v51 }
 0x189   : > { %2043 = vrot.lane.b32.xlu1 %v2006_v42, %s5123_s22  ;;  %v1820_v42 = vshll.u32 %v5918_v40, 16  ;;  %v4747_v54 = vpack.c.bf16 %v734_v34, %v734_v34  ;;  %v2009_v21 = vsel %vm1976_vm8, %v2007_v53, %v2008_v26  ;;  %v6789_v45 = vcombine.low %v5910_v16, %v5891_v10  ;;  %v1468_v10 = vld [vmem:[#allocation2 + $0x90] sm:$0xf]  ;;  %v6043_v16 = vld [vmem:[#allocation2 + $0x94] sm:$0xf] }
 0x18a   : > { %v6021_v2 = vpop.permute.xlu0 %2537  ;;  %v1172_v61 = vrot.slane %v1170_v24, 7  ;;  %v3023_v40 = vrot.slane %v5949_v44, 1  ;;  %v1153_v57 = vshrl.u32 %v4744_v56, 16  ;;  %v1156_v58 = vshll.u32 %v4744_v56, 16 }
 0x18b   : > { %v6024_v29 = vpop.permute.xlu1 %1900  ;;  %v3022_v19 = vrot.slane %v6789_v45, 1  ;;  %v1361_v13 = vld [vmem:[#allocation2 + $0xa8] sm:$0xf]  ;;  %v1178_v55 = vshrl.u32 %v4747_v54, 16  ;;  %v1817_v5 = vrot.slane %v1815_v47, 1  ;;  %v4745_v34 = vpack.c.bf16 %v732_v14, %v732_v14 }
 0x18c   : > { %2153 = vrot.lane.b32.xlu0 %v5963_v8, %s5125_s26  ;;  %v1175_v53 = vor.u32 %v1173_v33, %v1172_v61  ;;  %v1822_v44 = vrot.slane %v1820_v42, 1  ;;  %v1176_v24 = vrot.slane %v1172_v61, 4  ;;  %v1155_v56 = vrot.slane %v1153_v57, 7  ;;  %v6059_v61 = vld [vmem:[#allocation2 + $0x74] ss:$0 sps:$4 sm:$0x11]  }
 0x18d   : > { %2427 = vrot.lane.b32.xlu1 %v2336_v32, %s5128_s29  ;;  %v1181_v32 = vshll.u32 %v4747_v54, 16  ;;  %v1180_v45 = vrot.slane %v1178_v55, 7  ;;  %v1835_v1 = vsel %vm1703_vm9, %v1830_v18, %v5989_v43  ;;  %v1354_v33 = vld [vmem:[#allocation2 + $0x9c] sm:$0xf]  ;;  %v1365_v54 = vld [vmem:[#allocation2 + $0xb0] sm:$0x1]  ;;  %v6057_v42 = vcombine.low %v1468_v10, %v6043_v16 }
 0x18e   : > { %v6041_v26 = vpop.permute.xlu0 %2921  ;;  %v1362_v47 = vsel %vm5321_vm11, %v1175_v53, %v1361_v13  ;;  %v1161_v14 = vshrl.u32 %v4745_v34, 16  ;;  %v1164_v62 = vshll.u32 %v4745_v34, 16  ;;  %v1158_v57 = vor.u32 %v1156_v58, %v1155_v56 }
 0x18f   : > { %v6045_v9 = vpop.permute.xlu1 %2143  ;;  %1363 = vst [vmem:[#allocation2 + $0xa8] sm:$0xf] %v1362_v47  ;;  %v1183_v43 = vor.u32 %v1181_v32, %v1180_v45  ;;  %v1185_v18 = vrot.slane %v1180_v45, 4  ;;  %v1159_v31 = vrot.slane %v1155_v56, 4  ;;  %v1358_v32 = vld [vmem:[#allocation2 + $0xa4] sm:$0x1]  ;;  %v6791_v47 = vcombine.low %v5957_v7, %v5931_v48 }
 0x190   : > { %3065 = vrot.lane.b32.xlu0 %v5992_v41, %s5127_s28  ;;  %v3024_v41 = vsel %vm1976_vm8, %v3022_v19, %v3023_v40  ;;  %v1163_v13 = vrot.slane %v1161_v14, 7  ;;  %v1355_v10 = vsel %vm5321_vm11, %v1158_v57, %v1354_v33  ;;  %v6790_v40 = vshrl.u32 %v5960_v59, 16  ;;  %v1529_v7 = vld [vmem:[#allocation2 + $0x84] sm:$0xf]  ;;  %v6096_v57 = vld [vmem:[#allocation2 + $0x88] sm:$0xf] }
 0x191   : > { %1916 = vrot.lane.b32.xlu1 %v1835_v1, %s5124_s23  ;;  %v4623_v1 = vcombine.low %v6047_v12, %v6043_v16  ;;  %v1184_v34 = vsel %vm5328_vm12, %v1176_v24, %v1183_v43  ;;  %v1366_v58 = vsel %vm5241_vm5, %v1185_v18, %v1365_v54  ;;  %1356 = vst [vmem:[#allocation2 + $0x9c] sm:$0xf] %v1355_v10  ;;  %v2513_v33 = vrot.slane %v6791_v47, 1  ;;  %v1532_v47 = vld [vmem:[#allocation2 + $0x94] sm:$0xf] }
 0x192   : > { %v1899_v55 = vpop.permute.xlu0 %1898  ;;  %v1818_v56 = vor.u32 %v1817_v5, %v6790_v40  ;;  %1364 = vst.msk [vmem:[#allocation2 + $0xac] sm:$0xf] %vm739_vm4, %v1184_v34  ;;  %1367 = vst [vmem:[#allocation2 + $0xb0] sm:$0x1] %v1366_v58  ;;  %v1166_v24 = vor.u32 %v1164_v62, %v1163_v13  ;;  %v1168_v45 = vrot.slane %v1163_v13, 4  ;;  %v2514_v54 = vrot.slane %v6059_v61, 1 }
 0x193   : > { %v6062_v53 = vpop.permute.xlu1 %2651  ;;  %v3085_v19 = vsel %vm3081_vm13, %v5434_v28, %v1899_v55  ;;  %v6792_v43 = vshll.u32 %v5955_v15, 16  ;;  %v2833_v55 = vshll.u32 %v5945_v35, 16  ;;  %v3423_v13 = vsel %vm3421_vm3, %v6039_v51, 0  ;;  %v1531_v34 = vld [vmem:[#allocation2 + $0x90] sm:$0xf] }
 0x194   : > { %2045 = vrot.lane.b32.xlu0 %v2009_v21, %s5123_s22  ;;  %v2826_v21 = vshrl.u32 %v5955_v15, 16  ;;  %v1167_v5 = vsel %vm5328_vm12, %v1159_v31, %v1166_v24  ;;  %v1359_v62 = vsel %vm5241_vm5, %v1168_v45, %v1358_v32  ;;  %v6113_v15 = vld [vmem:[#allocation2 + $0x84] sm:$0xe]  ;;  %v2314_v10 = vshrl.u32 %v5963_v8, 16  ;;  %4854 = vmatpush3.bf16.msra.mxu1 %v3423_v13  ;;  %v6126_v40 = vld [vmem:[#allocation2 + $0x94] sm:$0xf] }
 0x195   : > { %2935 = vrot.lane.b32.xlu1 %v2824_v30, %s5129_s11  ;;  %v3118_v30 = vsel %vm6774_vm14, %v3085_v19, %v5975_v46  ;;  %v2830_v18 = vrot.slane %v6792_v43, 1  ;;  %1357 = vst.msk [vmem:[#allocation2 + $0xa0] sm:$0xf] %vm739_vm4, %v1167_v5  ;;  %1360 = vst [vmem:[#allocation2 + $0xa4] sm:$0x1] %v1359_v62  ;;  %v1823_v46 = vsel %vm1703_vm9, %v1818_v56, %v1822_v44  ;;  %vm3388_vm14 = vcmask 588800  }
 0x196   : > { %v2410_v28 = vpop.permute.xlu0 %2409  ;;  %v3151_v58 = vsel %vm3147_vm15, %v3118_v30, %v5926_v60  ;;  %v2352_v32 = vshll.u32 %v6057_v42, 16  ;;  %v1406_v19 = vld [vmem:[#allocation2 + $0x90] sm:$0xf]  ;;  %v2835_v45 = vrot.slane %v2833_v55, 1  ;;  %v1441_v60 = vld [vmem:[#allocation2 + $0x84] sm:$0xe]  ;;  %v4669_v16 = vcombine.low %v6113_v15, %v6096_v57 }
 0x197   : > { %v6092_v14 = vpop.permute.xlu1 %2543  ;;  %v3182_v48 = vsel %vm3180_vm1, %v6009_v17, %v2410_v28  ;;  %v6106_v17 = vld [vmem:[#allocation2 + $0x98] ss:$0 sps:$4 sm:$0x11]   ;;  %v2831_v24 = vor.u32 %v2830_v18, %v2826_v21  ;;  %v3087_v28 = vsel %vm3081_vm13, %v5404_v52, %v6024_v29  ;;  %v1569_v21 = vld [vmem:[#allocation2 + $0x90] sm:$0xe]  ;;  %v3184_v29 = vsel %vm3180_vm1, %v3151_v58, %v5999_v27 }
 0x198   : > { %v3215_v31 = vsel %vm3213_vm2, %v3182_v48, %v6021_v2  ;;  %3063 = vrot.lane.b32.xlu0 %v3024_v41, %s5127_s28  ;;  %v6793_v2 = vshll.u32 %v5963_v8, 16  ;;  %v2321_v41 = vshll.u32 %v6059_v61, 16  ;;  %v2515_v8 = vsel %vm1976_vm8, %v2513_v33, %v2514_v54  ;;  %v1405_v54 = vld [vmem:[#allocation2 + $0x88] sm:$0xf]  ;;  %v1404_v12 = vld [vmem:[#allocation2 + $0x84] sm:$0xf] }
 0x199   : > { %1914 = vrot.lane.b32.xlu1 %v1823_v46, %s5124_s23  ;;  %v3248_v35 = vsel %vm3246_vm6, %v3215_v31, %v5920_v50  ;;  %v2522_v33 = vrot.slane %v4623_v1, 1  ;;  %v6149_v62 = vld [vmem:[#allocation2 + $0x8c] ss:$0 sps:$4 sm:$0x11]   ;;  %v6152_v30 = vcombine.low %v1406_v19, %v6126_v40  ;;  %v4575_v1 = vcombine.low %v1441_v60, %v1405_v54  ;;  %v1466_v43 = vld [vmem:[#allocation2 + $0x84] sm:$0xf] }
 0x19a   : > { %v2318_v44 = vrot.slane %v6793_v2, 1  ;;  %v6121_v51 = vpop.permute.xlu0 %2653  ;;  %v3281_v50 = vsel %vm3279_vm10, %v3248_v35, %v6041_v26  ;;  %v6139_v26 = vcombine.low %v1529_v7, %v6096_v57  ;;  %v2323_v52 = vrot.slane %v2321_v41, 1  ;;  %v6158_v18 = vld [vmem:[#allocation2 + $0x88] sm:$0xf] }
 0x19b   : > { %v6128_v56 = vpop.permute.xlu1 %2031  ;;  %v3314_v61 = vsel %vm3312_vm0, %v3281_v50, %v5970_v23  ;;  %v2523_v23 = vrot.slane %v6106_v17, 1  ;;  %v6156_v7 = vcombine.low %v1531_v34, %v1532_v47  ;;  %v2836_v27 = vsel %vm1703_vm9, %v2831_v24, %v2835_v45  ;;  %v6165_v35 = vld [vmem:[#allocation2 + $0x98] ss:$0 sps:$4 sm:$0x11]  }
 0x19c   : > { %2553 = vrot.lane.b32.xlu0 %v2515_v8, %s5126_s27  ;;  %4855 = vmatprep.mubr.msk.bf16.mxu1 %vm3388_vm14, %v3314_v61  ;;  %v2319_v5 = vor.u32 %v2318_v44, %v2314_v10  ;;  %v2350_v31 = vshrl.u32 %v6057_v42, 16  ;;  %v2354_v46 = vrot.slane %v2352_v32, 1  ;;  %v2357_v13 = vshll.u32 %v6106_v17, 16  ;;  %v6173_v34 = vld [vmem:[#allocation2 + $0x98] ss:$0 sps:$4 sm:$0x11]  }
 0x19d   : > { %2159 = vrot.lane.b32.xlu1 %v6057_v42, %s5125_s26  ;;  %vm6794_vm3 = vcmask 130048   ;;  %v2840_v2 = vshll.u32 %v6139_v26, 16  ;;  %v3217_v44 = vsel %vm3213_vm2, %v3184_v29, %v5951_v22  ;;  %v4670_v41 = vcombine.low %v1569_v21, %v1532_v47  ;;  %v6182_v32 = vld [vmem:[#allocation2 + $0x8c] ss:$0 sps:$4 sm:$0x11]  }
 0x19e   : > { %v2142_v48 = vpop.permute.xlu0 %2141  ;;  %v3120_v10 = vsel %vm6794_vm3, %v3087_v28, %v5996_v3  ;;  %v2524_v42 = vsel %vm1976_vm8, %v2522_v33, %v2523_v23  ;;  %v2324_v17 = vsel %vm1703_vm9, %v2319_v5, %v2323_v52  ;;  %v6179_v58 = vcombine.low %v1404_v12, %v1405_v54  ;;  %v6195_v28 = vld [vmem:[#allocation2 + $0x84] sm:$0xe]  ;;  %v797_v23 = vld [vmem:[#allocation2 + $0xc0] sm:$0x1]  ;;  %v1442_v29 = vld [vmem:[#allocation2 + $0x90] sm:$0xe] }
 0x19f   : > { %v6160_v55 = vpop.permute.xlu1 %2415  ;;  %v1851_v3 = vshll.u32 %v6152_v30, 16  ;;  %v2010_v19 = vrot.slane %v4575_v1, 1  ;;  %v2011_v22 = vrot.slane %v6149_v62, 1  ;;  %v6189_v61 = vcombine.low %v1466_v43, %v6158_v18  ;;  %v5111_v43 = vld [vmem:[%s6762_s3] ss:$0 sm:$0xff] }
 0x1a0   : > { %2937 = vrot.lane.b32.xlu0 %v2836_v27, %s5129_s11  ;;  %v3250_v45 = vsel %vm3246_vm6, %v3217_v44, %v6062_v53  ;;  %v2355_v60 = vor.u32 %v2354_v46, %v2350_v31  ;;  %v2359_v47 = vrot.slane %v2357_v13, 1  ;;  %v1856_v33 = vshll.u32 %v6165_v35, 16 }
 0x1a1   : > { %2667 = vrot.lane.b32.xlu1 %v6139_v26, %s5122_s21  ;;  %v1849_v54 = vshrl.u32 %v6152_v30, 16  ;;  %v3031_v21 = vrot.slane %v4670_v41, 1  ;;  %v3032_v5 = vrot.slane %v6173_v34, 1  ;;  %v2838_v52 = vshrl.u32 %v6139_v26, 16 }
 0x1a2   : > { %v6184_v50 = vpop.permute.xlu0 %3053  ;;  %v1853_v53 = vrot.slane %v1851_v3, 1  ;;  %v2842_v12 = vrot.slane %v2840_v2, 1  ;;  %v2845_v1 = vshll.u32 %v6182_v32, 16  ;;  %v701_v27 = vadd.f32 %v5111_v43, %v5645_v38  ;;  %v794_v38 = vld [vmem:[#allocation2 + $0xb4] sm:$0x1] }
 0x1a3   : > { %v6191_v24 = vpop.permute.xlu1 %1904  ;;  %v2012_v46 = vsel %vm1976_vm8, %v2010_v19, %v2011_v22  ;;  %v2340_v13 = vshll.u32 %v6189_v61, 16  ;;  %v4622_v26 = vcombine.low %v6195_v28, %v6158_v18  ;;  %v798_v2 = vsel %vm5241_vm5, 0, %v797_v23 }
 0x1a4   : > { %2425 = vrot.lane.b32.xlu0 %v2324_v17, %s5128_s29  ;;  %v2360_v41 = vsel %vm1703_vm9, %v2355_v60, %v2359_v47  ;;  %v4576_v17 = vcombine.low %v1442_v29, %v6126_v40  ;;  %v737_v3 = vmax.f32 %v701_v27, 0.0  ;;  %799 = vst [vmem:[#allocation2 + $0xc0] sm:$0x1] %v798_v2  ;;  %v6219_v8 = vsel %vm3147_vm15, %v3120_v10, %v2142_v48 }
 0x1a5   : > { %2559 = vrot.lane.b32.xlu1 %v2524_v42, %s5126_s27  ;;  %v1858_v42 = vrot.slane %v1856_v33, 1  ;;  %v3033_v19 = vsel %vm1976_vm8, %v3031_v21, %v3032_v5  ;;  %v2014_v22 = vrot.slane %v6165_v35, 1  ;;  %v1837_v23 = vshrl.u32 %v6179_v58, 16  ;;  %v847_v5 = vld [vmem:[#allocation2 + $0xc8] sm:$0x1] }
 0x1a6   : > { %v6208_v31 = vpop.permute.xlu0 %2033  ;;  %v1854_v60 = vor.u32 %v1853_v53, %v1849_v54  ;;  %v2843_v47 = vor.u32 %v2842_v12, %v2838_v52  ;;  %v2847_v40 = vrot.slane %v2845_v1, 1  ;;  %v4750_v33 = vpack.c.bf16 %v737_v3, %v737_v3 }
 0x1a7   : > { %v2924_v44 = vpop.permute.xlu1 %2923  ;;  %v693_v48 = vadd.f32 %v5111_v43, %v5659_v63  ;;  %v795_v10 = vsel %vm5241_vm5, 0, %v794_v38  ;;  %v704_v21 = vadd.f32 %v5111_v43, %v5669_v4  ;;  %v1839_v54 = vshll.u32 %v6179_v58, 16 }
 0x1a8   : > { %2669 = vrot.lane.b32.xlu0 %v6156_v7, %s5122_s21  ;;  %v3283_v29 = vsel %vm3279_vm10, %v3250_v45, %v2924_v44  ;;  %v1204_v52 = vshrl.u32 %v4750_v33, 16  ;;  %v1207_v53 = vshll.u32 %v4750_v33, 16  ;;  %796 = vst [vmem:[#allocation2 + $0xb4] sm:$0x1] %v795_v10  ;;  %v2013_v63 = vrot.slane %v4576_v17, 1 }
 0x1a9   : > { %2047 = vrot.lane.b32.xlu1 %v2012_v46, %s5123_s22  ;;  %v1844_v45 = vshll.u32 %v6149_v62, 16  ;;  %v735_v12 = vmax.f32 %v693_v48, 0.0  ;;  %v738_v4 = vmax.f32 %v704_v21, 0.0  ;;  %v3028_v1 = vrot.slane %v4669_v16, 1 }
 0x1aa   : > { %v3052_v27 = vpop.permute.xlu0 %3051  ;;  %v1206_v46 = vrot.slane %v1204_v52, 7  ;;  %v848_v44 = vsel %vm5251_vm7, 0, %v847_v5  ;;  %v696_v3 = vadd.f32 %v5111_v43, %v5675_v39  ;;  %v1859_v17 = vsel %vm1703_vm9, %v1854_v60, %v1858_v42  ;;  %v6256_v43 = vld [vmem:[#allocation2 + $0x8c] ss:$0 sps:$4 sm:$0x11]  }
 0x1ab   : > { %v6232_v35 = vpop.permute.xlu1 %1902  ;;  %v3316_v2 = vsel %vm3312_vm0, %v3283_v29, %v3052_v27  ;;  %v3029_v62 = vrot.slane %v6182_v32, 1  ;;  %v1375_v33 = vld [vmem:[#allocation2 + $0xc0] sm:$0xf]  ;;  %v4748_v29 = vpack.c.bf16 %v735_v12, %v735_v12  ;;  %849 = vst [vmem:[#allocation2 + $0xc8] sm:$0x1] %v848_v44  ;;  %v2848_v57 = vsel %vm1703_vm9, %v2843_v47, %v2847_v40 }
 0x1ac   : > { %2157 = vrot.lane.b32.xlu0 %v6189_v61, %s5125_s26  ;;  %4856 = vmatmul.mubr.msk.bf16.vlgmr.msra.gmra.mrb[0].mxu1 %vm3388_vm14, %v3316_v2  ;;  %v844_v27 = vld [vmem:[#allocation2 + $0xbc] sm:$0x1]  ;;  %v1841_v15 = vrot.slane %v1839_v54, 1  ;;  %v1209_v16 = vor.u32 %v1207_v53, %v1206_v46  ;;  %v736_v10 = vmax.f32 %v696_v3, 0.0  ;;  %v2015_v39 = vsel %vm1976_vm8, %v2013_v63, %v2014_v22  ;;  %v1472_v12 = vld [vmem:[#allocation2 + $0xa8] sm:$0xf] }
 0x1ad   : > { %2431 = vrot.lane.b32.xlu1 %v2360_v41, %s5128_s29  ;;  %v4751_v41 = vpack.c.bf16 %v738_v4, %v738_v4  ;;  %v1187_v42 = vshrl.u32 %v4748_v29, 16  ;;  %v1190_v32 = vshll.u32 %v4748_v29, 16  ;;  %v845_v47 = vsel %vm5251_vm7, 0, %v844_v27  ;;  %vm6798_vm7 = vmmov %vm6794_vm3 }
 0x1ae   : > { %v6247_v38 = vpop.permute.xlu0 %2541  ;;  %v1376_v21 = vsel %vm5321_vm11, %v1209_v16, %v1375_v33  ;;  %v4749_v40 = vpack.c.bf16 %v736_v10, %v736_v10  ;;  %v1846_v54 = vrot.slane %v1844_v45, 1  ;;  %846 = vst [vmem:[#allocation2 + $0xbc] sm:$0x1] %v845_v47  ;;  %v1842_v63 = vor.u32 %v1841_v15, %v1837_v23  ;;  %v1507_v45 = vld [vmem:[#allocation2 + $0xa8] sm:$0xe] }
 0x1af   : > { %v6251_v48 = vpop.permute.xlu1 %2147  ;;  %v1212_v60 = vshrl.u32 %v4751_v41, 16  ;;  %v1215_v5 = vshll.u32 %v4751_v41, 16  ;;  %1377 = vst [vmem:[#allocation2 + $0xc0] sm:$0xf] %v1376_v21  ;;  %v1189_v22 = vrot.slane %v1187_v42, 7  ;;  %v2519_v4 = vrot.slane %v4622_v26, 1 }
 0x1b0   : > { %3069 = vrot.lane.b32.xlu0 %v3033_v19, %s5127_s28  ;;  %v1210_v19 = vrot.slane %v1206_v46, 4  ;;  %v1368_v44 = vld [vmem:[#allocation2 + $0xb4] sm:$0xf]  ;;  %v1195_v3 = vshrl.u32 %v4749_v40, 16  ;;  %v1198_v25 = vshll.u32 %v4749_v40, 16  ;;  %v2520_v46 = vrot.slane %v6256_v43, 1 }
 0x1b1   : > { %1920 = vrot.lane.b32.xlu1 %v1859_v17, %s5124_s23  ;;  %v1214_v52 = vrot.slane %v1212_v60, 7  ;;  %v1473_v17 = vld [vmem:[#allocation2 + $0xac] sm:$0xf]  ;;  %v2850_v33 = vshrl.u32 %v6156_v7, 16  ;;  %v1192_v29 = vor.u32 %v1190_v32, %v1189_v22  ;;  %v6795_v23 = vshll.u32 %v6156_v7, 16 }
 0x1b2   : > { %v2926_v2 = vpop.permute.xlu0 %2925  ;;  %v1193_v18 = vrot.slane %v1189_v22, 4  ;;  %v1379_v26 = vld [vmem:[#allocation2 + $0xc8] sm:$0x1]  ;;  %v1197_v15 = vrot.slane %v1195_v3, 7  ;;  %v3030_v10 = vsel %vm1976_vm8, %v3028_v1, %v3029_v62  ;;  %v6291_v21 = vcombine.low %v1472_v12, %v1473_v17  ;;  %v6305_v12 = vld [vmem:[#allocation2 + $0xa0] sm:$0xf] }
 0x1b3   : > { %v6263_v53 = vpop.permute.xlu1 %2655  ;;  %v1217_v41 = vor.u32 %v1215_v5, %v1214_v52  ;;  %v2854_v27 = vrot.slane %v6795_v23, 1  ;;  %v1219_v28 = vrot.slane %v1214_v52, 4  ;;  %v1369_v42 = vsel %vm5321_vm11, %v1192_v29, %v1368_v44  ;;  %v1409_v23 = vld [vmem:[#allocation2 + $0xa0] sm:$0xf]  ;;  %vm6800_vm11 = vmmov %vm6794_vm3 }
 0x1b4   : > { %2049 = vrot.lane.b32.xlu0 %v2015_v39, %s5123_s22  ;;  %v2857_v39 = vshll.u32 %v6173_v34, 16  ;;  %1370 = vst [vmem:[#allocation2 + $0xb4] sm:$0xf] %v1369_v42  ;;  %v1200_v1 = vor.u32 %v1198_v25, %v1197_v15  ;;  %v1202_v62 = vrot.slane %v1197_v15, 4  ;;  %v1847_v34 = vsel %vm1703_vm9, %v1842_v63, %v1846_v54  ;;  %v1533_v63 = vld [vmem:[#allocation2 + $0x9c] sm:$0xf] }
 0x1b5   : > { %2939 = vrot.lane.b32.xlu1 %v2848_v57, %s5129_s11  ;;  %v1218_v32 = vsel %vm5328_vm12, %v1210_v19, %v1217_v41  ;;  %v1380_v57 = vsel %vm5241_vm5, %v1219_v28, %v1379_v26  ;;  %v4625_v5 = vcombine.low %v1507_v45, %v1473_v17  ;;  %v2521_v47 = vsel %vm1976_vm8, %v2519_v4, %v2520_v46  ;;  %v1410_v25 = vld [vmem:[#allocation2 + $0xa8] sm:$0xf]  ;;  %v6324_v17 = vld [vmem:[#allocation2 + $0xac] sm:$0xf] }
 0x1b6   : > { %v2414_v16 = vpop.permute.xlu0 %2413  ;;  %1378 = vst.msk [vmem:[#allocation2 + $0xc4] sm:$0xf] %vm739_vm4, %v1218_v32  ;;  %1381 = vst [vmem:[#allocation2 + $0xc8] sm:$0x1] %v1380_v57  ;;  %v2855_v40 = vor.u32 %v2854_v27, %v2850_v33  ;;  %v1201_v19 = vsel %vm5328_vm12, %v1193_v18, %v1200_v1  ;;  %v3089_v54 = vsel %vm3081_vm13, %v5532_v6, %v6232_v35  ;;  %v2338_v35 = vshrl.u32 %v6189_v61, 16 }
 0x1b7   : > { %v6280_v60 = vpop.permute.xlu1 %2547  ;;  %v3186_v7 = vsel %vm3180_vm1, %v6219_v8, %v2414_v16  ;;  %1371 = vst.msk [vmem:[#allocation2 + $0xb8] sm:$0xf] %vm739_vm4, %v1201_v19  ;;  %v5076_v6 = vld [vmem:[#allocation2 + $0xb0] ss:$0 sps:$4 sm:$0x11]   ;;  %v2345_v3 = vshll.u32 %v6256_v43, 16  ;;  %vm6796_vm4 = vmmov %vm6794_vm3  ;;  %v6330_v43 = vcombine.low %v1533_v63, %v6305_v12  ;;  %v6341_v26 = vcombine.low %v1410_v25, %v6324_v17 }
 0x1b8   : > { %v3219_v49 = vsel %vm3213_vm2, %v3186_v7, %v6247_v38  ;;  %3067 = vrot.lane.b32.xlu0 %v3030_v10, %s5127_s28  ;;  %v1372_v38 = vld [vmem:[#allocation2 + $0xbc] sm:$0x1]  ;;  %v3122_v20 = vsel %vm6796_vm4, %v3089_v54, %v6128_v56  ;;  %v2376_v45 = vshll.u32 %v6291_v21, 16  ;;  %v2528_v61 = vrot.slane %v4625_v5, 1  ;;  %v1535_v15 = vld [vmem:[#allocation2 + $0xa8] sm:$0xf]  ;;  %vm6802_vm12 = vmmov %vm6794_vm3 }
 0x1b9   : > { %v3252_v8 = vsel %vm3246_vm6, %v3219_v49, %v6121_v51  ;;  %1918 = vrot.lane.b32.xlu1 %v1847_v34, %s5124_s23  ;;  %v2859_v51 = vrot.slane %v2857_v39, 1  ;;  %v1373_v4 = vsel %vm5241_vm5, %v1202_v62, %v1372_v38  ;;  %v2529_v56 = vrot.slane %v5076_v6, 1  ;;  %v6338_v18 = vld [vmem:[#allocation2 + $0xa4] ss:$0 sps:$4 sm:$0x11]   ;;  %vm6797_vm5 = vmmov %vm6794_vm3 }
 0x1ba   : > { %v6302_v22 = vpop.permute.xlu0 %2657  ;;  %v3285_v52 = vsel %vm3279_vm10, %v3252_v8, %v2926_v2  ;;  %1374 = vst [vmem:[#allocation2 + $0xbc] sm:$0x1] %v1373_v4  ;;  %v2342_v2 = vrot.slane %v2340_v13, 1  ;;  %v2347_v41 = vrot.slane %v2345_v3, 1  ;;  %v3155_v27 = vsel %vm3147_vm15, %v3122_v20, %v6045_v9  ;;  %v1571_v39 = vld [vmem:[#allocation2 + $0xa8] sm:$0xe]  ;;  %vm6807_vm4 = vmmov %vm6794_vm3 }
 0x1bb   : > { %v6310_v0 = vpop.permute.xlu1 %2035  ;;  %v3318_v44 = vsel %vm3312_vm0, %v3285_v52, %v6184_v50  ;;  %v1443_v50 = vld [vmem:[#allocation2 + $0x9c] sm:$0xe]  ;;  %v2860_v33 = vsel %vm1703_vm9, %v2855_v40, %v2859_v51  ;;  %v2374_v16 = vshrl.u32 %v6291_v21, 16  ;;  %v3188_v9 = vsel %vm3180_vm1, %v3155_v27, %v6160_v55  ;;  %v1536_v1 = vld [vmem:[#allocation2 + $0xac] sm:$0xf] }
 0x1bc   : > { %2557 = vrot.lane.b32.xlu0 %v2521_v47, %s5126_s27  ;;  %4859 = vmatprep.mubr.msk.bf16.mxu1 %vm3388_vm14, %v3318_v44  ;;  %v2343_v29 = vor.u32 %v2342_v2, %v2338_v35  ;;  %v4577_v28 = vcombine.low %v1443_v50, %v1409_v23  ;;  %v2378_v42 = vrot.slane %v2376_v45, 1  ;;  %v2530_v7 = vsel %vm1976_vm8, %v2528_v61, %v2529_v56  ;;  %v6354_v62 = vld [vmem:[#allocation2 + $0xb0] ss:$0 sps:$4 sm:$0x11]   ;;  %v1408_v49 = vld [vmem:[#allocation2 + $0x9c] sm:$0xf] }
 0x1bd   : > { %2163 = vrot.lane.b32.xlu1 %v6291_v21, %s5125_s26  ;;  %v2017_v21 = vrot.slane %v6338_v18, 1  ;;  %v2381_v5 = vshll.u32 %v5076_v6, 16  ;;  %v1875_v8 = vshll.u32 %v6341_v26, 16  ;;  %v1470_v55 = vld [vmem:[#allocation2 + $0x9c] sm:$0xf]  ;;  %v3221_v47 = vsel %vm3213_vm2, %v3188_v9, %v6092_v14 }
 0x1be   : > { %v6327_v13 = vpop.permute.xlu0 %2145  ;;  %v2348_v57 = vsel %vm1703_vm9, %v2343_v29, %v2347_v41  ;;  %v2016_v34 = vrot.slane %v4577_v28, 1  ;;  %v2864_v40 = vshll.u32 %v6330_v43, 16  ;;  %v6365_v38 = vcombine.low %v1535_v15, %v1536_v1  ;;  %v6367_v54 = vld [vmem:[#allocation2 + $0xb0] ss:$0 sps:$4 sm:$0x11]  }
 0x1bf   : > { %v6332_v46 = vpop.permute.xlu1 %2419  ;;  %v1444_v52 = vld [vmem:[#allocation2 + $0xa8] sm:$0xe]  ;;  %v6369_v51 = vcombine.low %v1408_v49, %v1409_v23  ;;  %v2379_v4 = vor.u32 %v2378_v42, %v2374_v16  ;;  %v6371_v44 = vld [vmem:[#allocation2 + $0xa0] sm:$0xf]  ;;  %v1880_v6 = vshll.u32 %v6354_v62, 16  ;;  %v4672_v35 = vcombine.low %v1571_v39, %v1536_v1 }
 0x1c0   : > { %2941 = vrot.lane.b32.xlu0 %v2860_v33, %s5129_s11  ;;  %v5086_v2 = vld [vmem:[#allocation2 + $0xa4] ss:$0 sps:$4 sm:$0x11]   ;;  %v2018_v14 = vsel %vm1976_vm8, %v2016_v34, %v2017_v21  ;;  %v2383_v3 = vrot.slane %v2381_v5, 1  ;;  %v1873_v20 = vshrl.u32 %v6341_v26, 16  ;;  %v1877_v50 = vrot.slane %v1875_v8, 1 }
 0x1c1   : > { %2671 = vrot.lane.b32.xlu1 %v6330_v43, %s5122_s21  ;;  %v3254_v25 = vsel %vm3246_vm6, %v3221_v47, %v6263_v53  ;;  %v2862_v45 = vshrl.u32 %v6330_v43, 16  ;;  %v2866_v61 = vrot.slane %v2864_v40, 1  ;;  %v6384_v29 = vcombine.low %v1470_v55, %v6371_v44  ;;  %v1570_v23 = vld [vmem:[#allocation2 + $0x9c] sm:$0xe] }
 0x1c2   : > { %v6346_v10 = vpop.permute.xlu0 %3057  ;;  %v3038_v41 = vrot.slane %v6367_v54, 1  ;;  %v1882_v15 = vrot.slane %v1880_v6, 1  ;;  %v3037_v53 = vrot.slane %v4672_v35, 1  ;;  %v4578_v43 = vcombine.low %v1444_v52, %v6324_v17  ;;  %v1506_v8 = vld [vmem:[#allocation2 + $0x9c] sm:$0xe] }
 0x1c3   : > { %v6350_v32 = vpop.permute.xlu1 %1908  ;;  %v2384_v16 = vsel %vm1703_vm9, %v2379_v4, %v2383_v3  ;;  %v1878_v39 = vor.u32 %v1877_v50, %v1873_v20  ;;  %v2869_v9 = vshll.u32 %v5086_v2, 16  ;;  %v1863_v42 = vshll.u32 %v6369_v51, 16  ;;  %v5089_v6 = vld [vmem:[#allocation2 + $0xa4] ss:$0 sps:$4 sm:$0x11]  }
 0x1c4   : > { %2429 = vrot.lane.b32.xlu0 %v2348_v57, %s5128_s29  ;;  %v2867_v1 = vor.u32 %v2866_v61, %v2862_v45  ;;  %v3039_v17 = vsel %vm1976_vm8, %v3037_v53, %v3038_v41  ;;  %v2019_v34 = vrot.slane %v4578_v43, 1  ;;  %v2020_v21 = vrot.slane %v6354_v62, 1  ;;  %v1477_v61 = vld [vmem:[#allocation2 + $0xc4] sm:$0xf] }
 0x1c5   : > { %2563 = vrot.lane.b32.xlu1 %v2530_v7, %s5126_s27  ;;  %v4671_v7 = vcombine.low %v1570_v23, %v6305_v12  ;;  %v1861_v5 = vshrl.u32 %v6369_v51, 16  ;;  %v1883_v55 = vsel %vm1703_vm9, %v1878_v39, %v1882_v15  ;;  %v2871_v47 = vrot.slane %v2869_v9, 1  ;;  %v1509_v39 = vld [vmem:[#allocation2 + $0xc0] sm:$0xe] }
 0x1c6   : > { %v6363_v19 = vpop.permute.xlu0 %2037  ;;  %v1865_v40 = vrot.slane %v1863_v42, 1  ;;  %v1868_v12 = vshll.u32 %v6338_v18, 16  ;;  %v3035_v4 = vrot.slane %v5086_v2, 1  ;;  %v4624_v35 = vcombine.low %v1506_v8, %v6371_v44 }
 0x1c7   : > { %v2928_v63 = vpop.permute.xlu1 %2927  ;;  %v3034_v52 = vrot.slane %v4671_v7, 1  ;;  %v3091_v62 = vsel %vm3081_vm13, %v5536_v37, %v6191_v24  ;;  %v2021_v3 = vsel %vm1976_vm8, %v2019_v34, %v2020_v21  ;;  %v2876_v20 = vshll.u32 %v6365_v38, 16  ;;  %v1476_v37 = vld [vmem:[#allocation2 + $0xc0] sm:$0xf]  ;;  %v1537_v7 = vld [vmem:[#allocation2 + $0xb4] sm:$0xf] }
 0x1c8   : > { %2673 = vrot.lane.b32.xlu0 %v6365_v38, %s5122_s21  ;;  %v3287_v33 = vsel %vm3279_vm10, %v3254_v25, %v2928_v63  ;;  %v3124_v18 = vsel %vm6797_vm5, %v3091_v62, %v6208_v31  ;;  %v2872_v50 = vsel %vm1703_vm9, %v2867_v1, %v2871_v47  ;;  %v1866_v2 = vor.u32 %v1865_v40, %v1861_v5  ;;  %v6446_v34 = vld [vmem:[#allocation2 + $0xb8] sm:$0xf]  ;;  %vm6808_vm5 = vmmov %vm6794_vm3 }
 0x1c9   : > { %2051 = vrot.lane.b32.xlu1 %v2018_v14, %s5123_s22  ;;  %v1870_v25 = vrot.slane %v1868_v12, 1  ;;  %v3157_v44 = vsel %vm3147_vm15, %v3124_v18, %v6327_v13  ;;  %v3036_v45 = vsel %vm1976_vm8, %v3034_v52, %v3035_v4  ;;  %v2874_v31 = vshrl.u32 %v6365_v38, 16  ;;  %v6460_v4 = vld [vmem:[#allocation2 + $0xbc] ss:$0 sps:$4 sm:$0x11]  }
 0x1ca   : > { %v3056_v56 = vpop.permute.xlu0 %3055  ;;  %v2881_v15 = vshll.u32 %v6367_v54, 16  ;;  %v2364_v13 = vshll.u32 %v6384_v29, 16  ;;  %v6435_v38 = vcombine.low %v1476_v37, %v1477_v61  ;;  %v2369_v1 = vshll.u32 %v5089_v6, 16  ;;  %v6476_v37 = vld [vmem:[#allocation2 + $0xc4] sm:$0xf] }
 0x1cb   : > { %v6387_v27 = vpop.permute.xlu1 %1906  ;;  %v3320_v28 = vsel %vm3312_vm0, %v3287_v33, %v3056_v56  ;;  %v2525_v33 = vrot.slane %v4624_v35, 1  ;;  %v2526_v56 = vrot.slane %v5089_v6, 1  ;;  %v1871_v43 = vsel %vm1703_vm9, %v1866_v2, %v1870_v25 }
 0x1cc   : > { %2161 = vrot.lane.b32.xlu0 %v6384_v29, %s5125_s26  ;;  %4860 = vmatmul.mubr.msk.bf16.gmra.mrb[4].mxu1 %vm3388_vm14, %v3320_v28  ;;  %v2878_v28 = vrot.slane %v2876_v20, 1  ;;  %v2883_v5 = vrot.slane %v2881_v15, 1  ;;  %v2366_v8 = vrot.slane %v2364_v13, 1  ;;  %v3093_v47 = vsel %vm3081_vm13, %v5685_v11, %v6387_v27  ;;  %v5099_v15 = vld [vmem:[#allocation2 + $0xbc] ss:$0 sps:$4 sm:$0x11]  }
 0x1cd   : > { %2435 = vrot.lane.b32.xlu1 %v2384_v16, %s5128_s29  ;;  %v2527_v54 = vsel %vm1976_vm8, %v2525_v33, %v2526_v56  ;;  %v4627_v40 = vcombine.low %v1509_v39, %v1477_v61  ;;  %v6458_v52 = vcombine.low %v1537_v7, %v6446_v34  ;;  %v3126_v11 = vsel %vm6798_vm7, %v3093_v47, %v6310_v0  ;;  %v1475_v39 = vld [vmem:[#allocation2 + $0xb8] sm:$0xf]  ;;  %vm6809_vm7 = vmmov %vm6794_vm3 }
 0x1ce   : > { %v2546_v57 = vpop.permute.xlu0 %2545  ;;  %v2879_v21 = vor.u32 %v2878_v28, %v2874_v31  ;;  %v3159_v2 = vsel %vm3147_vm15, %v3126_v11, %v6251_v48  ;;  %v2023_v0 = vrot.slane %v6460_v4, 1 }
 0x1cf   : > { %v6398_v49 = vpop.permute.xlu1 %2151  ;;  %v2534_v20 = vrot.slane %v4627_v40, 1  ;;  %v2888_v13 = vshll.u32 %v6458_v52, 16  ;;  %v6509_v40 = vld [vmem:[#allocation2 + $0xd4] ss:$0 sps:$4 sm:$0x11]  }
 0x1d0   : > { %3073 = vrot.lane.b32.xlu0 %v3039_v17, %s5127_s28  ;;  %v2884_v35 = vsel %vm1703_vm9, %v2879_v21, %v2883_v5  ;;  %v1508_v21 = vld [vmem:[#allocation2 + $0xb4] sm:$0xe] }
 0x1d1   : > { %1924 = vrot.lane.b32.xlu1 %v1883_v55, %s5124_s23  ;;  %v1445_v55 = vld [vmem:[#allocation2 + $0xb4] sm:$0xe]  ;;  %v2890_v5 = vrot.slane %v2888_v13, 1  ;;  %v4626_v11 = vcombine.low %v1508_v21, %v1475_v39 }
 0x1d2   : > { %v2930_v63 = vpop.permute.xlu0 %2929 }
 0x1d3   : > { %v6411_v14 = vpop.permute.xlu1 %2659 }
 0x1d4   : > { %2053 = vrot.lane.b32.xlu0 %v2021_v3, %s5123_s22  ;;  %v2400_v3 = vshll.u32 %v6435_v38, 16 }
 0x1d5   : > { %2943 = vrot.lane.b32.xlu1 %v2872_v50, %s5129_s11  ;;  %v1412_v50 = vld [vmem:[#allocation2 + $0xb4] sm:$0xf] }
 0x1d6   : > { %v2418_v24 = vpop.permute.xlu0 %2417  ;;  %v2402_v56 = vrot.slane %v2400_v3, 1 }
 0x1d7   : > { %v6424_v41 = vpop.permute.xlu1 %2551  ;;  %v3190_v23 = vsel %vm3180_vm1, %v3157_v44, %v2418_v24  ;;  %v1539_v44 = vld [vmem:[#allocation2 + $0xc0] sm:$0xf]  ;;  %v2398_v24 = vshrl.u32 %v6435_v38, 16 }
 0x1d8   : > { %v3223_v53 = vsel %vm3213_vm2, %v3190_v23, %v2546_v57  ;;  %3071 = vrot.lane.b32.xlu0 %v3036_v45, %s5127_s28  ;;  %v2362_v57 = vshrl.u32 %v6384_v29, 16  ;;  %v5092_v29 = vld [vmem:[#allocation2 + $0xc8] ss:$0 sps:$4 sm:$0x11]   ;;  %v1572_v23 = vld [vmem:[#allocation2 + $0xb4] sm:$0xe] }
 0x1d9   : > { %v3256_v16 = vsel %vm3246_vm6, %v3223_v53, %v6302_v22  ;;  %1922 = vrot.lane.b32.xlu1 %v1871_v43, %s5124_s23  ;;  %v2535_v18 = vrot.slane %v5092_v29, 1  ;;  %v2405_v31 = vshll.u32 %v5092_v29, 16  ;;  %v3192_v53 = vsel %vm3180_vm1, %v3159_v2, %v6332_v46 }
 0x1da   : > { %v6437_v9 = vpop.permute.xlu0 %2661  ;;  %v3289_v42 = vsel %vm3279_vm10, %v3256_v16, %v2930_v63  ;;  %v2371_v63 = vrot.slane %v2369_v1, 1  ;;  %v2367_v62 = vor.u32 %v2366_v8, %v2362_v57  ;;  %v6493_v16 = vcombine.low %v1539_v44, %v6476_v37 }
 0x1db   : > { %v6442_v17 = vpop.permute.xlu1 %2039  ;;  %v3322_v22 = vsel %vm3312_vm0, %v3289_v42, %v6346_v10  ;;  %v1413_v10 = vld [vmem:[#allocation2 + $0xb8] sm:$0xf]  ;;  %v2536_v28 = vsel %vm1976_vm8, %v2534_v20, %v2535_v18  ;;  %v2403_v57 = vor.u32 %v2402_v56, %v2398_v24  ;;  %v2407_v1 = vrot.slane %v2405_v31, 1  ;;  %v6517_v20 = vld [vmem:[#allocation2 + $0xc8] ss:$0 sps:$4 sm:$0x11]  }
 0x1dc   : > { %2561 = vrot.lane.b32.xlu0 %v2527_v54, %s5126_s27  ;;  %4863 = vmatprep.mubr.msk.bf16.mxu1 %vm3388_vm14, %v3322_v22  ;;  %v4579_v6 = vcombine.low %v1445_v55, %v1413_v10  ;;  %v2372_v61 = vsel %vm1703_vm9, %v2367_v62, %v2371_v63  ;;  %v6484_v48 = vcombine.low %v1412_v50, %v1413_v10  ;;  %v2886_v22 = vshrl.u32 %v6458_v52, 16 }
 0x1dd   : > { %2167 = vrot.lane.b32.xlu1 %v6435_v38, %s5125_s26  ;;  %v1474_v38 = vld [vmem:[#allocation2 + $0xb4] sm:$0xf]  ;;  %v4673_v54 = vcombine.low %v1572_v23, %v6446_v34  ;;  %v3225_v46 = vsel %vm3213_vm2, %v3192_v53, %v6280_v60  ;;  %v2893_v8 = vshll.u32 %v5099_v15, 16  ;;  %v2912_v34 = vshll.u32 %v5267_v36, 16 }
 0x1de   : > { %v6455_v12 = vpop.permute.xlu0 %2149  ;;  %v2022_v33 = vrot.slane %v4579_v6, 1  ;;  %v1887_v55 = vshll.u32 %v6484_v48, 16  ;;  %v3258_v47 = vsel %vm3246_vm6, %v3225_v46, %v6411_v14  ;;  %v6507_v29 = vcombine.low %v1474_v38, %v1475_v39  ;;  %v5101_v6 = vld [vmem:[#allocation2 + $0xbc] ss:$0 sps:$4 sm:$0x11]  }
 0x1df   : > { %v6464_v27 = vpop.permute.xlu1 %2423  ;;  %v3041_v63 = vrot.slane %v5099_v15, 1  ;;  %v2408_v3 = vsel %vm1703_vm9, %v2403_v57, %v2407_v1  ;;  %v1885_v14 = vshrl.u32 %v6484_v48, 16  ;;  %v2900_v18 = vshll.u32 %v6493_v16, 16 }
 0x1e0   : > { %2945 = vrot.lane.b32.xlu0 %v2884_v35, %s5129_s11  ;;  %v2024_v7 = vsel %vm1976_vm8, %v2022_v33, %v2023_v0  ;;  %v2891_v50 = vor.u32 %v2890_v5, %v2886_v22  ;;  %v2895_v2 = vrot.slane %v2893_v8, 1  ;;  %v1889_v0 = vrot.slane %v1887_v55, 1  ;;  %v1574_v33 = vld [vmem:[#allocation2 + $0xcc] sm:$0xe] }
 0x1e1   : > { %2675 = vrot.lane.b32.xlu1 %v6458_v52, %s5122_s21  ;;  %v3040_v52 = vrot.slane %v4673_v54, 1  ;;  %v1892_v44 = vshll.u32 %v6460_v4, 16  ;;  %v2910_v24 = vshrl.u32 %v5267_v36, 16  ;;  %v2531_v23 = vrot.slane %v4626_v11, 1 }
 0x1e2   : > { %v6473_v25 = vpop.permute.xlu0 %3061  ;;  %v2917_v15 = vshll.u32 %v6509_v40, 16  ;;  %v2898_v53 = vshrl.u32 %v6493_v16, 16  ;;  %v2902_v38 = vrot.slane %v2900_v18, 1  ;;  %v2905_v4 = vshll.u32 %v6517_v20, 16 }
 0x1e3   : > { %v6479_v45 = vpop.permute.xlu1 %1912  ;;  %v3042_v31 = vsel %vm1976_vm8, %v3040_v52, %v3041_v63  ;;  %v2388_v36 = vshll.u32 %v6507_v29, 16  ;;  %v2896_v39 = vsel %vm1703_vm9, %v2891_v50, %v2895_v2  ;;  %v1890_v54 = vor.u32 %v1889_v0, %v1885_v14 }
 0x1e4   : > { %2433 = vrot.lane.b32.xlu0 %v2372_v61, %s5128_s29  ;;  %v2914_v61 = vrot.slane %v2912_v34, 1  ;;  %v2386_v46 = vshrl.u32 %v6507_v29, 16  ;;  %v2903_v8 = vor.u32 %v2902_v38, %v2898_v53  ;;  %v2907_v55 = vrot.slane %v2905_v4, 1 }
 0x1e5   : > { %2567 = vrot.lane.b32.xlu1 %v2536_v28, %s5126_s27  ;;  %v2532_v28 = vrot.slane %v5101_v6, 1  ;;  %v2390_v34 = vrot.slane %v2388_v36, 1  ;;  %v3047_v14 = vrot.slane %v6509_v40, 1 }
 0x1e6   : > { %v6490_v43 = vpop.permute.xlu0 %2041  ;;  %v2915_v21 = vor.u32 %v2914_v61, %v2910_v24  ;;  %v2908_v2 = vsel %vm1703_vm9, %v2903_v8, %v2907_v55 }
 0x1e7   : > { %v2932_v42 = vpop.permute.xlu1 %2931  ;;  %v2533_v22 = vsel %vm1976_vm8, %v2531_v23, %v2532_v28  ;;  %v2391_v0 = vor.u32 %v2390_v34, %v2386_v46  ;;  %v6801_v28 = vld [vmem:[#allocation5_spill] sm:$0xff] }
 0x1e8   : > { %2677 = vrot.lane.b32.xlu0 %v6493_v16, %s5122_s21  ;;  %v3291_v60 = vsel %vm3279_vm10, %v3258_v47, %v2932_v42  ;;  %v1894_v42 = vrot.slane %v1892_v44, 1  ;;  %v2919_v16 = vrot.slane %v2917_v15, 1  ;;  %v2393_v47 = vshll.u32 %v5101_v6, 16 }
 0x1e9   : > { %2055 = vrot.lane.b32.xlu1 %v2024_v7, %s5123_s22  ;;  %v5112_v7 = vld [vmem:[#allocation2 + $0xd0] sm:$0xf] }
 0x1ea   : > { %v3060_v10 = vpop.permute.xlu0 %3059  ;;  %v4675_v57 = vcombine.low %v1574_v33, %v5112_v7  ;;  %v1895_v63 = vsel %vm1703_vm9, %v1890_v54, %v1894_v42  ;;  %v2920_v6 = vsel %vm1703_vm9, %v2915_v21, %v2919_v16 }
 0x1eb   : > { %v6512_v35 = vpop.permute.xlu1 %1910  ;;  %v3324_v62 = vsel %vm3312_vm0, %v3291_v60, %v3060_v10  ;;  %v1573_v60 = vld [vmem:[#allocation2 + $0xc0] sm:$0xe]  ;;  %v6799_v10 = vld [vmem:[#allocation3_spill] sm:$0xff] }
 0x1ec   : > { %2165 = vrot.lane.b32.xlu0 %v6507_v29, %s5125_s26  ;;  %4864 = vmatmul.mubr.msk.bf16.gmra.mrb[8].mxu1 %vm3388_vm14, %v3324_v62  ;;  %v3095_v52 = vsel %vm3081_vm13, %v6799_v10, %v6350_v32  ;;  %v3046_v11 = vrot.slane %v4675_v57, 1  ;;  %v4674_v32 = vcombine.low %v1573_v60, %v6476_v37 }
 0x1ed   : > { %2439 = vrot.lane.b32.xlu1 %v2408_v3, %s5128_s29  ;;  %v3128_v62 = vsel %vm6800_vm11, %v3095_v52, %v6363_v19  ;;  %v2395_v19 = vrot.slane %v2393_v47, 1  ;;  %vm6810_vm11 = vmmov %vm6794_vm3 }
 0x1ee   : > { %v2550_v56 = vpop.permute.xlu0 %2549  ;;  %v3161_v29 = vsel %vm3147_vm15, %v3128_v62, %v6455_v12  ;;  %v3048_v37 = vsel %vm1976_vm8, %v3046_v11, %v3047_v14  ;;  %v3043_v23 = vrot.slane %v4674_v32, 1 }
 0x1ef   : > { %v6528_v13 = vpop.permute.xlu1 %2155  ;;  %v2396_v33 = vsel %vm1703_vm9, %v2391_v0, %v2395_v19  ;;  %vm6805_vm9 = vmmov %vm6794_vm3 }
 0x1f0   : > { %3075 = vrot.lane.b32.xlu0 %v3042_v31, %s5127_s28 }
 0x1f1   : > { %2947 = vrot.lane.b32.xlu1 %v2896_v39, %s5129_s11 }
 0x1f2   : > { %v2934_v1 = vpop.permute.xlu0 %2933 }
 0x1f3   : > { %v2664_v5 = vpop.permute.xlu1 %2663 }
 0x1f4   : > { %2565 = vrot.lane.b32.xlu0 %v2533_v22, %s5126_s27 }
 0x1f5   : > { %1926 = vrot.lane.b32.xlu1 %v1895_v63, %s5124_s23 }
 0x1f6   : > { %v2422_v3 = vpop.permute.xlu0 %2421 }
 0x1f7   : > { %v6551_v18 = vpop.permute.xlu1 %2555  ;;  %v3194_v50 = vsel %vm3180_vm1, %v3161_v29, %v2422_v3 }
 0x1f8   : > { %v3227_v44 = vsel %vm3213_vm2, %v3194_v50, %v2550_v56  ;;  %2949 = vrot.lane.b32.xlu0 %v2908_v2, %s5129_s11  ;;  %v3044_v56 = vrot.slane %v6517_v20, 1 }
 0x1f9   : > { %v3260_v12 = vsel %vm3246_vm6, %v3227_v44, %v6437_v9  ;;  %2951 = vrot.lane.b32.xlu1 %v2920_v6, %s5129_s11  ;;  %v3097_v9 = vsel %vm3081_vm13, %v6801_v28, %v6512_v35 }
 0x1fa   : > { %v2666_v40 = vpop.permute.xlu0 %2665  ;;  %v3293_v24 = vsel %vm3279_vm10, %v3260_v12, %v2934_v1  ;;  %v3130_v53 = vsel %vm6802_vm12, %v3097_v9, %v6442_v17  ;;  %vm6811_vm12 = vmmov %vm6794_vm3 }
 0x1fb   : > { %v2044_v61 = vpop.permute.xlu1 %2043  ;;  %v3326_v31 = vsel %vm3312_vm0, %v3293_v24, %v6473_v25  ;;  %v3045_v25 = vsel %vm1976_vm8, %v3043_v23, %v3044_v56  ;;  %v3163_v20 = vsel %vm3147_vm15, %v3130_v53, %v6398_v49  ;;  %vm6804_vm8 = vmmov %vm6794_vm3 }
 0x1fc   : > { %2437 = vrot.lane.b32.xlu0 %v2396_v33, %s5128_s29  ;;  %4867 = vmatprep.mubr.msk.bf16.mxu1 %vm3388_vm14, %v3326_v31  ;;  %v3196_v36 = vsel %vm3180_vm1, %v3163_v20, %v6464_v27  ;;  %v6803_v27 = vld [vmem:[#allocation4_spill] sm:$0xff]  ;;  %v6806_v31 = vld [vmem:[#allocation7_spill] sm:$0xff] }
 0x1fd   : > { %3079 = vrot.lane.b32.xlu1 %v3048_v37, %s5127_s28  ;;  %v3229_v42 = vsel %vm3213_vm2, %v3196_v36, %v6424_v41  ;;  %v3099_v8 = vsel %vm3081_vm13, %v6803_v27, %v6479_v45 }
 0x1fe   : > { %v2154_v15 = vpop.permute.xlu0 %2153  ;;  %v3262_v17 = vsel %vm3246_vm6, %v3229_v42, %v2664_v5  ;;  %v3132_v41 = vsel %vm6804_vm8, %v3099_v8, %v6490_v43 }
 0x1ff   : > { %v2428_v38 = vpop.permute.xlu1 %2427  ;;  %v3165_v5 = vsel %vm3147_vm15, %v3132_v41, %v2154_v15 }
 0x200   : > { %3077 = vrot.lane.b32.xlu0 %v3045_v25, %s5127_s28 }
 0x202   : > { %v3066_v4 = vpop.permute.xlu0 %3065 }
 0x203   : > { %v1917_v35 = vpop.permute.xlu1 %1916 }
 0x204   : > { %v3103_v23 = vsel %vm3081_vm13, %v6806_v31, %v1917_v35 }
 0x206   : > { %v2046_v39 = vpop.permute.xlu0 %2045 }
 0x207   : > { %v2936_v54 = vpop.permute.xlu1 %2935  ;;  %v3136_v56 = vsel %vm6794_vm3, %v3103_v23, %v2046_v39 }
 0x208   : > { %v3295_v7 = vsel %vm3279_vm10, %v3262_v17, %v2936_v54 }
 0x20a   : > { %v3064_v57 = vpop.permute.xlu0 %3063 }
 0x20b   : > { %v1915_v1 = vpop.permute.xlu1 %1914  ;;  %v3328_v22 = vsel %vm3312_vm0, %v3295_v7, %v3064_v57 }
 0x20c   : > { %4868 = vmatmul.mubr.msk.bf16.gmra.mrb[12].mxu1 %vm3388_vm14, %v3328_v22  ;;  %v3101_v45 = vsel %vm3081_vm13, %v5960_v59, %v1915_v1 }
 0x20d   : > { %v3134_v29 = vsel %vm6805_vm9, %v3101_v45, %v2044_v61 }
 0x20e   : > { %v2554_v49 = vpop.permute.xlu0 %2553  ;;  %v3167_v6 = vsel %vm3147_vm15, %v3134_v29, %v6528_v13 }
 0x20f   : > { %v2160_v21 = vpop.permute.xlu1 %2159  ;;  %v3200_v50 = vsel %vm3180_vm1, %v3167_v6, %v2428_v38 }
 0x210   : > { %v3233_v19 = vsel %vm3213_vm2, %v3200_v50, %v6551_v18 }
 0x212   : > { %v2938_v16 = vpop.permute.xlu0 %2937 }
 0x213   : > { %v2668_v46 = vpop.permute.xlu1 %2667 }
 0x214   : > { %v3266_v59 = vsel %vm3246_vm6, %v3233_v19, %v2668_v46 }
 0x216   : > { %v2426_v55 = vpop.permute.xlu0 %2425 }
 0x217   : > { %v2560_v34 = vpop.permute.xlu1 %2559  ;;  %v3198_v47 = vsel %vm3180_vm1, %v3165_v5, %v2426_v55 }
 0x218   : > { %v3231_v60 = vsel %vm3213_vm2, %v3198_v47, %v2554_v49 }
 0x219   : > { %v3264_v10 = vsel %vm3246_vm6, %v3231_v60, %v2666_v40 }
 0x21a   : > { %v2670_v52 = vpop.permute.xlu0 %2669  ;;  %v3297_v63 = vsel %vm3279_vm10, %v3264_v10, %v2938_v16 }
 0x21b   : > { %v2048_v11 = vpop.permute.xlu1 %2047  ;;  %v3330_v62 = vsel %vm3312_vm0, %v3297_v63, %v3066_v4 }
 0x21c   : > { %4871 = vmatprep.mubr.msk.bf16.mxu1 %vm3388_vm14, %v3330_v62 }
 0x21e   : > { %v2158_v43 = vpop.permute.xlu0 %2157 }
 0x21f   : > { %v2432_v3 = vpop.permute.xlu1 %2431  ;;  %v3169_v18 = vsel %vm3147_vm15, %v3136_v56, %v2158_v43 }
 0x222   : > { %v3070_v14 = vpop.permute.xlu0 %3069 }
 0x223   : > { %v1921_v32 = vpop.permute.xlu1 %1920 }
 0x224   : > { %v3107_v60 = vsel %vm3081_vm13, %v6152_v30, %v1921_v32 }
 0x226   : > { %v2050_v2 = vpop.permute.xlu0 %2049 }
 0x227   : > { %v2940_v0 = vpop.permute.xlu1 %2939  ;;  %v3140_v10 = vsel %vm6808_vm5, %v3107_v60, %v2050_v2 }
 0x228   : > { %v3299_v44 = vsel %vm3279_vm10, %v3266_v59, %v2940_v0 }
 0x22a   : > { %v3068_v12 = vpop.permute.xlu0 %3067 }
 0x22b   : > { %v1919_v40 = vpop.permute.xlu1 %1918  ;;  %v3332_v37 = vsel %vm3312_vm0, %v3299_v44, %v3068_v12 }
 0x22c   : > { %4872 = vmatmul.mubr.msk.bf16.gmra.mrb[16].mxu1 %vm3388_vm14, %v3332_v37  ;;  %v3105_v35 = vsel %vm3081_vm13, %v6179_v58, %v1919_v40 }
 0x22d   : > { %v3138_v54 = vsel %vm6807_vm4, %v3105_v35, %v2048_v11 }
 0x22e   : > { %v2558_v13 = vpop.permute.xlu0 %2557  ;;  %v3171_v17 = vsel %vm3147_vm15, %v3138_v54, %v2160_v21 }
 0x22f   : > { %v2164_v24 = vpop.permute.xlu1 %2163  ;;  %v3204_v1 = vsel %vm3180_vm1, %v3171_v17, %v2432_v3  ;;  %v6674_v17 = vld [vmem:[%s6764_s5] ss:$0 sm:$0xff] }
 0x230   : > { %v3237_v16 = vsel %vm3213_vm2, %v3204_v1, %v2560_v34 }
 0x232   : > { %v2942_v61 = vpop.permute.xlu0 %2941 }
 0x233   : > { %v2672_v33 = vpop.permute.xlu1 %2671 }
 0x234   : > { %v3270_v46 = vsel %vm3246_vm6, %v3237_v16, %v2672_v33 }
 0x236   : > { %v2430_v28 = vpop.permute.xlu0 %2429 }
 0x237   : > { %v2564_v9 = vpop.permute.xlu1 %2563  ;;  %v3202_v15 = vsel %vm3180_vm1, %v3169_v18, %v2430_v28 }
 0x238   : > { %v3235_v53 = vsel %vm3213_vm2, %v3202_v15, %v2558_v13 }
 0x239   : > { %v3268_v38 = vsel %vm3246_vm6, %v3235_v53, %v2670_v52  ;;  %v6812_v53 = vld [vmem:[#allocation6_spill] sm:$0xff] }
 0x23a   : > { %v2674_v25 = vpop.permute.xlu0 %2673  ;;  %v3301_v20 = vsel %vm3279_vm10, %v3268_v38, %v2942_v61 }
 0x23b   : > { %v2052_v4 = vpop.permute.xlu1 %2051  ;;  %v3334_v36 = vsel %vm3312_vm0, %v3301_v20, %v3070_v14 }
 0x23c   : > { %4875 = vmatprep.mubr.msk.bf16.mxu1 %vm3388_vm14, %v3334_v36 }
 0x23e   : > { %v2162_v39 = vpop.permute.xlu0 %2161 }
 0x23f   : > { %v2436_v42 = vpop.permute.xlu1 %2435  ;;  %v3173_v34 = vsel %vm3147_vm15, %v3140_v10, %v2162_v39 }
 0x242   : > { %v3074_v7 = vpop.permute.xlu0 %3073 }
 0x243   : > { %v1925_v57 = vpop.permute.xlu1 %1924 }
 0x244   : > { %v3111_v18 = vsel %vm3081_vm13, %v6341_v26, %v1925_v57 }
 0x246   : > { %v2054_v22 = vpop.permute.xlu0 %2053 }
 0x247   : > { %v2944_v49 = vpop.permute.xlu1 %2943 }
 0x248   : > { %v3303_v58 = vsel %vm3279_vm10, %v3270_v46, %v2944_v49 }
 0x24a   : > { %v3072_v27 = vpop.permute.xlu0 %3071 }
 0x24b   : > { %v1923_v8 = vpop.permute.xlu1 %1922  ;;  %v3336_v41 = vsel %vm3312_vm0, %v3303_v58, %v3072_v27 }
 0x24c   : > { %4876 = vmatmul.mubr.msk.bf16.gmra.mrb[20].mxu1 %vm3388_vm14, %v3336_v41  ;;  %v3109_v52 = vsel %vm3081_vm13, %v6369_v51, %v1923_v8 }
 0x24d   : > { %v3142_v43 = vsel %vm6809_vm7, %v3109_v52, %v2052_v4 }
 0x24e   : > { %v2562_v5 = vpop.permute.xlu0 %2561  ;;  %v3175_v32 = vsel %vm3147_vm15, %v3142_v43, %v2164_v24 }
 0x24f   : > { %v2168_v21 = vpop.permute.xlu1 %2167  ;;  %v3208_v50 = vsel %vm3180_vm1, %v3175_v32, %v2436_v42 }
 0x250   : > { %v3241_v0 = vsel %vm3213_vm2, %v3208_v50, %v2564_v9  ;;  %v3144_v9 = vsel %vm6811_vm12, %v3111_v18, %v2054_v22  ;;  %v3859_v50 = vld [vmem:[%s6767_s8 + $0x8] sm:$0xff] }
 0x252   : > { %v2946_v55 = vpop.permute.xlu0 %2945 }
 0x253   : > { %v2676_v47 = vpop.permute.xlu1 %2675 }
 0x254   : > { %v3274_v59 = vsel %vm3246_vm6, %v3241_v0, %v2676_v47 }
 0x256   : > { %v2434_v63 = vpop.permute.xlu0 %2433 }
 0x257   : > { %v2568_v11 = vpop.permute.xlu1 %2567  ;;  %v3206_v62 = vsel %vm3180_vm1, %v3173_v34, %v2434_v63 }
 0x258   : > { %v3239_v45 = vsel %vm3213_vm2, %v3206_v62, %v2562_v5 }
 0x259   : > { %v3272_v29 = vsel %vm3246_vm6, %v3239_v45, %v2674_v25 }
 0x25a   : > { %v2678_v3 = vpop.permute.xlu0 %2677  ;;  %v3305_v30 = vsel %vm3279_vm10, %v3272_v29, %v2946_v55 }
 0x25b   : > { %v2056_v6 = vpop.permute.xlu1 %2055  ;;  %v3338_v14 = vsel %vm3312_vm0, %v3305_v30, %v3074_v7 }
 0x25c   : > { %4879 = vmatprep.mubr.msk.bf16.mxu1 %vm3388_vm14, %v3338_v14 }
 0x25e   : > { %v2166_v51 = vpop.permute.xlu0 %2165 }
 0x25f   : > { %v2440_v2 = vpop.permute.xlu1 %2439  ;;  %v3177_v15 = vsel %vm3147_vm15, %v3144_v9, %v2166_v51  ;;  %v3858_v51 = vld [vmem:[%s6767_s8] sm:$0xff] }
 0x262   : > { %v3076_v19 = vpop.permute.xlu0 %3075 }
 0x263   : > { %v2948_v44 = vpop.permute.xlu1 %2947 }
 0x264   : > { %v3307_v12 = vsel %vm3279_vm10, %v3274_v59, %v2948_v44 }
 0x265   : > { %v3340_v40 = vsel %vm3312_vm0, %v3307_v12, %v3076_v19 }
 0x266   : > { %4880 = vmatmul.mubr.msk.bf16.gmra.mrb[24].mxu1 %vm3388_vm14, %v3340_v40  ;;  %v2566_v37 = vpop.permute.xlu0 %2565 }
 0x267   : > { %v1927_v13 = vpop.permute.xlu1 %1926 }
 0x268   : > { %v3113_v24 = vsel %vm3081_vm13, %v6484_v48, %v1927_v13 }
 0x269   : > { %v3146_v61 = vsel %vm6810_vm11, %v3113_v24, %v2056_v6 }
 0x26a   : > { %v3179_v33 = vsel %vm3147_vm15, %v3146_v61, %v2168_v21  ;;  %v2950_v31 = vpop.permute.xlu0 %2949 }
 0x26b   : > { %v3212_v23 = vsel %vm3180_vm1, %v3179_v33, %v2440_v2  ;;  %v2952_v56 = vpop.permute.xlu1 %2951  ;;  %v4913_v2 = vpack.c.bf16 %v3859_v50, %v3858_v51 }
 0x26c   : > { %v3245_v28 = vsel %vm3213_vm2, %v3212_v23, %v2568_v11 }
 0x26d   : > { %v3278_v48 = vsel %vm3246_vm6, %v3245_v28, %v6812_v53  ;;  %4914 = vmatprep.subr.bf16.mxu0 %v4913_v2 }
 0x26e   : > { %v2438_v38 = vpop.permute.xlu0 %2437  ;;  %v3311_v4 = vsel %vm3279_vm10, %v3278_v48, %v2952_v56  ;;  %4916 = vmatpush3.bf16.msra.mxu0 %v4913_v2 }
 0x26f   : > { %v3210_v25 = vsel %vm3180_vm1, %v3177_v15, %v2438_v38  ;;  %v3080_v36 = vpop.permute.xlu1 %3079  ;;  %vm6816_vm1 = vcmask 1041408  }
 0x270   : > { %v3243_v20 = vsel %vm3213_vm2, %v3210_v25, %v2566_v37  ;;  %v3344_v42 = vsel %vm3312_vm0, %v3311_v4, %v3080_v36  ;;  %vm6817_vm2 = vmmov %vm6816_vm1 }
 0x271   : > { %v3276_v35 = vsel %vm3246_vm6, %v3243_v20, %v2678_v3  ;;  %vm4289_vm6 = vcmask 31744  }
 0x272   : > { %v3309_v26 = vsel %vm3279_vm10, %v3276_v35, %v2950_v31  ;;  %v3078_v39 = vpop.permute.xlu0 %3077 }
 0x273   : > { %v3342_v54 = vsel %vm3312_vm0, %v3309_v26, %v3078_v39  ;;  %vm6813_vm0 = vmmov %vm6794_vm3 }
 0x274   : > { %4883 = vmatprep.mubr.msk.bf16.mxu1 %vm3388_vm14, %v3342_v54  ;;  %vm6815_vm15 = vmmov %vm6813_vm0 }
 0x275   : > { %4884 = vmatmul.mubr.msk.bf16.gmra.mrb[28].mxu1 %vm3388_vm14, %v3344_v42  ;;  %vm6814_vm14 = vmmov %vm6813_vm0 }
 0x276   : > { %vm6818_vm10 = vmmov %vm6813_vm0 }
 0x277   : > { %vm6819_vm8 = vmmov %vm6813_vm0 }
 0x278   : > { %vm6820_vm9 = vmmov %vm6813_vm0 }
 0x279   : > { %vm6821_vm3 = vmmov %vm6813_vm0 }
 0x27a   : > { %vm6822_vm4 = vmmov %vm6813_vm0 }
 0x27f   : > { %v4857_v7 = vpop.f32.mrb[0].mxu1 }
 0x280   : > { %v3468_v57 = vadd.f32 %v4857_v7, %v6674_v17  ;;  %v3459_v1 = vpop.f32.mrb[1].mxu1 }
 0x281   : > { %v3460_v22 = vadd.f32 %v6674_v17, %v3459_v1  ;;  %v4858_v49 = vpop.f32.mrb[2].mxu1 }
 0x282   : > { %v3471_v16 = vadd.f32 %v4858_v49, %v6674_v17  ;;  %v3462_v46 = vpop.f32.mrb[3].mxu1 }
 0x283   : > { %v3586_v58 = vadd.f32 %v3468_v57, %v3460_v22  ;;  %v3463_v27 = vadd.f32 %v6674_v17, %v3462_v46 }
 0x285   : > { %v3587_v8 = vadd.f32 %v3471_v16, %v3463_v27  ;;  %3602 = vxpose.xlu0.b32.start [1/2] (short) (narrow) %v3586_v58, 8 }
 0x289   : > { %3603 = vxpose.xlu0.b32.end [2/2] (short) (narrow) %v3587_v8, 8 }
 0x29f   : > { %v4861_v41 = vpop.f32.mrb[4].mxu1 }
 0x2a0   : > { %v3484_v5 = vadd.f32 %v4861_v41, %v6674_v17  ;;  %v3475_v21 = vpop.f32.mrb[5].mxu1 }
 0x2a1   : > { %v3476_v55 = vadd.f32 %v6674_v17, %v3475_v21  ;;  %v4862_v47 = vpop.f32.mrb[6].mxu1 }
 0x2a2   : > { %v3487_v60 = vadd.f32 %v4862_v47, %v6674_v17  ;;  %v3478_v10 = vpop.f32.mrb[7].mxu1 }
 0x2a3   : > { %v3588_v34 = vadd.f32 %v3484_v5, %v3476_v55  ;;  %v3479_v52 = vadd.f32 %v6674_v17, %v3478_v10 }
 0x2a5   : > { %v3589_v63 = vadd.f32 %v3487_v60, %v3479_v52  ;;  %3634 = vxpose.xlu1.b32.start [1/2] (short) (narrow) %v3588_v34, 8 }
 0x2a9   : > { %3635 = vxpose.xlu1.b32.end [2/2] (short) (narrow) %v3589_v63, 8 }
 0x2bf   : > { %v4865_v11 = vpop.f32.mrb[8].mxu1 }
 0x2c0   : > { %v3500_v62 = vadd.f32 %v4865_v11, %v6674_v17  ;;  %v3491_v45 = vpop.f32.mrb[9].mxu1 }
 0x2c1   : > { %v3492_v43 = vadd.f32 %v6674_v17, %v3491_v45  ;;  %v4866_v29 = vpop.f32.mrb[10].mxu1 }
 0x2c2   : > { %v3503_v3 = vadd.f32 %v4866_v29, %v6674_v17  ;;  %v3494_v30 = vpop.f32.mrb[11].mxu1 }
 0x2c3   : > { %v3590_v6 = vadd.f32 %v3500_v62, %v3492_v43  ;;  %v3495_v14 = vadd.f32 %v6674_v17, %v3494_v30  ;;  %v4261_v43 = vld [vmem:[%s6765_s6] sm:$0x3]  ;;  %v5108_v30 = vld [vmem:[%s347_s18 + $0x10] sm:$0xff]  }
 0x2c4   : > { %4919 = vmatprep.subr.msk.bf16.mxu1 %vm6816_vm1, %v4261_v43  ;;  %v4303_v29 = vsel %vm6817_vm2, %v4261_v43, 0 }
 0x2c5   : > { %v3591_v32 = vadd.f32 %v3503_v3, %v3495_v14  ;;  %3666 = vxpose.xlu0.b32.start [1/2] (short) (narrow) %v3590_v6, 8  ;;  %4904 = vmatpush3.bf16.msra.mxu1 %v4303_v29  ;;  %v5106_v3 = vld [vmem:[%s347_s18] sm:$0xff]   ;;  %v5109_v6 = vld [vmem:[%s347_s18 + $0x18] sm:$0xff]  }
 0x2c6   : > { %4905 = vmatprep.mubr.msk.bf16.mxu1 %vm4289_vm6, %v5106_v3 }
 0x2c9   : > { %3667 = vxpose.xlu0.b32.end [2/2] (short) (narrow) %v3591_v32, 8 }
 0x2df   : > { %v4869_v0 = vpop.f32.mrb[12].mxu1 }
 0x2e0   : > { %v3516_v19 = vadd.f32 %v4869_v0, %v6674_v17  ;;  %v3507_v59 = vpop.f32.mrb[13].mxu1 }
 0x2e1   : > { %v3508_v44 = vadd.f32 %v6674_v17, %v3507_v59  ;;  %v4870_v12 = vpop.f32.mrb[14].mxu1 }
 0x2e2   : > { %v3519_v40 = vadd.f32 %v4870_v12, %v6674_v17  ;;  %v3510_v37 = vpop.f32.mrb[15].mxu1 }
 0x2e3   : > { %v3592_v13 = vadd.f32 %v3516_v19, %v3508_v44  ;;  %v3511_v24 = vadd.f32 %v6674_v17, %v3510_v37 }
 0x2e5   : > { %v3593_v61 = vadd.f32 %v3519_v40, %v3511_v24  ;;  %3698 = vxpose.xlu0.b32.start [1/2] (short) (narrow) %v3592_v13, 8 }
 0x2e9   : > { %3699 = vxpose.xlu0.b32.end [2/2] (short) (narrow) %v3593_v61, 8 }
 0x2ff   : > { %v4873_v33 = vpop.f32.mrb[16].mxu1 }
 0x300   : > { %v3532_v31 = vadd.f32 %v4873_v33, %v6674_v17  ;;  %v3523_v23 = vpop.f32.mrb[17].mxu1 }
 0x301   : > { %v3524_v56 = vadd.f32 %v6674_v17, %v3523_v23  ;;  %v4874_v18 = vpop.f32.mrb[18].mxu1 }
 0x302   : > { %v3535_v28 = vadd.f32 %v4874_v18, %v6674_v17  ;;  %v3526_v9 = vpop.f32.mrb[19].mxu1 }
 0x303   : > { %v3594_v15 = vadd.f32 %v3532_v31, %v3524_v56  ;;  %v3527_v53 = vadd.f32 %v6674_v17, %v3526_v9  ;;  %v4706_v31 = vld [vmem:[%s6766_s7] ss:$0 sm:$0xff] }
 0x305   : > { %v3595_v48 = vadd.f32 %v3535_v28, %v3527_v53  ;;  %3730 = vxpose.xlu1.b32.start [1/2] (short) (narrow) %v3594_v15, 8  ;;  %v3618_v38 = vpop.trf.xlu0 }
 0x306   : > { %4891 = vmatprep.mubr.msk.f32.mxu0 %vm6813_vm0, %v3618_v38 }
 0x309   : > { %3731 = vxpose.xlu1.b32.end [2/2] (short) (narrow) %v3595_v48, 8 }
 0x31f   : > { %v4877_v25 = vpop.f32.mrb[20].mxu1 }
 0x320   : > { %v3548_v20 = vadd.f32 %v4877_v25, %v6674_v17  ;;  %v3539_v4 = vpop.f32.mrb[21].mxu1 }
 0x321   : > { %v3540_v36 = vadd.f32 %v6674_v17, %v3539_v4  ;;  %v4878_v35 = vpop.f32.mrb[22].mxu1 }
 0x322   : > { %v3551_v26 = vadd.f32 %v4878_v35, %v6674_v17  ;;  %v3542_v39 = vpop.f32.mrb[23].mxu1 }
 0x323   : > { %v3596_v54 = vadd.f32 %v3548_v20, %v3540_v36  ;;  %v3543_v42 = vadd.f32 %v6674_v17, %v3542_v39 }
 0x325   : > { %v3597_v7 = vadd.f32 %v3551_v26, %v3543_v42  ;;  %3762 = vxpose.xlu0.b32.start [1/2] (short) (narrow) %v3596_v54, 8  ;;  %v3650_v57 = vpop.trf.xlu1 }
 0x326   : > { %4892 = vmatmul.mubr.msk.f32.vlgmr.msra.gmra.mrb[32].mxu0 %vm6814_vm14, %v3650_v57 }
 0x329   : > { %3763 = vxpose.xlu0.b32.end [2/2] (short) (narrow) %v3597_v7, 8 }
 0x339   : > { %v4881_v1 = vpop.f32.mrb[24].mxu1 }
 0x33a   : > { %v3564_v22 = vadd.f32 %v4881_v1, %v6674_v17  ;;  %v3555_v49 = vpop.f32.mrb[25].mxu1 }
 0x33b   : > { %v3556_v16 = vadd.f32 %v6674_v17, %v3555_v49  ;;  %v4882_v46 = vpop.f32.mrb[26].mxu1 }
 0x33c   : > { %v3567_v58 = vadd.f32 %v4882_v46, %v6674_v17  ;;  %v3558_v27 = vpop.f32.mrb[27].mxu1 }
 0x33d   : > { %v3598_v8 = vadd.f32 %v3564_v22, %v3556_v16  ;;  %v3559_v41 = vadd.f32 %v6674_v17, %v3558_v27 }
 0x33f   : > { %v3599_v5 = vadd.f32 %v3567_v58, %v3559_v41  ;;  %3794 = vxpose.xlu1.b32.start [1/2] (short) (narrow) %v3598_v8, 8 }
 0x343   : > { %3795 = vxpose.xlu1.b32.end [2/2] (short) (narrow) %v3599_v5, 8 }
 0x345   : > { %v3682_v21 = vpop.trf.xlu0 }
 0x346   : > { %4894 = vmatprep.mubr.msk.f32.mxu0 %vm6815_vm15, %v3682_v21 }
 0x348   : > { %v4885_v55 = vpop.f32.mrb[28].mxu1 }
 0x349   : > { %v3580_v47 = vadd.f32 %v4885_v55, %v6674_v17  ;;  %v3571_v60 = vpop.f32.mrb[29].mxu1 }
 0x34a   : > { %v3572_v10 = vadd.f32 %v6674_v17, %v3571_v60  ;;  %v4886_v34 = vpop.f32.mrb[30].mxu1 }
 0x34b   : > { %v3583_v52 = vadd.f32 %v4886_v34, %v6674_v17  ;;  %v3574_v63 = vpop.f32.mrb[31].mxu1 }
 0x34c   : > { %v3600_v11 = vadd.f32 %v3580_v47, %v3572_v10  ;;  %v3575_v62 = vadd.f32 %v6674_v17, %v3574_v63  ;;  %v5107_v17 = vld [vmem:[%s347_s18 + $0x8] sm:$0xff]  }
 0x34d   : > { %4906 = vmatmul.mubr.msk.bf16.vlgmr.msra.gmra.mrb[32].mxu1 %vm4289_vm6, %v5107_v17 }
 0x34e   : > { %v3601_v45 = vadd.f32 %v3583_v52, %v3575_v62  ;;  %3826 = vxpose.xlu0.b32.start [1/2] (short) (narrow) %v3600_v11, 8  ;;  %4909 = vmatprep.mubr.msk.bf16.mxu1 %vm4289_vm6, %v5108_v30 }
 0x352   : > { %3827 = vxpose.xlu0.b32.end [2/2] (short) (narrow) %v3601_v45, 8 }
 0x355   : > { %4910 = vmatmul.mubr.msk.bf16.gmra.mrb[36].mxu1 %vm4289_vm6, %v5109_v6 }
 0x365   : > { %v3714_v14 = vpop.trf.xlu0 }
 0x366   : > { %4895 = vmatmul.mubr.msk.f32.gmra.mrb[34].mxu0 %vm6818_vm10, %v3714_v14 }
 0x385   : > { %v3746_v32 = vpop.trf.xlu1 }
 0x386   : > { %4897 = vmatprep.mubr.msk.f32.mxu0 %vm6819_vm8, %v3746_v32 }
 0x3a5   : > { %v3778_v51 = vpop.trf.xlu0 }
 0x3a6   : > { %4898 = vmatmul.mubr.msk.f32.gmra.mrb[36].mxu0 %vm6820_vm9, %v3778_v51 }
 0x3bf   : > { %v3810_v50 = vpop.trf.xlu1 }
 0x3c0   : > { %4900 = vmatprep.mubr.msk.f32.mxu0 %vm6821_vm3, %v3810_v50 }
 0x3ce   : > { %v3842_v2 = vpop.trf.xlu0 }
 0x3cf   : > { %4901 = vmatmul.mubr.msk.f32.gmra.mrb[38].mxu0 %vm6822_vm4, %v3842_v2 }
 0x3f9   : > { %v4893_v0 = vpop.f32.mrb[32].mxu0 }
 0x3fa   : > { %4021 = vxpose.xlu1.b32.start.end [1/1] (short) (narrow) %v4893_v0, 8  ;;  %v3950_v19 = vpop.f32.mrb[33].mxu0 }
 0x3fe   : > { %3989 = vxpose.xlu1.b32.start.end [1/1] (short) (narrow) %v3950_v19, 8 }
 0x420   : > { %v4907_v59 = vpop.f32.mrb[32].mxu1 }
 0x421   : > { %v4339_v44 = vpop.f32.mrb[33].mxu1  ;;  %v4348_v26 = vadd.f32 %v4907_v59, %v4706_v31 }
 0x422   : > { %v4908_v12 = vpop.f32.mrb[34].mxu1  ;;  %v4340_v53 = vadd.f32 %v4706_v31, %v4339_v44 }
 0x423   : > { %v4342_v40 = vpop.f32.mrb[35].mxu1  ;;  %v4351_v35 = vadd.f32 %v4908_v12, %v4706_v31 }
 0x424   : > { %v4343_v56 = vadd.f32 %v4706_v31, %v4342_v40 }
 0x428   : > { %v4911_v24 = vpop.f32.mrb[36].mxu1 }
 0x429   : > { %v4355_v61 = vpop.f32.mrb[37].mxu1  ;;  %v4364_v60 = vadd.f32 %v4911_v24, %v4706_v31 }
 0x42a   : > { %v4912_v33 = vpop.f32.mrb[38].mxu1  ;;  %v4356_v49 = vadd.f32 %v4706_v31, %v4355_v61 }
 0x42b   : > { %v4358_v15 = vpop.f32.mrb[39].mxu1  ;;  %v4367_v21 = vadd.f32 %v4912_v33, %v4706_v31 }
 0x42c   : > { %v4359_v22 = vadd.f32 %v4706_v31, %v4358_v15 }
 0x439   : > { %v4896_v37 = vpop.f32.mrb[34].mxu0 }
 0x43a   : > { %v3960_v13 = vpop.f32.mrb[35].mxu0  ;;  %4085 = vxpose.xlu1.b32.start.end [1/1] (short) (narrow) %v4896_v37, 8 }
 0x43b   : > { %4053 = vxpose.xlu0.b32.start.end [1/1] (short) (narrow) %v3960_v13, 8 }
 0x479   : > { %v4899_v23 = vpop.f32.mrb[36].mxu0 }
 0x47a   : > { %v3970_v18 = vpop.f32.mrb[37].mxu0  ;;  %4149 = vxpose.xlu1.b32.start.end [1/1] (short) (narrow) %v4899_v23, 8  ;;  %v4037_v28 = vpop.trf.xlu1 }
 0x47b   : > { %4117 = vxpose.xlu0.b32.start.end [1/1] (short) (narrow) %v3970_v18, 8  ;;  %v4246_v9 = vmul.f32 0.25, %v4037_v28 }
 0x47d   : > { %v4371_v48 = vadd.f32 %v4343_v56, %v4246_v9 }
 0x47e   : > { %v4005_v38 = vpop.trf.xlu1 }
 0x47f   : > { %4379 = vst.msk [vmem:[%s6738_s13 + $0x8] sm:$0xff] %vm3081_vm13, %v4371_v48  ;;  %v4245_v25 = vmul.f32 0.25, %v4005_v38 }
 0x481   : > { %v4370_v20 = vadd.f32 %v4340_v53, %v4245_v25 }
 0x483   : > { %4378 = vst.msk [vmem:[%s6738_s13] sm:$0xff] %vm3081_vm13, %v4370_v20 }
 0x4a2   : > { %v4902_v4 = vpop.f32.mrb[38].mxu0 }
 0x4a3   : > { %4213 = vxpose.xlu1.b32.start.end [1/1] (short) (narrow) %v4902_v4, 8  ;;  %v3980_v36 = vpop.f32.mrb[39].mxu0 }
 0x4a4   : > { %4181 = vxpose.xlu0.b32.start.end [1/1] (short) (narrow) %v3980_v36, 8 }
 0x4ba   : > { %v4101_v39 = vpop.trf.xlu1 }
 0x4bb   : > { %v4248_v54 = vmul.f32 0.25, %v4101_v39  ;;  %v4069_v42 = vpop.trf.xlu0 }
 0x4bc   : > { %v4247_v7 = vmul.f32 0.25, %v4069_v42 }
 0x4bd   : > { %v4373_v57 = vadd.f32 %v4351_v35, %v4248_v54 }
 0x4be   : > { %v4372_v1 = vadd.f32 %v4348_v26, %v4247_v7 }
 0x4bf   : > { %4381 = vst.msk [vmem:[%s6738_s13 + $0x18] sm:$0xff] %vm3081_vm13, %v4373_v57 }
 0x4c0   : > { %4380 = vst.msk [vmem:[%s6738_s13 + $0x10] sm:$0xff] %vm3081_vm13, %v4372_v1 }
 0x4fa   : > { %v4165_v16 = vpop.trf.xlu1 }
 0x4fb   : > { %v4250_v46 = vmul.f32 0.25, %v4165_v16  ;;  %v4133_v58 = vpop.trf.xlu0 }
 0x4fc   : > { %v4249_v27 = vmul.f32 0.25, %v4133_v58 }
 0x4fd   : > { %v4375_v8 = vadd.f32 %v4359_v22, %v4250_v46 }
 0x4fe   : > { %v4374_v41 = vadd.f32 %v4356_v49, %v4249_v27 }
 0x4ff   : > { %4383 = vst.msk [vmem:[%s6738_s13 + $0x28] sm:$0xff] %vm3081_vm13, %v4375_v8 }
 0x500   : > { %4382 = vst.msk [vmem:[%s6738_s13 + $0x20] sm:$0xff] %vm3081_vm13, %v4374_v41 }
 0x523   : > { %v4229_v5 = vpop.trf.xlu1 }
 0x524   : > { %v4252_v55 = vmul.f32 0.25, %v4229_v5  ;;  %v4197_v47 = vpop.trf.xlu0 }
 0x525   : > { %v4251_v10 = vmul.f32 0.25, %v4197_v47 }
 0x526   : > { %v4377_v34 = vadd.f32 %v4367_v21, %v4252_v55 }
 0x527   : > { %v4376_v52 = vadd.f32 %v4364_v60, %v4251_v10 }
 0x528   : > { %4385 = vst.msk [vmem:[%s6738_s13 + $0x38] sm:$0xff] %vm3081_vm13, %v4377_v34 }
 0x529   : > { %4384 = vst.msk [vmem:[%s6738_s13 + $0x30] sm:$0xff] %vm3081_vm13, %v4376_v52 }
 0x52a PF: > { %s19_s30 = sadd.s32 1, %s5119_s30  }
 0x52b   : > { %p16_p4 = scmp.ge.s32.totalorder %s19_s30, 4  }
 0x52d   :  { %18 = sbr.rel (!%p16_p4) target bundleno = 1 (0x1), region = 92 }

</bundles_post_ra>
